<compile_context>
chip_gen: v7x
topology: tpu7x:2x2x1
jax: 0.10.0
libtpu: 0.0.40
codegen_flags: <defaults>
</compile_context>

<pallas_src>
import numpy as np
import jax
import jax.numpy as jnp
from jax.experimental import pallas as pl
from jax.experimental.pallas import tpu as pltpu


def _make_dlrm_kernel(tb: int, n: int, p_pad: int):
    def kernel(li_ref, lj_ref, x_ref, o_ref):
        # li_ref, lj_ref: (p_pad, 1) int32  row/col index of each lower-tri pair
        # x_ref        : (tb, n, d)         one batch tile, native dtype
        # o_ref        : (tb, p_pad)
        col = jax.lax.broadcasted_iota(jnp.int32, (p_pad, n), 1)
        sel_dt = x_ref.dtype
        ri = (col == li_ref[...]).astype(sel_dt)     # (p_pad, n) one-hot: picks row li[p]
        rj = (col == lj_ref[...]).astype(sel_dt)     # (p_pad, n) one-hot: picks row lj[p]
        for b in range(tb):                          # static unroll over the batch tile
            xb = x_ref[b]                            # (n, d), native dtype -> MXU
            xl = jnp.dot(ri, xb, preferred_element_type=jnp.float32)  # (p_pad, d) = x[li]
            xr = jnp.dot(rj, xb, preferred_element_type=jnp.float32)  # (p_pad, d) = x[lj]
            # out[p] = <x[li[p]], x[lj[p]]>; reduction over the lane-dense D axis.
            o_ref[b, :] = jnp.sum(xl * xr, axis=-1).astype(o_ref.dtype)

    return kernel


def dlrm_interaction(inputs: jax.Array, block_b=None) -> jax.Array:
    """inputs: [B, N, D] -> [B, N*(N-1)//2], strict lower triangle of X @ X^T."""
    B, N, D = inputs.shape
    P = N * (N - 1) // 2
    if P == 0:
        return jnp.zeros((B, 0), dtype=inputs.dtype)

    # Strict-lower-triangle index pairs, exactly as the PyTorch module builds them.
    li = np.asarray([i for i in range(N) for j in range(i)], dtype=np.int32)
    lj = np.asarray([j for i in range(N) for j in range(i)], dtype=np.int32)

    # Pad the pair axis to a multiple of 128 so output stores are lane-dense.
    P_pad = ((P + 127) // 128) * 128
    li_p = np.zeros((P_pad, 1), dtype=np.int32)
    lj_p = np.zeros((P_pad, 1), dtype=np.int32)
    li_p[:P, 0] = li
    lj_p[:P, 0] = lj

    # Batch tile: amortizes per-grid-step overhead; padded rows are sliced away.
    TB = int(block_b) if block_b is not None else min(B, 64)
    n_tiles = -(-B // TB)
    B_pad = n_tiles * TB
    x = inputs if B_pad == B else jnp.pad(inputs, ((0, B_pad - B), (0, 0), (0, 0)))

    itemsize = jnp.dtype(inputs.dtype).itemsize
    cost = pl.CostEstimate(
        flops=B * P * D * (4 * N + 2),          # two selection matmuls + mul/add reduce
        transcendentals=0,
        bytes_accessed=B * N * D * itemsize + B * P * itemsize + 2 * P * 4,
    )

    out = pl.pallas_call(
        _make_dlrm_kernel(TB, N, P_pad),
        out_shape=jax.ShapeDtypeStruct((B_pad, P_pad), inputs.dtype),
        grid_spec=pltpu.PrefetchScalarGridSpec(
            num_scalar_prefetch=0,
            grid=(B_pad // TB,),
            in_specs=[
                pl.BlockSpec((P_pad, 1), lambda i: (0, 0)),      # li (fetched once)
                pl.BlockSpec((P_pad, 1), lambda i: (0, 0)),      # lj (fetched once)
                pl.BlockSpec((TB, N, D), lambda i: (i, 0, 0)),   # batch tile
            ],
            out_specs=pl.BlockSpec((TB, P_pad), lambda i: (i, 0)),
        ),
        compiler_params=pltpu.CompilerParams(
            dimension_semantics=("parallel",),   # shard batch tiles across TensorCores
            vmem_limit_bytes=32 * 1024 * 1024,
        ),
        cost_estimate=cost,
    )(jnp.asarray(li_p), jnp.asarray(lj_p), x)

    return out[:B, :P]


def dlrm_reference(inputs: jax.Array) -> jax.Array:
    """Pure-JAX reference matching the PyTorch forward (full f32 precision)."""
    B, N, D = inputs.shape
    z = jnp.einsum("bnd,bmd->bnm", inputs, inputs,
                   precision=jax.lax.Precision.HIGHEST)
    li = jnp.asarray([i for i in range(N) for j in range(i)], dtype=jnp.int32)
    lj = jnp.asarray([j for i in range(N) for j in range(i)], dtype=jnp.int32)
    return z[:, li, lj]


if __name__ == "__main__":
    B, N, D = 16, 8, 32
    key = jax.random.PRNGKey(0)
    x = jax.random.normal(key, (B, N, D), dtype=jnp.float32)

    # float32 path
    out = jax.block_until_ready(dlrm_interaction(x))
    ref = dlrm_reference(x)
    assert out.shape == (B, N * (N - 1) // 2), out.shape
    np.testing.assert_allclose(np.asarray(out), np.asarray(ref), rtol=1e-5, atol=1e-4)

    # bfloat16 fast path (MXU-native, f32 accumulation); compare against f32 reference.
    xb = x.astype(jnp.bfloat16)
    out_b = jax.block_until_ready(dlrm_interaction(xb))
    assert out_b.dtype == jnp.bfloat16, out_b.dtype
    ref_b = dlrm_reference(xb.astype(jnp.float32))
    np.testing.assert_allclose(np.asarray(out_b, dtype=np.float32),
                               np.asarray(ref_b), rtol=2e-2, atol=5e-2)

    print("KERNEL_OK")
</pallas_src>

<mosaic_0001>
module attributes {stable_mosaic.version = 11 : i64} {
  func.func @kernel(%arg0: i32, %arg1: memref<128x1xi32, #tpu.memory_space<vmem>>, %arg2: memref<128x1xi32, #tpu.memory_space<vmem>>, %arg3: memref<16x8x32xf32, #tpu.memory_space<vmem>>, %arg4: memref<16x128xf32, #tpu.memory_space<vmem>>) attributes {dimension_semantics = [#tpu.dimension_semantics<parallel>], iteration_bounds = array<i64: 1>, scalar_prefetch = 0 : i64, scratch_operands = 0 : i64, tpu.core_type = #tpu.core_type<tc>, window_params = [{pipeline_mode = #tpu.pipeline_mode<synchronous>, transform_indices = @transform_0, window_bounds = array<i64: 128, 1>}, {pipeline_mode = #tpu.pipeline_mode<synchronous>, transform_indices = @transform_1, window_bounds = array<i64: 128, 1>}, {transform_indices = @transform_2, window_bounds = array<i64: 16, 8, 32>}, {transform_indices = @transform_3, window_bounds = array<i64: 16, 128>}]} {
    %0 = tpu.iota {dimensions = array<i32: 1>} : vector<128x8xi32>
    %c0 = arith.constant 0 : index
    %c0_0 = arith.constant 0 : index
    %1 = vector.load %arg1[%c0, %c0_0] : memref<128x1xi32, #tpu.memory_space<vmem>>, vector<128x1xi32>
    %2 = vector.broadcast %1 : vector<128x1xi32> to vector<128x8xi32>
    %3 = arith.cmpi eq, %0, %2 : vector<128x8xi32>
    %4 = arith.extui %3 : vector<128x8xi1> to vector<128x8xi32>
    %5 = arith.sitofp %4 : vector<128x8xi32> to vector<128x8xf32>
    %c0_1 = arith.constant 0 : index
    %c0_2 = arith.constant 0 : index
    %6 = vector.load %arg2[%c0_1, %c0_2] : memref<128x1xi32, #tpu.memory_space<vmem>>, vector<128x1xi32>
    %7 = vector.broadcast %6 : vector<128x1xi32> to vector<128x8xi32>
    %8 = arith.cmpi eq, %0, %7 : vector<128x8xi32>
    %9 = arith.extui %8 : vector<128x8xi1> to vector<128x8xi32>
    %10 = arith.sitofp %9 : vector<128x8xi32> to vector<128x8xf32>
    %c0_3 = arith.constant 0 : index
    %c0_4 = arith.constant 0 : index
    %c0_5 = arith.constant 0 : index
    %11 = vector.load %arg3[%c0_3, %c0_4, %c0_5] : memref<16x8x32xf32, #tpu.memory_space<vmem>>, vector<1x8x32xf32>
    %12 = vector.shape_cast %11 : vector<1x8x32xf32> to vector<8x32xf32>
    %cst = arith.constant dense<0.000000e+00> : vector<128x32xf32>
    %13 = tpu.matmul %5, %12, %cst {dimension_numbers = #tpu.dot_dimension_numbers<[1], [0], [0], [1], [0, 0, 1, 1], [], []>} : vector<128x8xf32>, vector<8x32xf32>, vector<128x32xf32> -> vector<128x32xf32>
    %cst_6 = arith.constant dense<0.000000e+00> : vector<128x32xf32>
    %14 = tpu.matmul %10, %12, %cst_6 {dimension_numbers = #tpu.dot_dimension_numbers<[1], [0], [0], [1], [0, 0, 1, 1], [], []>} : vector<128x8xf32>, vector<8x32xf32>, vector<128x32xf32> -> vector<128x32xf32>
    %15 = arith.mulf %13, %14 : vector<128x32xf32>
    %cst_7 = arith.constant dense<0.000000e+00> : vector<128xf32>
    %16 = vector.multi_reduction <add>, %15, %cst_7 [1] : vector<128x32xf32> to vector<128xf32>
    %c0_8 = arith.constant 0 : index
    %c0_9 = arith.constant 0 : index
    %17 = vector.load %arg4[%c0_8, %c0_9] : memref<16x128xf32, #tpu.memory_space<vmem>>, vector<1x128xf32>
    %18 = vector.shape_cast %17 : vector<1x128xf32> to vector<128xf32>
    %19 = vector.shape_cast %16 : vector<128xf32> to vector<1x128xf32>
    tpu.vector_store %arg4[%c0_8, %c0_9], %19 {strides = array<i32>} : memref<16x128xf32, #tpu.memory_space<vmem>>, vector<1x128xf32>,
    %c1 = arith.constant 1 : index
    %c0_10 = arith.constant 0 : index
    %c0_11 = arith.constant 0 : index
    %20 = vector.load %arg3[%c1, %c0_10, %c0_11] : memref<16x8x32xf32, #tpu.memory_space<vmem>>, vector<1x8x32xf32>
    %21 = vector.shape_cast %20 : vector<1x8x32xf32> to vector<8x32xf32>
    %cst_12 = arith.constant dense<0.000000e+00> : vector<128x32xf32>
    %22 = tpu.matmul %5, %21, %cst_12 {dimension_numbers = #tpu.dot_dimension_numbers<[1], [0], [0], [1], [0, 0, 1, 1], [], []>} : vector<128x8xf32>, vector<8x32xf32>, vector<128x32xf32> -> vector<128x32xf32>
    %cst_13 = arith.constant dense<0.000000e+00> : vector<128x32xf32>
    %23 = tpu.matmul %10, %21, %cst_13 {dimension_numbers = #tpu.dot_dimension_numbers<[1], [0], [0], [1], [0, 0, 1, 1], [], []>} : vector<128x8xf32>, vector<8x32xf32>, vector<128x32xf32> -> vector<128x32xf32>
    %24 = arith.mulf %22, %23 : vector<128x32xf32>
    %cst_14 = arith.constant dense<0.000000e+00> : vector<128xf32>
    %25 = vector.multi_reduction <add>, %24, %cst_14 [1] : vector<128x32xf32> to vector<128xf32>
    %c1_15 = arith.constant 1 : index
    %c0_16 = arith.constant 0 : index
    %26 = vector.load %arg4[%c1_15, %c0_16] : memref<16x128xf32, #tpu.memory_space<vmem>>, vector<1x128xf32>
    %27 = vector.shape_cast %26 : vector<1x128xf32> to vector<128xf32>
    %28 = vector.shape_cast %25 : vector<128xf32> to vector<1x128xf32>
    tpu.vector_store %arg4[%c1_15, %c0_16], %28 {strides = array<i32>} : memref<16x128xf32, #tpu.memory_space<vmem>>, vector<1x128xf32>,
    %c2 = arith.constant 2 : index
    %c0_17 = arith.constant 0 : index
    %c0_18 = arith.constant 0 : index
    %29 = vector.load %arg3[%c2, %c0_17, %c0_18] : memref<16x8x32xf32, #tpu.memory_space<vmem>>, vector<1x8x32xf32>
    %30 = vector.shape_cast %29 : vector<1x8x32xf32> to vector<8x32xf32>
    %cst_19 = arith.constant dense<0.000000e+00> : vector<128x32xf32>
    %31 = tpu.matmul %5, %30, %cst_19 {dimension_numbers = #tpu.dot_dimension_numbers<[1], [0], [0], [1], [0, 0, 1, 1], [], []>} : vector<128x8xf32>, vector<8x32xf32>, vector<128x32xf32> -> vector<128x32xf32>
    %cst_20 = arith.constant dense<0.000000e+00> : vector<128x32xf32>
    %32 = tpu.matmul %10, %30, %cst_20 {dimension_numbers = #tpu.dot_dimension_numbers<[1], [0], [0], [1], [0, 0, 1, 1], [], []>} : vector<128x8xf32>, vector<8x32xf32>, vector<128x32xf32> -> vector<128x32xf32>
    %33 = arith.mulf %31, %32 : vector<128x32xf32>
    %cst_21 = arith.constant dense<0.000000e+00> : vector<128xf32>
    %34 = vector.multi_reduction <add>, %33, %cst_21 [1] : vector<128x32xf32> to vector<128xf32>
    %c2_22 = arith.constant 2 : index
    %c0_23 = arith.constant 0 : index
    %35 = vector.load %arg4[%c2_22, %c0_23] : memref<16x128xf32, #tpu.memory_space<vmem>>, vector<1x128xf32>
    %36 = vector.shape_cast %35 : vector<1x128xf32> to vector<128xf32>
    %37 = vector.shape_cast %34 : vector<128xf32> to vector<1x128xf32>
    tpu.vector_store %arg4[%c2_22, %c0_23], %37 {strides = array<i32>} : memref<16x128xf32, #tpu.memory_space<vmem>>, vector<1x128xf32>,
    %c3 = arith.constant 3 : index
    %c0_24 = arith.constant 0 : index
    %c0_25 = arith.constant 0 : index
    %38 = vector.load %arg3[%c3, %c0_24, %c0_25] : memref<16x8x32xf32, #tpu.memory_space<vmem>>, vector<1x8x32xf32>
    %39 = vector.shape_cast %38 : vector<1x8x32xf32> to vector<8x32xf32>
    %cst_26 = arith.constant dense<0.000000e+00> : vector<128x32xf32>
    %40 = tpu.matmul %5, %39, %cst_26 {dimension_numbers = #tpu.dot_dimension_numbers<[1], [0], [0], [1], [0, 0, 1, 1], [], []>} : vector<128x8xf32>, vector<8x32xf32>, vector<128x32xf32> -> vector<128x32xf32>
    %cst_27 = arith.constant dense<0.000000e+00> : vector<128x32xf32>
    %41 = tpu.matmul %10, %39, %cst_27 {dimension_numbers = #tpu.dot_dimension_numbers<[1], [0], [0], [1], [0, 0, 1, 1], [], []>} : vector<128x8xf32>, vector<8x32xf32>, vector<128x32xf32> -> vector<128x32xf32>
    %42 = arith.mulf %40, %41 : vector<128x32xf32>
    %cst_28 = arith.constant dense<0.000000e+00> : vector<128xf32>
    %43 = vector.multi_reduction <add>, %42, %cst_28 [1] : vector<128x32xf32> to vector<128xf32>
    %c3_29 = arith.constant 3 : index
    %c0_30 = arith.constant 0 : index
    %44 = vector.load %arg4[%c3_29, %c0_30] : memref<16x128xf32, #tpu.memory_space<vmem>>, vector<1x128xf32>
    %45 = vector.shape_cast %44 : vector<1x128xf32> to vector<128xf32>
    %46 = vector.shape_cast %43 : vector<128xf32> to vector<1x128xf32>
    tpu.vector_store %arg4[%c3_29, %c0_30], %46 {strides = array<i32>} : memref<16x128xf32, #tpu.memory_space<vmem>>, vector<1x128xf32>,
    %c4 = arith.constant 4 : index
    %c0_31 = arith.constant 0 : index
    %c0_32 = arith.constant 0 : index
    %47 = vector.load %arg3[%c4, %c0_31, %c0_32] : memref<16x8x32xf32, #tpu.memory_space<vmem>>, vector<1x8x32xf32>
    %48 = vector.shape_cast %47 : vector<1x8x32xf32> to vector<8x32xf32>
    %cst_33 = arith.constant dense<0.000000e+00> : vector<128x32xf32>
    %49 = tpu.matmul %5, %48, %cst_33 {dimension_numbers = #tpu.dot_dimension_numbers<[1], [0], [0], [1], [0, 0, 1, 1], [], []>} : vector<128x8xf32>, vector<8x32xf32>, vector<128x32xf32> -> vector<128x32xf32>
    %cst_34 = arith.constant dense<0.000000e+00> : vector<128x32xf32>
    %50 = tpu.matmul %10, %48, %cst_34 {dimension_numbers = #tpu.dot_dimension_numbers<[1], [0], [0], [1], [0, 0, 1, 1], [], []>} : vector<128x8xf32>, vector<8x32xf32>, vector<128x32xf32> -> vector<128x32xf32>
    %51 = arith.mulf %49, %50 : vector<128x32xf32>
    %cst_35 = arith.constant dense<0.000000e+00> : vector<128xf32>
    %52 = vector.multi_reduction <add>, %51, %cst_35 [1] : vector<128x32xf32> to vector<128xf32>
    %c4_36 = arith.constant 4 : index
    %c0_37 = arith.constant 0 : index
    %53 = vector.load %arg4[%c4_36, %c0_37] : memref<16x128xf32, #tpu.memory_space<vmem>>, vector<1x128xf32>
    %54 = vector.shape_cast %53 : vector<1x128xf32> to vector<128xf32>
    %55 = vector.shape_cast %52 : vector<128xf32> to vector<1x128xf32>
    tpu.vector_store %arg4[%c4_36, %c0_37], %55 {strides = array<i32>} : memref<16x128xf32, #tpu.memory_space<vmem>>, vector<1x128xf32>,
    %c5 = arith.constant 5 : index
    %c0_38 = arith.constant 0 : index
    %c0_39 = arith.constant 0 : index
    %56 = vector.load %arg3[%c5, %c0_38, %c0_39] : memref<16x8x32xf32, #tpu.memory_space<vmem>>, vector<1x8x32xf32>
    %57 = vector.shape_cast %56 : vector<1x8x32xf32> to vector<8x32xf32>
    %cst_40 = arith.constant dense<0.000000e+00> : vector<128x32xf32>
    %58 = tpu.matmul %5, %57, %cst_40 {dimension_numbers = #tpu.dot_dimension_numbers<[1], [0], [0], [1], [0, 0, 1, 1], [], []>} : vector<128x8xf32>, vector<8x32xf32>, vector<128x32xf32> -> vector<128x32xf32>
    %cst_41 = arith.constant dense<0.000000e+00> : vector<128x32xf32>
    %59 = tpu.matmul %10, %57, %cst_41 {dimension_numbers = #tpu.dot_dimension_numbers<[1], [0], [0], [1], [0, 0, 1, 1], [], []>} : vector<128x8xf32>, vector<8x32xf32>, vector<128x32xf32> -> vector<128x32xf32>
    %60 = arith.mulf %58, %59 : vector<128x32xf32>
    %cst_42 = arith.constant dense<0.000000e+00> : vector<128xf32>
    %61 = vector.multi_reduction <add>, %60, %cst_42 [1] : vector<128x32xf32> to vector<128xf32>
    %c5_43 = arith.constant 5 : index
    %c0_44 = arith.constant 0 : index
    %62 = vector.load %arg4[%c5_43, %c0_44] : memref<16x128xf32, #tpu.memory_space<vmem>>, vector<1x128xf32>
    %63 = vector.shape_cast %62 : vector<1x128xf32> to vector<128xf32>
    %64 = vector.shape_cast %61 : vector<128xf32> to vector<1x128xf32>
    tpu.vector_store %arg4[%c5_43, %c0_44], %64 {strides = array<i32>} : memref<16x128xf32, #tpu.memory_space<vmem>>, vector<1x128xf32>,
    %c6 = arith.constant 6 : index
    %c0_45 = arith.constant 0 : index
    %c0_46 = arith.constant 0 : index
    %65 = vector.load %arg3[%c6, %c0_45, %c0_46] : memref<16x8x32xf32, #tpu.memory_space<vmem>>, vector<1x8x32xf32>
    %66 = vector.shape_cast %65 : vector<1x8x32xf32> to vector<8x32xf32>
    %cst_47 = arith.constant dense<0.000000e+00> : vector<128x32xf32>
    %67 = tpu.matmul %5, %66, %cst_47 {dimension_numbers = #tpu.dot_dimension_numbers<[1], [0], [0], [1], [0, 0, 1, 1], [], []>} : vector<128x8xf32>, vector<8x32xf32>, vector<128x32xf32> -> vector<128x32xf32>
    %cst_48 = arith.constant dense<0.000000e+00> : vector<128x32xf32>
    %68 = tpu.matmul %10, %66, %cst_48 {dimension_numbers = #tpu.dot_dimension_numbers<[1], [0], [0], [1], [0, 0, 1, 1], [], []>} : vector<128x8xf32>, vector<8x32xf32>, vector<128x32xf32> -> vector<128x32xf32>
    %69 = arith.mulf %67, %68 : vector<128x32xf32>
    %cst_49 = arith.constant dense<0.000000e+00> : vector<128xf32>
    %70 = vector.multi_reduction <add>, %69, %cst_49 [1] : vector<128x32xf32> to vector<128xf32>
    %c6_50 = arith.constant 6 : index
    %c0_51 = arith.constant 0 : index
    %71 = vector.load %arg4[%c6_50, %c0_51] : memref<16x128xf32, #tpu.memory_space<vmem>>, vector<1x128xf32>
    %72 = vector.shape_cast %71 : vector<1x128xf32> to vector<128xf32>
    %73 = vector.shape_cast %70 : vector<128xf32> to vector<1x128xf32>
    tpu.vector_store %arg4[%c6_50, %c0_51], %73 {strides = array<i32>} : memref<16x128xf32, #tpu.memory_space<vmem>>, vector<1x128xf32>,
    %c7 = arith.constant 7 : index
    %c0_52 = arith.constant 0 : index
    %c0_53 = arith.constant 0 : index
    %74 = vector.load %arg3[%c7, %c0_52, %c0_53] : memref<16x8x32xf32, #tpu.memory_space<vmem>>, vector<1x8x32xf32>
    %75 = vector.shape_cast %74 : vector<1x8x32xf32> to vector<8x32xf32>
    %cst_54 = arith.constant dense<0.000000e+00> : vector<128x32xf32>
    %76 = tpu.matmul %5, %75, %cst_54 {dimension_numbers = #tpu.dot_dimension_numbers<[1], [0], [0], [1], [0, 0, 1, 1], [], []>} : vector<128x8xf32>, vector<8x32xf32>, vector<128x32xf32> -> vector<128x32xf32>
    %cst_55 = arith.constant dense<0.000000e+00> : vector<128x32xf32>
    %77 = tpu.matmul %10, %75, %cst_55 {dimension_numbers = #tpu.dot_dimension_numbers<[1], [0], [0], [1], [0, 0, 1, 1], [], []>} : vector<128x8xf32>, vector<8x32xf32>, vector<128x32xf32> -> vector<128x32xf32>
    %78 = arith.mulf %76, %77 : vector<128x32xf32>
    %cst_56 = arith.constant dense<0.000000e+00> : vector<128xf32>
    %79 = vector.multi_reduction <add>, %78, %cst_56 [1] : vector<128x32xf32> to vector<128xf32>
    %c7_57 = arith.constant 7 : index
    %c0_58 = arith.constant 0 : index
    %80 = vector.load %arg4[%c7_57, %c0_58] : memref<16x128xf32, #tpu.memory_space<vmem>>, vector<1x128xf32>
    %81 = vector.shape_cast %80 : vector<1x128xf32> to vector<128xf32>
    %82 = vector.shape_cast %79 : vector<128xf32> to vector<1x128xf32>
    tpu.vector_store %arg4[%c7_57, %c0_58], %82 {strides = array<i32>} : memref<16x128xf32, #tpu.memory_space<vmem>>, vector<1x128xf32>,
    %c8 = arith.constant 8 : index
    %c0_59 = arith.constant 0 : index
    %c0_60 = arith.constant 0 : index
    %83 = vector.load %arg3[%c8, %c0_59, %c0_60] : memref<16x8x32xf32, #tpu.memory_space<vmem>>, vector<1x8x32xf32>
    %84 = vector.shape_cast %83 : vector<1x8x32xf32> to vector<8x32xf32>
    %cst_61 = arith.constant dense<0.000000e+00> : vector<128x32xf32>
    %85 = tpu.matmul %5, %84, %cst_61 {dimension_numbers = #tpu.dot_dimension_numbers<[1], [0], [0], [1], [0, 0, 1, 1], [], []>} : vector<128x8xf32>, vector<8x32xf32>, vector<128x32xf32> -> vector<128x32xf32>
    %cst_62 = arith.constant dense<0.000000e+00> : vector<128x32xf32>
    %86 = tpu.matmul %10, %84, %cst_62 {dimension_numbers = #tpu.dot_dimension_numbers<[1], [0], [0], [1], [0, 0, 1, 1], [], []>} : vector<128x8xf32>, vector<8x32xf32>, vector<128x32xf32> -> vector<128x32xf32>
    %87 = arith.mulf %85, %86 : vector<128x32xf32>
    %cst_63 = arith.constant dense<0.000000e+00> : vector<128xf32>
    %88 = vector.multi_reduction <add>, %87, %cst_63 [1] : vector<128x32xf32> to vector<128xf32>
    %c8_64 = arith.constant 8 : index
    %c0_65 = arith.constant 0 : index
    %89 = vector.load %arg4[%c8_64, %c0_65] : memref<16x128xf32, #tpu.memory_space<vmem>>, vector<1x128xf32>
    %90 = vector.shape_cast %89 : vector<1x128xf32> to vector<128xf32>
    %91 = vector.shape_cast %88 : vector<128xf32> to vector<1x128xf32>
    tpu.vector_store %arg4[%c8_64, %c0_65], %91 {strides = array<i32>} : memref<16x128xf32, #tpu.memory_space<vmem>>, vector<1x128xf32>,
    %c9 = arith.constant 9 : index
    %c0_66 = arith.constant 0 : index
    %c0_67 = arith.constant 0 : index
    %92 = vector.load %arg3[%c9, %c0_66, %c0_67] : memref<16x8x32xf32, #tpu.memory_space<vmem>>, vector<1x8x32xf32>
    %93 = vector.shape_cast %92 : vector<1x8x32xf32> to vector<8x32xf32>
    %cst_68 = arith.constant dense<0.000000e+00> : vector<128x32xf32>
    %94 = tpu.matmul %5, %93, %cst_68 {dimension_numbers = #tpu.dot_dimension_numbers<[1], [0], [0], [1], [0, 0, 1, 1], [], []>} : vector<128x8xf32>, vector<8x32xf32>, vector<128x32xf32> -> vector<128x32xf32>
    %cst_69 = arith.constant dense<0.000000e+00> : vector<128x32xf32>
    %95 = tpu.matmul %10, %93, %cst_69 {dimension_numbers = #tpu.dot_dimension_numbers<[1], [0], [0], [1], [0, 0, 1, 1], [], []>} : vector<128x8xf32>, vector<8x32xf32>, vector<128x32xf32> -> vector<128x32xf32>
    %96 = arith.mulf %94, %95 : vector<128x32xf32>
    %cst_70 = arith.constant dense<0.000000e+00> : vector<128xf32>
    %97 = vector.multi_reduction <add>, %96, %cst_70 [1] : vector<128x32xf32> to vector<128xf32>
    %c9_71 = arith.constant 9 : index
    %c0_72 = arith.constant 0 : index
    %98 = vector.load %arg4[%c9_71, %c0_72] : memref<16x128xf32, #tpu.memory_space<vmem>>, vector<1x128xf32>
    %99 = vector.shape_cast %98 : vector<1x128xf32> to vector<128xf32>
    %100 = vector.shape_cast %97 : vector<128xf32> to vector<1x128xf32>
    tpu.vector_store %arg4[%c9_71, %c0_72], %100 {strides = array<i32>} : memref<16x128xf32, #tpu.memory_space<vmem>>, vector<1x128xf32>,
    %c10 = arith.constant 10 : index
    %c0_73 = arith.constant 0 : index
    %c0_74 = arith.constant 0 : index
    %101 = vector.load %arg3[%c10, %c0_73, %c0_74] : memref<16x8x32xf32, #tpu.memory_space<vmem>>, vector<1x8x32xf32>
    %102 = vector.shape_cast %101 : vector<1x8x32xf32> to vector<8x32xf32>
    %cst_75 = arith.constant dense<0.000000e+00> : vector<128x32xf32>
    %103 = tpu.matmul %5, %102, %cst_75 {dimension_numbers = #tpu.dot_dimension_numbers<[1], [0], [0], [1], [0, 0, 1, 1], [], []>} : vector<128x8xf32>, vector<8x32xf32>, vector<128x32xf32> -> vector<128x32xf32>
    %cst_76 = arith.constant dense<0.000000e+00> : vector<128x32xf32>
    %104 = tpu.matmul %10, %102, %cst_76 {dimension_numbers = #tpu.dot_dimension_numbers<[1], [0], [0], [1], [0, 0, 1, 1], [], []>} : vector<128x8xf32>, vector<8x32xf32>, vector<128x32xf32> -> vector<128x32xf32>
    %105 = arith.mulf %103, %104 : vector<128x32xf32>
    %cst_77 = arith.constant dense<0.000000e+00> : vector<128xf32>
    %106 = vector.multi_reduction <add>, %105, %cst_77 [1] : vector<128x32xf32> to vector<128xf32>
    %c10_78 = arith.constant 10 : index
    %c0_79 = arith.constant 0 : index
    %107 = vector.load %arg4[%c10_78, %c0_79] : memref<16x128xf32, #tpu.memory_space<vmem>>, vector<1x128xf32>
    %108 = vector.shape_cast %107 : vector<1x128xf32> to vector<128xf32>
    %109 = vector.shape_cast %106 : vector<128xf32> to vector<1x128xf32>
    tpu.vector_store %arg4[%c10_78, %c0_79], %109 {strides = array<i32>} : memref<16x128xf32, #tpu.memory_space<vmem>>, vector<1x128xf32>,
    %c11 = arith.constant 11 : index
    %c0_80 = arith.constant 0 : index
    %c0_81 = arith.constant 0 : index
    %110 = vector.load %arg3[%c11, %c0_80, %c0_81] : memref<16x8x32xf32, #tpu.memory_space<vmem>>, vector<1x8x32xf32>
    %111 = vector.shape_cast %110 : vector<1x8x32xf32> to vector<8x32xf32>
    %cst_82 = arith.constant dense<0.000000e+00> : vector<128x32xf32>
    %112 = tpu.matmul %5, %111, %cst_82 {dimension_numbers = #tpu.dot_dimension_numbers<[1], [0], [0], [1], [0, 0, 1, 1], [], []>} : vector<128x8xf32>, vector<8x32xf32>, vector<128x32xf32> -> vector<128x32xf32>
    %cst_83 = arith.constant dense<0.000000e+00> : vector<128x32xf32>
    %113 = tpu.matmul %10, %111, %cst_83 {dimension_numbers = #tpu.dot_dimension_numbers<[1], [0], [0], [1], [0, 0, 1, 1], [], []>} : vector<128x8xf32>, vector<8x32xf32>, vector<128x32xf32> -> vector<128x32xf32>
    %114 = arith.mulf %112, %113 : vector<128x32xf32>
    %cst_84 = arith.constant dense<0.000000e+00> : vector<128xf32>
    %115 = vector.multi_reduction <add>, %114, %cst_84 [1] : vector<128x32xf32> to vector<128xf32>
    %c11_85 = arith.constant 11 : index
    %c0_86 = arith.constant 0 : index
    %116 = vector.load %arg4[%c11_85, %c0_86] : memref<16x128xf32, #tpu.memory_space<vmem>>, vector<1x128xf32>
    %117 = vector.shape_cast %116 : vector<1x128xf32> to vector<128xf32>
    %118 = vector.shape_cast %115 : vector<128xf32> to vector<1x128xf32>
    tpu.vector_store %arg4[%c11_85, %c0_86], %118 {strides = array<i32>} : memref<16x128xf32, #tpu.memory_space<vmem>>, vector<1x128xf32>,
    %c12 = arith.constant 12 : index
    %c0_87 = arith.constant 0 : index
    %c0_88 = arith.constant 0 : index
    %119 = vector.load %arg3[%c12, %c0_87, %c0_88] : memref<16x8x32xf32, #tpu.memory_space<vmem>>, vector<1x8x32xf32>
    %120 = vector.shape_cast %119 : vector<1x8x32xf32> to vector<8x32xf32>
    %cst_89 = arith.constant dense<0.000000e+00> : vector<128x32xf32>
    %121 = tpu.matmul %5, %120, %cst_89 {dimension_numbers = #tpu.dot_dimension_numbers<[1], [0], [0], [1], [0, 0, 1, 1], [], []>} : vector<128x8xf32>, vector<8x32xf32>, vector<128x32xf32> -> vector<128x32xf32>
    %cst_90 = arith.constant dense<0.000000e+00> : vector<128x32xf32>
    %122 = tpu.matmul %10, %120, %cst_90 {dimension_numbers = #tpu.dot_dimension_numbers<[1], [0], [0], [1], [0, 0, 1, 1], [], []>} : vector<128x8xf32>, vector<8x32xf32>, vector<128x32xf32> -> vector<128x32xf32>
    %123 = arith.mulf %121, %122 : vector<128x32xf32>
    %cst_91 = arith.constant dense<0.000000e+00> : vector<128xf32>
    %124 = vector.multi_reduction <add>, %123, %cst_91 [1] : vector<128x32xf32> to vector<128xf32>
    %c12_92 = arith.constant 12 : index
    %c0_93 = arith.constant 0 : index
    %125 = vector.load %arg4[%c12_92, %c0_93] : memref<16x128xf32, #tpu.memory_space<vmem>>, vector<1x128xf32>
    %126 = vector.shape_cast %125 : vector<1x128xf32> to vector<128xf32>
    %127 = vector.shape_cast %124 : vector<128xf32> to vector<1x128xf32>
    tpu.vector_store %arg4[%c12_92, %c0_93], %127 {strides = array<i32>} : memref<16x128xf32, #tpu.memory_space<vmem>>, vector<1x128xf32>,
    %c13 = arith.constant 13 : index
    %c0_94 = arith.constant 0 : index
    %c0_95 = arith.constant 0 : index
    %128 = vector.load %arg3[%c13, %c0_94, %c0_95] : memref<16x8x32xf32, #tpu.memory_space<vmem>>, vector<1x8x32xf32>
    %129 = vector.shape_cast %128 : vector<1x8x32xf32> to vector<8x32xf32>
    %cst_96 = arith.constant dense<0.000000e+00> : vector<128x32xf32>
    %130 = tpu.matmul %5, %129, %cst_96 {dimension_numbers = #tpu.dot_dimension_numbers<[1], [0], [0], [1], [0, 0, 1, 1], [], []>} : vector<128x8xf32>, vector<8x32xf32>, vector<128x32xf32> -> vector<128x32xf32>
    %cst_97 = arith.constant dense<0.000000e+00> : vector<128x32xf32>
    %131 = tpu.matmul %10, %129, %cst_97 {dimension_numbers = #tpu.dot_dimension_numbers<[1], [0], [0], [1], [0, 0, 1, 1], [], []>} : vector<128x8xf32>, vector<8x32xf32>, vector<128x32xf32> -> vector<128x32xf32>
    %132 = arith.mulf %130, %131 : vector<128x32xf32>
    %cst_98 = arith.constant dense<0.000000e+00> : vector<128xf32>
    %133 = vector.multi_reduction <add>, %132, %cst_98 [1] : vector<128x32xf32> to vector<128xf32>
    %c13_99 = arith.constant 13 : index
    %c0_100 = arith.constant 0 : index
    %134 = vector.load %arg4[%c13_99, %c0_100] : memref<16x128xf32, #tpu.memory_space<vmem>>, vector<1x128xf32>
    %135 = vector.shape_cast %134 : vector<1x128xf32> to vector<128xf32>
    %136 = vector.shape_cast %133 : vector<128xf32> to vector<1x128xf32>
    tpu.vector_store %arg4[%c13_99, %c0_100], %136 {strides = array<i32>} : memref<16x128xf32, #tpu.memory_space<vmem>>, vector<1x128xf32>,
    %c14 = arith.constant 14 : index
    %c0_101 = arith.constant 0 : index
    %c0_102 = arith.constant 0 : index
    %137 = vector.load %arg3[%c14, %c0_101, %c0_102] : memref<16x8x32xf32, #tpu.memory_space<vmem>>, vector<1x8x32xf32>
    %138 = vector.shape_cast %137 : vector<1x8x32xf32> to vector<8x32xf32>
    %cst_103 = arith.constant dense<0.000000e+00> : vector<128x32xf32>
    %139 = tpu.matmul %5, %138, %cst_103 {dimension_numbers = #tpu.dot_dimension_numbers<[1], [0], [0], [1], [0, 0, 1, 1], [], []>} : vector<128x8xf32>, vector<8x32xf32>, vector<128x32xf32> -> vector<128x32xf32>
    %cst_104 = arith.constant dense<0.000000e+00> : vector<128x32xf32>
    %140 = tpu.matmul %10, %138, %cst_104 {dimension_numbers = #tpu.dot_dimension_numbers<[1], [0], [0], [1], [0, 0, 1, 1], [], []>} : vector<128x8xf32>, vector<8x32xf32>, vector<128x32xf32> -> vector<128x32xf32>
    %141 = arith.mulf %139, %140 : vector<128x32xf32>
    %cst_105 = arith.constant dense<0.000000e+00> : vector<128xf32>
    %142 = vector.multi_reduction <add>, %141, %cst_105 [1] : vector<128x32xf32> to vector<128xf32>
    %c14_106 = arith.constant 14 : index
    %c0_107 = arith.constant 0 : index
    %143 = vector.load %arg4[%c14_106, %c0_107] : memref<16x128xf32, #tpu.memory_space<vmem>>, vector<1x128xf32>
    %144 = vector.shape_cast %143 : vector<1x128xf32> to vector<128xf32>
    %145 = vector.shape_cast %142 : vector<128xf32> to vector<1x128xf32>
    tpu.vector_store %arg4[%c14_106, %c0_107], %145 {strides = array<i32>} : memref<16x128xf32, #tpu.memory_space<vmem>>, vector<1x128xf32>,
    %c15 = arith.constant 15 : index
    %c0_108 = arith.constant 0 : index
    %c0_109 = arith.constant 0 : index
    %146 = vector.load %arg3[%c15, %c0_108, %c0_109] : memref<16x8x32xf32, #tpu.memory_space<vmem>>, vector<1x8x32xf32>
    %147 = vector.shape_cast %146 : vector<1x8x32xf32> to vector<8x32xf32>
    %cst_110 = arith.constant dense<0.000000e+00> : vector<128x32xf32>
    %148 = tpu.matmul %5, %147, %cst_110 {dimension_numbers = #tpu.dot_dimension_numbers<[1], [0], [0], [1], [0, 0, 1, 1], [], []>} : vector<128x8xf32>, vector<8x32xf32>, vector<128x32xf32> -> vector<128x32xf32>
    %cst_111 = arith.constant dense<0.000000e+00> : vector<128x32xf32>
    %149 = tpu.matmul %10, %147, %cst_111 {dimension_numbers = #tpu.dot_dimension_numbers<[1], [0], [0], [1], [0, 0, 1, 1], [], []>} : vector<128x8xf32>, vector<8x32xf32>, vector<128x32xf32> -> vector<128x32xf32>
    %150 = arith.mulf %148, %149 : vector<128x32xf32>
    %cst_112 = arith.constant dense<0.000000e+00> : vector<128xf32>
    %151 = vector.multi_reduction <add>, %150, %cst_112 [1] : vector<128x32xf32> to vector<128xf32>
    %c15_113 = arith.constant 15 : index
    %c0_114 = arith.constant 0 : index
    %152 = vector.load %arg4[%c15_113, %c0_114] : memref<16x128xf32, #tpu.memory_space<vmem>>, vector<1x128xf32>
    %153 = vector.shape_cast %152 : vector<1x128xf32> to vector<128xf32>
    %154 = vector.shape_cast %151 : vector<128xf32> to vector<1x128xf32>
    tpu.vector_store %arg4[%c15_113, %c0_114], %154 {strides = array<i32>} : memref<16x128xf32, #tpu.memory_space<vmem>>, vector<1x128xf32>,
    return
  }
  func.func @transform_0(%arg0: i32) -> (i32, i32) {
    %c0_i32 = arith.constant 0 : i32
    %c0_i32_0 = arith.constant 0 : i32
    %c0_i32_1 = arith.constant 0 : i32
    return %c0_i32, %c0_i32_0 : i32, i32
  }
  func.func @transform_1(%arg0: i32) -> (i32, i32) {
    %c0_i32 = arith.constant 0 : i32
    %c0_i32_0 = arith.constant 0 : i32
    %c0_i32_1 = arith.constant 0 : i32
    return %c0_i32, %c0_i32_0 : i32, i32
  }
  func.func @transform_2(%arg0: i32) -> (i32, i32, i32) {
    %c0_i32 = arith.constant 0 : i32
    %c0_i32_0 = arith.constant 0 : i32
    %c0_i32_1 = arith.constant 0 : i32
    return %arg0, %c0_i32, %c0_i32_0 : i32, i32, i32
  }
  func.func @transform_3(%arg0: i32) -> (i32, i32) {
    %c0_i32 = arith.constant 0 : i32
    %c0_i32_0 = arith.constant 0 : i32
    return %arg0, %c0_i32 : i32, i32
  }
}

</mosaic_0001>

<bundles_post_ra>
// kernel: tpu_custom_call.1
= control target key start
LH: loop header
LB: loop body
LE: loop exit
PB: predicated region body
PF: predicated region fallthrough
CT: control target
= control target key end

     0   :  { %v9598_v2 = vmov 0   ;;  %s11840_s0 = inlined_call_operand.vmem [shape: s32[128,1], index: 0, kind: input, shape index: {}]   ;;  %s11841_s1 = inlined_call_operand.vmem [shape: s32[128,1], index: 1, kind: input, shape index: {}]   ;;  %s11842_s2 = inlined_call_operand.vmem [shape: f32[16,8,32], index: 2, kind: input, shape index: {}]   ;;  %s11843_s3 = inlined_call_operand.hbm [shape: f32[16,128], index: 3, kind: output, shape index: {}]  }
   0x1   :  { %v18_v0 = vld [vmem:[%s11840_s0 + $0x8] sm:$0xff]  ;;  %v17_v1 = vld [vmem:[%s11840_s0] sm:$0xff]  ;;  %9573 = vset.pattern.permute.xlu1 %v9598_v2  ;;  %9572 = vset.pattern.permute.xlu0 %v9598_v2  ;;  %v131_v5 = vld [vmem:[%s11841_s1 + $0x10] sm:$0xff] }
   0x2   :  { %37 = vperm.xlu1 %9573, %v18_v0   ;;  %34 = vperm.xlu0 %9572, %v17_v1   ;;  %v130_v3 = vld [vmem:[%s11841_s1 + $0x8] sm:$0xff]  ;;  %v129_v4 = vld [vmem:[%s11841_s1] sm:$0xff]  ;;  %v19_v6 = vld [vmem:[%s11840_s0 + $0x10] sm:$0xff] }
   0x3   :  { %v241_v7 = vld [vmem:[%s11842_s2] sm:$0xff]  ;;  %v132_v8 = vld [vmem:[%s11841_s1 + $0x18] sm:$0xff] }
   0x4   :  { %v20_v9 = vld [vmem:[%s11840_s0 + $0x18] sm:$0xff]  ;;  %8735 = vmatprep.subr.mxu0 %v241_v7  ;;  %8761 = vmatprep.subr.mxu1 %v241_v7 }
   0x6   :  { %149 = vperm.xlu1 %9573, %v130_v3   ;;  %146 = vperm.xlu0 %9572, %v129_v4  }
   0xa   :  { %152 = vperm.xlu1 %9573, %v131_v5   ;;  %40 = vperm.xlu0 %9572, %v19_v6  }
   0xb   :  { %8 = vsyncpa [#allocation3], 0  ;;  %8736 = vmatpush3.msra.mxu0 %v241_v7  ;;  %8762 = vmatpush3.msra.mxu1 %v241_v7  ;;  %v133_v10 = vld [vmem:[%s11841_s1 + $0x20] sm:$0xff]  ;;  %v134_v12 = vld [vmem:[%s11841_s1 + $0x28] sm:$0xff]  ;;  %v15_v35 = vlaneseq  ;;  %vm242_vm0 = vcmask 64512   ;;  %v9599_v39 = vmov 0.0  }
   0xc   :  { %v21_v11 = vld [vmem:[%s11840_s0 + $0x20] sm:$0xff]  ;;  %v22_v13 = vld [vmem:[%s11840_s0 + $0x28] sm:$0xff]  ;;  %v135_v14 = vld [vmem:[%s11841_s1 + $0x30] sm:$0xff] }
   0xd   :  { %v23_v15 = vld [vmem:[%s11840_s0 + $0x30] sm:$0xff]  ;;  %v136_v16 = vld [vmem:[%s11841_s1 + $0x38] sm:$0xff]  ;;  %v137_v18 = vld [vmem:[%s11841_s1 + $0x40] sm:$0xff]  ;;  %v9726_v36 = vand.u32 127, %v15_v35 }
   0xe   :  { %155 = vperm.xlu1 %9573, %v132_v8   ;;  %43 = vperm.xlu0 %9572, %v20_v9   ;;  %v24_v17 = vld [vmem:[%s11840_s0 + $0x38] sm:$0xff]  ;;  %v25_v19 = vld [vmem:[%s11840_s0 + $0x40] sm:$0xff]  ;;  %v138_v20 = vld [vmem:[%s11841_s1 + $0x48] sm:$0xff] }
   0xf   :  { %v26_v21 = vld [vmem:[%s11840_s0 + $0x48] sm:$0xff]  ;;  %v139_v23 = vld [vmem:[%s11841_s1 + $0x50] sm:$0xff]  ;;  %v140_v25 = vld [vmem:[%s11841_s1 + $0x58] sm:$0xff] }
  0x10   :  { %v7696_v22 = vld [vmem:[%s11842_s2 + $0x8] sm:$0xff]  ;;  %v27_v24 = vld [vmem:[%s11840_s0 + $0x50] sm:$0xff]  ;;  %v28_v26 = vld [vmem:[%s11840_s0 + $0x58] sm:$0xff] }
  0x11   :  { %8787 = vmatprep.subr.mxu0 %v7696_v22  ;;  %8813 = vmatprep.subr.mxu1 %v7696_v22  ;;  %v141_v27 = vld [vmem:[%s11841_s1 + $0x60] sm:$0xff]  ;;  %v142_v29 = vld [vmem:[%s11841_s1 + $0x68] sm:$0xff]  ;;  %v143_v31 = vld [vmem:[%s11841_s1 + $0x70] sm:$0xff] }
  0x12   :  { %158 = vperm.xlu1 %9573, %v133_v10   ;;  %46 = vperm.xlu0 %9572, %v21_v11   ;;  %v29_v28 = vld [vmem:[%s11840_s0 + $0x60] sm:$0xff]  ;;  %v30_v30 = vld [vmem:[%s11840_s0 + $0x68] sm:$0xff]  ;;  %v31_v32 = vld [vmem:[%s11840_s0 + $0x70] sm:$0xff] }
  0x13   :  { %v144_v33 = vld [vmem:[%s11841_s1 + $0x78] sm:$0xff]  ;;  %v9741_v42 = vld [vmem:[%s11842_s2 + $0x10] sm:$0xff] }
  0x14   :  { %v32_v34 = vld [vmem:[%s11840_s0 + $0x78] sm:$0xff] }
  0x16   :  { %161 = vperm.xlu1 %9573, %v134_v12   ;;  %49 = vperm.xlu0 %9572, %v22_v13  }
  0x1a   :  { %164 = vperm.xlu1 %9573, %v135_v14   ;;  %52 = vperm.xlu0 %9572, %v23_v15  }
  0x1e   :  { %167 = vperm.xlu1 %9573, %v136_v16   ;;  %55 = vperm.xlu0 %9572, %v24_v17  }
  0x22   :  { %170 = vperm.xlu1 %9573, %v137_v18   ;;  %58 = vperm.xlu0 %9572, %v25_v19  }
  0x26   :  { %173 = vperm.xlu1 %9573, %v138_v20   ;;  %61 = vperm.xlu0 %9572, %v26_v21  }
  0x2a   :  { %176 = vperm.xlu1 %9573, %v139_v23   ;;  %64 = vperm.xlu0 %9572, %v27_v24  }
  0x2e   :  { %179 = vperm.xlu1 %9573, %v140_v25   ;;  %67 = vperm.xlu0 %9572, %v28_v26  }
  0x32   :  { %182 = vperm.xlu1 %9573, %v141_v27   ;;  %70 = vperm.xlu0 %9572, %v29_v28  }
  0x36   :  { %185 = vperm.xlu1 %9573, %v142_v29   ;;  %73 = vperm.xlu0 %9572, %v30_v30  }
  0x3a   :  { %188 = vperm.xlu1 %9573, %v143_v31   ;;  %76 = vperm.xlu0 %9572, %v31_v32  }
  0x3e   :  { %191 = vperm.xlu1 %9573, %v144_v33   ;;  %79 = vperm.xlu0 %9572, %v32_v34  }
  0x81   :  { %v38_v37 = vpop.permute.xlu1 %37  ;;  %v35_v38 = vpop.permute.xlu0 %34 }
  0x82   :  { %vm82_vm1 = vcmp.eq.s32.totalorder %v9726_v36, %v38_v37  ;;  %vm81_vm2 = vcmp.eq.s32.totalorder %v9726_v36, %v35_v38 }
  0x83   :  { %v9731_v40 = vsel %vm82_vm1, 1.0, %v9599_v39  ;;  %v9734_v41 = vsel %vm81_vm2, 1.0, %v9599_v39 }
  0x84   :  { %8737 = vmatprep.mubr.msk.f32.mxu0 %vm242_vm0, %v9734_v41 }
  0x85   :  { %v150_v43 = vpop.permute.xlu1 %149  ;;  %v147_v44 = vpop.permute.xlu0 %146  ;;  %8738 = vmatmul.mubr.msk.f32.vlgmr.msra.gmra.mrb[0].mxu0 %vm242_vm0, %v9731_v40 }
  0x86   :  { %vm194_vm3 = vcmp.eq.s32.totalorder %v9726_v36, %v150_v43  ;;  %vm193_vm4 = vcmp.eq.s32.totalorder %v9726_v36, %v147_v44  ;;  %8788 = vmatpush3.msra.mxu0 %v7696_v22 }
  0x87   :  { %v9748_v45 = vsel %vm194_vm3, 1.0, %v9599_v39  ;;  %v9751_v46 = vsel %vm193_vm4, 1.0, %v9599_v39  ;;  %8839 = vmatprep.subr.mxu0 %v9741_v42 }
  0x88   :  { %8763 = vmatprep.mubr.msk.f32.mxu1 %vm242_vm0, %v9751_v46 }
  0x89   :  { %v153_v47 = vpop.permute.xlu1 %152  ;;  %v41_v48 = vpop.permute.xlu0 %40  ;;  %8764 = vmatmul.mubr.msk.f32.vlgmr.msra.gmra.mrb[0].mxu1 %vm242_vm0, %v9748_v45 }
  0x8a   :  { %vm195_vm5 = vcmp.eq.s32.totalorder %v9726_v36, %v153_v47  ;;  %vm83_vm6 = vcmp.eq.s32.totalorder %v9726_v36, %v41_v48  ;;  %8814 = vmatpush3.msra.mxu1 %v7696_v22  ;;  %v7828_v47 = vld [vmem:[%s11842_s2 + $0x28] sm:$0xff]  ;;  %v7861_v48 = vld [vmem:[%s11842_s2 + $0x30] sm:$0xff] }
  0x8b   :  { %v9761_v49 = vsel %vm195_vm5, 1.0, %v9599_v39  ;;  %v9764_v50 = vsel %vm83_vm6, 1.0, %v9599_v39  ;;  %8865 = vmatprep.subr.mxu1 %v9741_v42 }
  0x8c   :  { %8740 = vmatprep.mubr.msk.f32.mxu0 %vm242_vm0, %v9764_v50  ;;  %8766 = vmatprep.mubr.msk.f32.mxu1 %vm242_vm0, %v9761_v49 }
  0x8d   :  { %v156_v51 = vpop.permute.xlu1 %155  ;;  %v44_v52 = vpop.permute.xlu0 %43 }
  0x8e   :  { %vm196_vm7 = vcmp.eq.s32.totalorder %v9726_v36, %v156_v51  ;;  %vm84_vm8 = vcmp.eq.s32.totalorder %v9726_v36, %v44_v52  ;;  %v7894_v51 = vld [vmem:[%s11842_s2 + $0x38] sm:$0xff] }
  0x8f   :  { %v9774_v53 = vsel %vm196_vm7, 1.0, %v9599_v39  ;;  %v9777_v54 = vsel %vm84_vm8, 1.0, %v9599_v39 }
  0x90   :  { %8741 = vmatmul.mubr.msk.f32.gmra.mrb[2].mxu0 %vm242_vm0, %v9777_v54  ;;  %8767 = vmatmul.mubr.msk.f32.gmra.mrb[2].mxu1 %vm242_vm0, %v9774_v53 }
  0x91   :  { %v159_v55 = vpop.permute.xlu1 %158  ;;  %v47_v56 = vpop.permute.xlu0 %46 }
  0x92   :  { %vm197_vm9 = vcmp.eq.s32.totalorder %v9726_v36, %v159_v55  ;;  %vm85_vm10 = vcmp.eq.s32.totalorder %v9726_v36, %v47_v56 }
  0x93   :  { %v9786_v57 = vsel %vm197_vm9, 1.0, %v9599_v39  ;;  %v9789_v58 = vsel %vm85_vm10, 1.0, %v9599_v39 }
  0x94   :  { %8743 = vmatprep.mubr.msk.f32.mxu0 %vm242_vm0, %v9789_v58  ;;  %8769 = vmatprep.mubr.msk.f32.mxu1 %vm242_vm0, %v9786_v57 }
  0x95   :  { %v162_v59 = vpop.permute.xlu1 %161  ;;  %v50_v60 = vpop.permute.xlu0 %49 }
  0x96   :  { %vm198_vm11 = vcmp.eq.s32.totalorder %v9726_v36, %v162_v59  ;;  %vm86_vm12 = vcmp.eq.s32.totalorder %v9726_v36, %v50_v60 }
  0x97   :  { %v9798_v61 = vsel %vm198_vm11, 1.0, %v9599_v39  ;;  %v9801_v62 = vsel %vm86_vm12, 1.0, %v9599_v39 }
  0x98   :  { %8744 = vmatmul.mubr.msk.f32.gmra.mrb[4].mxu0 %vm242_vm0, %v9801_v62  ;;  %8770 = vmatmul.mubr.msk.f32.gmra.mrb[4].mxu1 %vm242_vm0, %v9798_v61 }
  0x99   :  { %v165_v63 = vpop.permute.xlu1 %164  ;;  %v53_v0 = vpop.permute.xlu0 %52 }
  0x9a   :  { %vm199_vm13 = vcmp.eq.s32.totalorder %v9726_v36, %v165_v63  ;;  %vm87_vm14 = vcmp.eq.s32.totalorder %v9726_v36, %v53_v0 }
  0x9b   :  { %v9810_v1 = vsel %vm199_vm13, 1.0, %v9599_v39  ;;  %v9813_v2 = vsel %vm87_vm14, 1.0, %v9599_v39 }
  0x9c   :  { %8746 = vmatprep.mubr.msk.f32.mxu0 %vm242_vm0, %v9813_v2  ;;  %8772 = vmatprep.mubr.msk.f32.mxu1 %vm242_vm0, %v9810_v1 }
  0x9d   :  { %v168_v3 = vpop.permute.xlu1 %167  ;;  %v56_v4 = vpop.permute.xlu0 %55 }
  0x9e   :  { %vm200_vm15 = vcmp.eq.s32.totalorder %v9726_v36, %v168_v3  ;;  %vm88_vm1 = vcmp.eq.s32.totalorder %v9726_v36, %v56_v4 }
  0x9f   :  { %v9822_v5 = vsel %vm200_vm15, 1.0, %v9599_v39  ;;  %v9825_v6 = vsel %vm88_vm1, 1.0, %v9599_v39 }
  0xa0   :  { %8747 = vmatmul.mubr.msk.f32.gmra.mrb[6].mxu0 %vm242_vm0, %v9825_v6  ;;  %8773 = vmatmul.mubr.msk.f32.gmra.mrb[6].mxu1 %vm242_vm0, %v9822_v5 }
  0xa1   :  { %v171_v7 = vpop.permute.xlu1 %170  ;;  %v59_v8 = vpop.permute.xlu0 %58 }
  0xa2   :  { %vm201_vm2 = vcmp.eq.s32.totalorder %v9726_v36, %v171_v7  ;;  %vm89_vm3 = vcmp.eq.s32.totalorder %v9726_v36, %v59_v8 }
  0xa3   :  { %v9834_v9 = vsel %vm201_vm2, 1.0, %v9599_v39  ;;  %v9837_v10 = vsel %vm89_vm3, 1.0, %v9599_v39  ;;  %vm645_vm3 = vcmask 261120  }
  0xa4   :  { %8749 = vmatprep.mubr.msk.f32.mxu0 %vm242_vm0, %v9837_v10  ;;  %8775 = vmatprep.mubr.msk.f32.mxu1 %vm242_vm0, %v9834_v9 }
  0xa5   :  { %v174_v11 = vpop.permute.xlu1 %173  ;;  %v62_v12 = vpop.permute.xlu0 %61 }
  0xa6   :  { %vm202_vm4 = vcmp.eq.s32.totalorder %v9726_v36, %v174_v11  ;;  %vm90_vm5 = vcmp.eq.s32.totalorder %v9726_v36, %v62_v12 }
  0xa7   :  { %v9846_v13 = vsel %vm202_vm4, 1.0, %v9599_v39  ;;  %v9849_v14 = vsel %vm90_vm5, 1.0, %v9599_v39  ;;  %vm719_vm4 = vcmask 130112   ;;  %vm726_vm5 = vcmask 195712  }
  0xa8   :  { %8750 = vmatmul.mubr.msk.f32.gmra.mrb[8].mxu0 %vm242_vm0, %v9849_v14  ;;  %8776 = vmatmul.mubr.msk.f32.gmra.mrb[8].mxu1 %vm242_vm0, %v9846_v13 }
  0xa9   :  { %v177_v15 = vpop.permute.xlu1 %176  ;;  %v65_v16 = vpop.permute.xlu0 %64 }
  0xaa   :  { %vm203_vm6 = vcmp.eq.s32.totalorder %v9726_v36, %v177_v15  ;;  %vm91_vm7 = vcmp.eq.s32.totalorder %v9726_v36, %v65_v16  ;;  %v10277_v15 = vld [vmem:[%s11842_s2 + $0x40] sm:$0xff] }
  0xab   :  { %v9858_v17 = vsel %vm203_vm6, 1.0, %v9599_v39  ;;  %v9861_v18 = vsel %vm91_vm7, 1.0, %v9599_v39  ;;  %vm733_vm6 = vcmask 261312   ;;  %vm740_vm7 = vcmask 326912  }
  0xac   :  { %8752 = vmatprep.mubr.msk.f32.mxu0 %vm242_vm0, %v9861_v18  ;;  %8778 = vmatprep.mubr.msk.f32.mxu1 %vm242_vm0, %v9858_v17 }
  0xad   :  { %v180_v19 = vpop.permute.xlu1 %179  ;;  %v68_v20 = vpop.permute.xlu0 %67 }
  0xae   :  { %vm204_vm8 = vcmp.eq.s32.totalorder %v9726_v36, %v180_v19  ;;  %vm92_vm9 = vcmp.eq.s32.totalorder %v9726_v36, %v68_v20 }
  0xaf   :  { %v9870_v21 = vsel %vm204_vm8, 1.0, %v9599_v39  ;;  %v9873_v22 = vsel %vm92_vm9, 1.0, %v9599_v39  ;;  %vm747_vm8 = vcmask 392512   ;;  %vm754_vm9 = vcmask 458112  }
  0xb0   :  { %11862 = vst [vmem:[#allocation5_spill] sm:$0xff] %v9870_v21  ;;  %8753 = vmatmul.mubr.msk.f32.gmra.mrb[10].mxu0 %vm242_vm0, %v9873_v22  ;;  %8779 = vmatmul.mubr.msk.f32.gmra.mrb[10].mxu1 %vm242_vm0, %v9870_v21 }
  0xb1   :  { %v183_v23 = vpop.permute.xlu1 %182  ;;  %v71_v24 = vpop.permute.xlu0 %70 }
  0xb2   :  { %vm205_vm10 = vcmp.eq.s32.totalorder %v9726_v36, %v183_v23  ;;  %vm93_vm11 = vcmp.eq.s32.totalorder %v9726_v36, %v71_v24 }
  0xb3   :  { %v9882_v25 = vsel %vm205_vm10, 1.0, %v9599_v39  ;;  %v9885_v26 = vsel %vm93_vm11, 1.0, %v9599_v39  ;;  %vm761_vm10 = vcmask 523712   ;;  %vm768_vm11 = vcmask 589312  }
  0xb4   :  { %8755 = vmatprep.mubr.msk.f32.mxu0 %vm242_vm0, %v9885_v26  ;;  %8781 = vmatprep.mubr.msk.f32.mxu1 %vm242_vm0, %v9882_v25 }
  0xb5   :  { %v186_v27 = vpop.permute.xlu1 %185  ;;  %v74_v28 = vpop.permute.xlu0 %73 }
  0xb6   :  { %vm206_vm12 = vcmp.eq.s32.totalorder %v9726_v36, %v186_v27  ;;  %vm94_vm13 = vcmp.eq.s32.totalorder %v9726_v36, %v74_v28 }
  0xb7   :  { %v9894_v29 = vsel %vm206_vm12, 1.0, %v9599_v39  ;;  %v9897_v30 = vsel %vm94_vm13, 1.0, %v9599_v39  ;;  %vm775_vm12 = vcmask 654912   ;;  %vm11859_vm13 = vcmask 720512  }
  0xb8   :  { %11863 = vst [vmem:[#allocation6_spill] sm:$0xff] %v9894_v29  ;;  %11864 = vst [vmem:[#allocation7_spill] sm:$0xff] %v9897_v30  ;;  %8756 = vmatmul.mubr.msk.f32.gmra.mrb[12].mxu0 %vm242_vm0, %v9897_v30  ;;  %8782 = vmatmul.mubr.msk.f32.gmra.mrb[12].mxu1 %vm242_vm0, %v9894_v29 }
  0xb9   :  { %v189_v31 = vpop.permute.xlu1 %188  ;;  %v77_v32 = vpop.permute.xlu0 %76 }
  0xba   :  { %vm207_vm14 = vcmp.eq.s32.totalorder %v9726_v36, %v189_v31  ;;  %vm95_vm15 = vcmp.eq.s32.totalorder %v9726_v36, %v77_v32 }
  0xbb   :  { %v9906_v33 = vsel %vm207_vm14, 1.0, %v9599_v39  ;;  %v9909_v34 = vsel %vm95_vm15, 1.0, %v9599_v39  ;;  %vm789_vm14 = vcmask 786112   ;;  %vm11854_vm15 = vcmask 851712  }
  0xbc   :  { %11865 = vst [vmem:[#allocation8_spill] sm:$0xff] %v9906_v33  ;;  %8758 = vmatprep.mubr.msk.f32.mxu0 %vm242_vm0, %v9909_v34  ;;  %8784 = vmatprep.mubr.msk.f32.mxu1 %vm242_vm0, %v9906_v33 }
  0xbd   :  { %v192_v37 = vpop.permute.xlu1 %191  ;;  %v80_v38 = vpop.permute.xlu0 %79 }
  0xbe   :  { %vm208_vm1 = vcmp.eq.s32.totalorder %v9726_v36, %v192_v37  ;;  %vm96_vm2 = vcmp.eq.s32.totalorder %v9726_v36, %v80_v38 }
  0xbf   :  { %v9918_v43 = vsel %vm208_vm1, 1.0, %v9599_v39  ;;  %v9921_v44 = vsel %vm96_vm2, 1.0, %v9599_v39  ;;  %v7762_v39 = vld [vmem:[%s11842_s2 + $0x18] sm:$0xff]  ;;  %vm803_vm1 = vcmask 917312   ;;  %vm810_vm2 = vcmask 982912  }
  0xc0   :  { %8759 = vmatmul.mubr.msk.f32.gmra.mrb[14].mxu0 %vm242_vm0, %v9921_v44  ;;  %8785 = vmatmul.mubr.msk.f32.gmra.mrb[14].mxu1 %vm242_vm0, %v9918_v43 }
  0xc1   :  { %8789 = vmatprep.mubr.msk.f32.mxu0 %vm242_vm0, %v9734_v41  ;;  %8815 = vmatprep.mubr.msk.f32.mxu1 %vm242_vm0, %v9751_v46 }
  0xc4   :  { %8790 = vmatmul.mubr.msk.f32.vlgmr.msra.gmra.mrb[16].mxu0 %vm242_vm0, %v9731_v40  ;;  %8816 = vmatmul.mubr.msk.f32.vlgmr.msra.gmra.mrb[16].mxu1 %vm242_vm0, %v9748_v45 }
  0xc5   :  { %8840 = vmatpush3.msra.mxu0 %v9741_v42  ;;  %8866 = vmatpush3.msra.mxu1 %v9741_v42  ;;  %v7795_v42 = vld [vmem:[%s11842_s2 + $0x20] sm:$0xff] }
  0xc6   :  { %8792 = vmatprep.mubr.msk.f32.mxu0 %vm242_vm0, %v9764_v50  ;;  %8818 = vmatprep.mubr.msk.f32.mxu1 %vm242_vm0, %v9761_v49 }
  0xc7   :  { %8891 = vmatprep.subr.mxu0 %v7762_v39  ;;  %8917 = vmatprep.subr.mxu1 %v7762_v39 }
  0xc8   :  { %8793 = vmatmul.mubr.msk.f32.gmra.mrb[18].mxu0 %vm242_vm0, %v9777_v54  ;;  %8819 = vmatmul.mubr.msk.f32.gmra.mrb[18].mxu1 %vm242_vm0, %v9774_v53 }
  0xc9   :  { %8795 = vmatprep.mubr.msk.f32.mxu0 %vm242_vm0, %v9789_v58  ;;  %8821 = vmatprep.mubr.msk.f32.mxu1 %vm242_vm0, %v9786_v57 }
  0xcc   :  { %8796 = vmatmul.mubr.msk.f32.gmra.mrb[20].mxu0 %vm242_vm0, %v9801_v62  ;;  %8822 = vmatmul.mubr.msk.f32.gmra.mrb[20].mxu1 %vm242_vm0, %v9798_v61 }
  0xcd   :  { %8798 = vmatprep.mubr.msk.f32.mxu0 %vm242_vm0, %v9813_v2  ;;  %8824 = vmatprep.mubr.msk.f32.mxu1 %vm242_vm0, %v9810_v1 }
  0xd0   :  { %8799 = vmatmul.mubr.msk.f32.gmra.mrb[22].mxu0 %vm242_vm0, %v9825_v6  ;;  %8825 = vmatmul.mubr.msk.f32.gmra.mrb[22].mxu1 %vm242_vm0, %v9822_v5 }
  0xd1   :  { %8801 = vmatprep.mubr.msk.f32.mxu0 %vm242_vm0, %v9837_v10  ;;  %8827 = vmatprep.mubr.msk.f32.mxu1 %vm242_vm0, %v9834_v9 }
  0xd4   :  { %8802 = vmatmul.mubr.msk.f32.gmra.mrb[24].mxu0 %vm242_vm0, %v9849_v14  ;;  %8828 = vmatmul.mubr.msk.f32.gmra.mrb[24].mxu1 %vm242_vm0, %v9846_v13 }
  0xd5   :  { %8804 = vmatprep.mubr.msk.f32.mxu0 %vm242_vm0, %v9861_v18  ;;  %8830 = vmatprep.mubr.msk.f32.mxu1 %vm242_vm0, %v9858_v17 }
  0xd8   :  { %8805 = vmatmul.mubr.msk.f32.gmra.mrb[26].mxu0 %vm242_vm0, %v9873_v22  ;;  %8831 = vmatmul.mubr.msk.f32.gmra.mrb[26].mxu1 %vm242_vm0, %v9870_v21 }
  0xd9   :  { %8807 = vmatprep.mubr.msk.f32.mxu0 %vm242_vm0, %v9885_v26  ;;  %8833 = vmatprep.mubr.msk.f32.mxu1 %vm242_vm0, %v9882_v25 }
  0xdc   :  { %8808 = vmatmul.mubr.msk.f32.gmra.mrb[28].mxu0 %vm242_vm0, %v9897_v30  ;;  %8834 = vmatmul.mubr.msk.f32.gmra.mrb[28].mxu1 %vm242_vm0, %v9894_v29 }
  0xdd   :  { %8810 = vmatprep.mubr.msk.f32.mxu0 %vm242_vm0, %v9909_v34  ;;  %8836 = vmatprep.mubr.msk.f32.mxu1 %vm242_vm0, %v9906_v33 }
  0xe0   :  { %8811 = vmatmul.mubr.msk.f32.gmra.mrb[30].mxu0 %vm242_vm0, %v9921_v44  ;;  %8837 = vmatmul.mubr.msk.f32.gmra.mrb[30].mxu1 %vm242_vm0, %v9918_v43 }
  0xe1   :  { %8841 = vmatprep.mubr.msk.f32.mxu0 %vm242_vm0, %v9734_v41  ;;  %8867 = vmatprep.mubr.msk.f32.mxu1 %vm242_vm0, %v9751_v46 }
  0xe4   :  { %8842 = vmatmul.mubr.msk.f32.vlgmr.msra.gmra.mrb[32].mxu0 %vm242_vm0, %v9731_v40  ;;  %8868 = vmatmul.mubr.msk.f32.vlgmr.msra.gmra.mrb[32].mxu1 %vm242_vm0, %v9748_v45 }
  0xe5   :  { %8892 = vmatpush3.msra.mxu0 %v7762_v39  ;;  %8918 = vmatpush3.msra.mxu1 %v7762_v39 }
  0xe6   :  { %8844 = vmatprep.mubr.msk.f32.mxu0 %vm242_vm0, %v9764_v50  ;;  %8870 = vmatprep.mubr.msk.f32.mxu1 %vm242_vm0, %v9761_v49 }
  0xe7   :  { %8943 = vmatprep.subr.mxu0 %v7795_v42  ;;  %8969 = vmatprep.subr.mxu1 %v7795_v42 }
  0xe8   :  { %8845 = vmatmul.mubr.msk.f32.gmra.mrb[34].mxu0 %vm242_vm0, %v9777_v54  ;;  %8871 = vmatmul.mubr.msk.f32.gmra.mrb[34].mxu1 %vm242_vm0, %v9774_v53 }
  0xe9   :  { %8847 = vmatprep.mubr.msk.f32.mxu0 %vm242_vm0, %v9789_v58  ;;  %8873 = vmatprep.mubr.msk.f32.mxu1 %vm242_vm0, %v9786_v57 }
  0xec   :  { %8848 = vmatmul.mubr.msk.f32.gmra.mrb[36].mxu0 %vm242_vm0, %v9801_v62  ;;  %8874 = vmatmul.mubr.msk.f32.gmra.mrb[36].mxu1 %vm242_vm0, %v9798_v61 }
  0xed   :  { %8850 = vmatprep.mubr.msk.f32.mxu0 %vm242_vm0, %v9813_v2  ;;  %8876 = vmatprep.mubr.msk.f32.mxu1 %vm242_vm0, %v9810_v1 }
  0xf0   :  { %8851 = vmatmul.mubr.msk.f32.gmra.mrb[38].mxu0 %vm242_vm0, %v9825_v6  ;;  %8877 = vmatmul.mubr.msk.f32.gmra.mrb[38].mxu1 %vm242_vm0, %v9822_v5 }
  0xf1   :  { %8853 = vmatprep.mubr.msk.f32.mxu0 %vm242_vm0, %v9837_v10  ;;  %8879 = vmatprep.mubr.msk.f32.mxu1 %vm242_vm0, %v9834_v9 }
  0xf4   :  { %8854 = vmatmul.mubr.msk.f32.gmra.mrb[40].mxu0 %vm242_vm0, %v9849_v14  ;;  %8880 = vmatmul.mubr.msk.f32.gmra.mrb[40].mxu1 %vm242_vm0, %v9846_v13 }
  0xf5   :  { %8856 = vmatprep.mubr.msk.f32.mxu0 %vm242_vm0, %v9861_v18  ;;  %8882 = vmatprep.mubr.msk.f32.mxu1 %vm242_vm0, %v9858_v17 }
  0xf8   :  { %8857 = vmatmul.mubr.msk.f32.gmra.mrb[42].mxu0 %vm242_vm0, %v9873_v22  ;;  %8883 = vmatmul.mubr.msk.f32.gmra.mrb[42].mxu1 %vm242_vm0, %v9870_v21 }
  0xf9   :  { %8859 = vmatprep.mubr.msk.f32.mxu0 %vm242_vm0, %v9885_v26  ;;  %8885 = vmatprep.mubr.msk.f32.mxu1 %vm242_vm0, %v9882_v25 }
  0xfc   :  { %8860 = vmatmul.mubr.msk.f32.gmra.mrb[44].mxu0 %vm242_vm0, %v9897_v30  ;;  %8886 = vmatmul.mubr.msk.f32.gmra.mrb[44].mxu1 %vm242_vm0, %v9894_v29 }
  0xfd   :  { %8862 = vmatprep.mubr.msk.f32.mxu0 %vm242_vm0, %v9909_v34  ;;  %8888 = vmatprep.mubr.msk.f32.mxu1 %vm242_vm0, %v9906_v33 }
 0x100   :  { %8863 = vmatmul.mubr.msk.f32.gmra.mrb[46].mxu0 %vm242_vm0, %v9921_v44  ;;  %8889 = vmatmul.mubr.msk.f32.gmra.mrb[46].mxu1 %vm242_vm0, %v9918_v43 }
 0x101   :  { %8893 = vmatprep.mubr.msk.f32.mxu0 %vm242_vm0, %v9734_v41  ;;  %8919 = vmatprep.mubr.msk.f32.mxu1 %vm242_vm0, %v9751_v46 }
 0x104   :  { %8894 = vmatmul.mubr.msk.f32.vlgmr.msra.gmra.mrb[48].mxu0 %vm242_vm0, %v9731_v40  ;;  %8920 = vmatmul.mubr.msk.f32.vlgmr.msra.gmra.mrb[48].mxu1 %vm242_vm0, %v9748_v45 }
 0x105   :  { %8944 = vmatpush3.msra.mxu0 %v7795_v42  ;;  %8970 = vmatpush3.msra.mxu1 %v7795_v42 }
 0x106   :  { %8896 = vmatprep.mubr.msk.f32.mxu0 %vm242_vm0, %v9764_v50  ;;  %8922 = vmatprep.mubr.msk.f32.mxu1 %vm242_vm0, %v9761_v49 }
 0x107   :  { %8995 = vmatprep.subr.mxu0 %v7828_v47  ;;  %9021 = vmatprep.subr.mxu1 %v7828_v47 }
 0x108   :  { %8897 = vmatmul.mubr.msk.f32.gmra.mrb[50].mxu0 %vm242_vm0, %v9777_v54  ;;  %8923 = vmatmul.mubr.msk.f32.gmra.mrb[50].mxu1 %vm242_vm0, %v9774_v53 }
 0x109   :  { %8899 = vmatprep.mubr.msk.f32.mxu0 %vm242_vm0, %v9789_v58  ;;  %8925 = vmatprep.mubr.msk.f32.mxu1 %vm242_vm0, %v9786_v57 }
 0x10c   :  { %8900 = vmatmul.mubr.msk.f32.gmra.mrb[52].mxu0 %vm242_vm0, %v9801_v62  ;;  %8926 = vmatmul.mubr.msk.f32.gmra.mrb[52].mxu1 %vm242_vm0, %v9798_v61 }
 0x10d   :  { %8902 = vmatprep.mubr.msk.f32.mxu0 %vm242_vm0, %v9813_v2  ;;  %8928 = vmatprep.mubr.msk.f32.mxu1 %vm242_vm0, %v9810_v1 }
 0x110   :  { %8903 = vmatmul.mubr.msk.f32.gmra.mrb[54].mxu0 %vm242_vm0, %v9825_v6  ;;  %8929 = vmatmul.mubr.msk.f32.gmra.mrb[54].mxu1 %vm242_vm0, %v9822_v5 }
 0x111   :  { %8905 = vmatprep.mubr.msk.f32.mxu0 %vm242_vm0, %v9837_v10  ;;  %8931 = vmatprep.mubr.msk.f32.mxu1 %vm242_vm0, %v9834_v9 }
 0x114   :  { %8906 = vmatmul.mubr.msk.f32.gmra.mrb[56].mxu0 %vm242_vm0, %v9849_v14  ;;  %8932 = vmatmul.mubr.msk.f32.gmra.mrb[56].mxu1 %vm242_vm0, %v9846_v13 }
 0x115   :  { %8908 = vmatprep.mubr.msk.f32.mxu0 %vm242_vm0, %v9861_v18  ;;  %8934 = vmatprep.mubr.msk.f32.mxu1 %vm242_vm0, %v9858_v17 }
 0x118   :  { %8909 = vmatmul.mubr.msk.f32.gmra.mrb[58].mxu0 %vm242_vm0, %v9873_v22  ;;  %8935 = vmatmul.mubr.msk.f32.gmra.mrb[58].mxu1 %vm242_vm0, %v9870_v21 }
 0x119   :  { %8911 = vmatprep.mubr.msk.f32.mxu0 %vm242_vm0, %v9885_v26  ;;  %8937 = vmatprep.mubr.msk.f32.mxu1 %vm242_vm0, %v9882_v25 }
 0x11c   :  { %8912 = vmatmul.mubr.msk.f32.gmra.mrb[60].mxu0 %vm242_vm0, %v9897_v30  ;;  %8938 = vmatmul.mubr.msk.f32.gmra.mrb[60].mxu1 %vm242_vm0, %v9894_v29 }
 0x11d   :  { %8914 = vmatprep.mubr.msk.f32.mxu0 %vm242_vm0, %v9909_v34  ;;  %8940 = vmatprep.mubr.msk.f32.mxu1 %vm242_vm0, %v9906_v33 }
 0x120   :  { %8915 = vmatmul.mubr.msk.f32.gmra.mrb[62].mxu0 %vm242_vm0, %v9921_v44  ;;  %8941 = vmatmul.mubr.msk.f32.gmra.mrb[62].mxu1 %vm242_vm0, %v9918_v43 }
 0x121   :  { %8945 = vmatprep.mubr.msk.f32.mxu0 %vm242_vm0, %v9734_v41  ;;  %8971 = vmatprep.mubr.msk.f32.mxu1 %vm242_vm0, %v9751_v46 }
 0x124   :  { %8946 = vmatmul.mubr.msk.f32.vlgmr.msra.gmra.mrb[64].mxu0 %vm242_vm0, %v9731_v40  ;;  %8972 = vmatmul.mubr.msk.f32.vlgmr.msra.gmra.mrb[64].mxu1 %vm242_vm0, %v9748_v45 }
 0x125   :  { %8996 = vmatpush3.msra.mxu0 %v7828_v47  ;;  %9022 = vmatpush3.msra.mxu1 %v7828_v47 }
 0x126   :  { %8948 = vmatprep.mubr.msk.f32.mxu0 %vm242_vm0, %v9764_v50  ;;  %8974 = vmatprep.mubr.msk.f32.mxu1 %vm242_vm0, %v9761_v49 }
 0x127   :  { %9047 = vmatprep.subr.mxu0 %v7861_v48  ;;  %9073 = vmatprep.subr.mxu1 %v7861_v48 }
 0x128   :  { %8949 = vmatmul.mubr.msk.f32.gmra.mrb[66].mxu0 %vm242_vm0, %v9777_v54  ;;  %8975 = vmatmul.mubr.msk.f32.gmra.mrb[66].mxu1 %vm242_vm0, %v9774_v53 }
 0x129   :  { %8951 = vmatprep.mubr.msk.f32.mxu0 %vm242_vm0, %v9789_v58  ;;  %8977 = vmatprep.mubr.msk.f32.mxu1 %vm242_vm0, %v9786_v57 }
 0x12c   :  { %8952 = vmatmul.mubr.msk.f32.gmra.mrb[68].mxu0 %vm242_vm0, %v9801_v62  ;;  %8978 = vmatmul.mubr.msk.f32.gmra.mrb[68].mxu1 %vm242_vm0, %v9798_v61 }
 0x12d   :  { %8954 = vmatprep.mubr.msk.f32.mxu0 %vm242_vm0, %v9813_v2  ;;  %8980 = vmatprep.mubr.msk.f32.mxu1 %vm242_vm0, %v9810_v1 }
 0x130   :  { %8955 = vmatmul.mubr.msk.f32.gmra.mrb[70].mxu0 %vm242_vm0, %v9825_v6  ;;  %8981 = vmatmul.mubr.msk.f32.gmra.mrb[70].mxu1 %vm242_vm0, %v9822_v5 }
 0x131   :  { %8957 = vmatprep.mubr.msk.f32.mxu0 %vm242_vm0, %v9837_v10  ;;  %8983 = vmatprep.mubr.msk.f32.mxu1 %vm242_vm0, %v9834_v9 }
 0x134   :  { %8958 = vmatmul.mubr.msk.f32.gmra.mrb[72].mxu0 %vm242_vm0, %v9849_v14  ;;  %8984 = vmatmul.mubr.msk.f32.gmra.mrb[72].mxu1 %vm242_vm0, %v9846_v13 }
 0x135   :  { %8960 = vmatprep.mubr.msk.f32.mxu0 %vm242_vm0, %v9861_v18  ;;  %8986 = vmatprep.mubr.msk.f32.mxu1 %vm242_vm0, %v9858_v17 }
 0x138   :  { %8961 = vmatmul.mubr.msk.f32.gmra.mrb[74].mxu0 %vm242_vm0, %v9873_v22  ;;  %8987 = vmatmul.mubr.msk.f32.gmra.mrb[74].mxu1 %vm242_vm0, %v9870_v21 }
 0x139   :  { %8963 = vmatprep.mubr.msk.f32.mxu0 %vm242_vm0, %v9885_v26  ;;  %8989 = vmatprep.mubr.msk.f32.mxu1 %vm242_vm0, %v9882_v25 }
 0x13c   :  { %8964 = vmatmul.mubr.msk.f32.gmra.mrb[76].mxu0 %vm242_vm0, %v9897_v30  ;;  %8990 = vmatmul.mubr.msk.f32.gmra.mrb[76].mxu1 %vm242_vm0, %v9894_v29 }
 0x13d   :  { %8966 = vmatprep.mubr.msk.f32.mxu0 %vm242_vm0, %v9909_v34  ;;  %8992 = vmatprep.mubr.msk.f32.mxu1 %vm242_vm0, %v9906_v33 }
 0x140   :  { %8967 = vmatmul.mubr.msk.f32.gmra.mrb[78].mxu0 %vm242_vm0, %v9921_v44  ;;  %8993 = vmatmul.mubr.msk.f32.gmra.mrb[78].mxu1 %vm242_vm0, %v9918_v43 }
 0x141   :  { %8997 = vmatprep.mubr.msk.f32.mxu0 %vm242_vm0, %v9734_v41  ;;  %9023 = vmatprep.mubr.msk.f32.mxu1 %vm242_vm0, %v9751_v46 }
 0x144   :  { %8998 = vmatmul.mubr.msk.f32.vlgmr.msra.gmra.mrb[80].mxu0 %vm242_vm0, %v9731_v40  ;;  %9024 = vmatmul.mubr.msk.f32.vlgmr.msra.gmra.mrb[80].mxu1 %vm242_vm0, %v9748_v45 }
 0x145   :  { %9048 = vmatpush3.msra.mxu0 %v7861_v48  ;;  %9074 = vmatpush3.msra.mxu1 %v7861_v48 }
 0x146   :  { %9000 = vmatprep.mubr.msk.f32.mxu0 %vm242_vm0, %v9764_v50  ;;  %9026 = vmatprep.mubr.msk.f32.mxu1 %vm242_vm0, %v9761_v49 }
 0x147   :  { %9099 = vmatprep.subr.mxu0 %v7894_v51  ;;  %9125 = vmatprep.subr.mxu1 %v7894_v51 }
 0x148   :  { %9001 = vmatmul.mubr.msk.f32.gmra.mrb[82].mxu0 %vm242_vm0, %v9777_v54  ;;  %9027 = vmatmul.mubr.msk.f32.gmra.mrb[82].mxu1 %vm242_vm0, %v9774_v53 }
 0x149   :  { %9003 = vmatprep.mubr.msk.f32.mxu0 %vm242_vm0, %v9789_v58  ;;  %9029 = vmatprep.mubr.msk.f32.mxu1 %vm242_vm0, %v9786_v57 }
 0x14c   :  { %9004 = vmatmul.mubr.msk.f32.gmra.mrb[84].mxu0 %vm242_vm0, %v9801_v62  ;;  %9030 = vmatmul.mubr.msk.f32.gmra.mrb[84].mxu1 %vm242_vm0, %v9798_v61 }
 0x14d   :  { %9006 = vmatprep.mubr.msk.f32.mxu0 %vm242_vm0, %v9813_v2  ;;  %9032 = vmatprep.mubr.msk.f32.mxu1 %vm242_vm0, %v9810_v1 }
 0x150   :  { %9007 = vmatmul.mubr.msk.f32.gmra.mrb[86].mxu0 %vm242_vm0, %v9825_v6  ;;  %9033 = vmatmul.mubr.msk.f32.gmra.mrb[86].mxu1 %vm242_vm0, %v9822_v5 }
 0x151   :  { %9009 = vmatprep.mubr.msk.f32.mxu0 %vm242_vm0, %v9837_v10  ;;  %9035 = vmatprep.mubr.msk.f32.mxu1 %vm242_vm0, %v9834_v9 }
 0x154   :  { %9010 = vmatmul.mubr.msk.f32.gmra.mrb[88].mxu0 %vm242_vm0, %v9849_v14  ;;  %9036 = vmatmul.mubr.msk.f32.gmra.mrb[88].mxu1 %vm242_vm0, %v9846_v13 }
 0x155   :  { %9012 = vmatprep.mubr.msk.f32.mxu0 %vm242_vm0, %v9861_v18  ;;  %9038 = vmatprep.mubr.msk.f32.mxu1 %vm242_vm0, %v9858_v17 }
 0x158   :  { %v8739_v52 = vpop.f32.mrb[0].mxu0  ;;  %9013 = vmatmul.mubr.msk.f32.gmra.mrb[90].mxu0 %vm242_vm0, %v9873_v22  ;;  %9039 = vmatmul.mubr.msk.f32.gmra.mrb[90].mxu1 %vm242_vm0, %v9870_v21 }
 0x159   :  { %v357_v55 = vpop.f32.mrb[1].mxu0  ;;  %9015 = vmatprep.mubr.msk.f32.mxu0 %vm242_vm0, %v9885_v26  ;;  %9041 = vmatprep.mubr.msk.f32.mxu1 %vm242_vm0, %v9882_v25 }
 0x15c   :  { %v8765_v56 = vpop.f32.mrb[0].mxu1  ;;  %9016 = vmatmul.mubr.msk.f32.gmra.mrb[92].mxu0 %vm242_vm0, %v9897_v30  ;;  %9042 = vmatmul.mubr.msk.f32.gmra.mrb[92].mxu1 %vm242_vm0, %v9894_v29 }
 0x15d   :  { %v630_v59 = vmul.f32 %v8765_v56, %v8739_v52  ;;  %v550_v60 = vpop.f32.mrb[1].mxu1  ;;  %9018 = vmatprep.mubr.msk.f32.mxu0 %vm242_vm0, %v9909_v34  ;;  %9044 = vmatprep.mubr.msk.f32.mxu1 %vm242_vm0, %v9906_v33 }
 0x15e   :  { %v629_v63 = vmul.f32 %v550_v60, %v357_v55 }
 0x15f   :  { %v649_v0 = vsel %vm645_vm3, %v630_v59, 0.0 }
 0x160   :  { %9019 = vmatmul.mubr.msk.f32.gmra.mrb[94].mxu0 %vm242_vm0, %v9921_v44  ;;  %9045 = vmatmul.mubr.msk.f32.gmra.mrb[94].mxu1 %vm242_vm0, %v9918_v43  ;;  %v646_v3 = vsel %vm645_vm3, %v629_v63, 0.0 }
 0x161   :  { %650 = vadd.xlane.f32.xlu1 %v649_v0  ;;  %9049 = vmatprep.mubr.msk.f32.mxu0 %vm242_vm0, %v9734_v41 }
 0x162   :  { %9075 = vmatprep.mubr.msk.f32.mxu1 %vm242_vm0, %v9751_v46  ;;  %647 = vadd.xlane.f32.xlu0 %v646_v3 }
 0x163   :  { %v8742_v4 = vpop.f32.mrb[2].mxu0  ;;  %v8768_v7 = vpop.f32.mrb[2].mxu1 }
 0x164   :  { %v632_v8 = vmul.f32 %v8768_v7, %v8742_v4  ;;  %v367_v11 = vpop.f32.mrb[3].mxu0  ;;  %v560_v12 = vpop.f32.mrb[3].mxu1  ;;  %9050 = vmatmul.mubr.msk.f32.vlgmr.msra.gmra.mrb[96].mxu0 %vm242_vm0, %v9731_v40  ;;  %9076 = vmatmul.mubr.msk.f32.vlgmr.msra.gmra.mrb[96].mxu1 %vm242_vm0, %v9748_v45 }
 0x165   :  { %v631_v16 = vmul.f32 %v560_v12, %v367_v11  ;;  %9100 = vmatpush3.msra.mxu0 %v7894_v51  ;;  %9126 = vmatpush3.msra.mxu1 %v7894_v51 }
 0x166   :  { %9052 = vmatprep.mubr.msk.f32.mxu0 %vm242_vm0, %v9764_v50  ;;  %9078 = vmatprep.mubr.msk.f32.mxu1 %vm242_vm0, %v9761_v49  ;;  %v655_v19 = vsel %vm645_vm3, %v632_v8, 0.0 }
 0x167   :  { %656 = vadd.xlane.f32.xlu0 %v655_v19  ;;  %9151 = vmatprep.subr.mxu0 %v10277_v15  ;;  %v652_v20 = vsel %vm645_vm3, %v631_v16, 0.0 }
 0x168   :  { %9053 = vmatmul.mubr.msk.f32.gmra.mrb[98].mxu0 %vm242_vm0, %v9777_v54  ;;  %9079 = vmatmul.mubr.msk.f32.gmra.mrb[98].mxu1 %vm242_vm0, %v9774_v53 }
 0x169   :  { %9055 = vmatprep.mubr.msk.f32.mxu0 %vm242_vm0, %v9789_v58  ;;  %9081 = vmatprep.mubr.msk.f32.mxu1 %vm242_vm0, %v9786_v57 }
 0x16a   :  { %9177 = vmatprep.subr.mxu1 %v10277_v15 }
 0x16b   :  { %v8771_v23 = vpop.f32.mrb[4].mxu1  ;;  %653 = vadd.xlane.f32.xlu0 %v652_v20  ;;  %v8745_v24 = vpop.f32.mrb[4].mxu0 }
 0x16c   :  { %v634_v27 = vmul.f32 %v8771_v23, %v8745_v24  ;;  %v377_v28 = vpop.f32.mrb[5].mxu0  ;;  %v570_v31 = vpop.f32.mrb[5].mxu1  ;;  %9056 = vmatmul.mubr.msk.f32.gmra.mrb[100].mxu0 %vm242_vm0, %v9801_v62  ;;  %9082 = vmatmul.mubr.msk.f32.gmra.mrb[100].mxu1 %vm242_vm0, %v9798_v61  ;;  %v10356_v23 = vld [vmem:[%s11842_s2 + $0x48] sm:$0xff] }
 0x16d   :  { %v633_v32 = vmul.f32 %v570_v31, %v377_v28  ;;  %9058 = vmatprep.mubr.msk.f32.mxu0 %vm242_vm0, %v9813_v2  ;;  %9084 = vmatprep.mubr.msk.f32.mxu1 %vm242_vm0, %v9810_v1 }
 0x16e   :  { %v661_v37 = vsel %vm645_vm3, %v634_v27, 0.0 }
 0x16f   :  { %662 = vadd.xlane.f32.xlu0 %v661_v37  ;;  %v658_v38 = vsel %vm645_vm3, %v633_v32, 0.0 }
 0x170   :  { %9059 = vmatmul.mubr.msk.f32.gmra.mrb[102].mxu0 %vm242_vm0, %v9825_v6  ;;  %9085 = vmatmul.mubr.msk.f32.gmra.mrb[102].mxu1 %vm242_vm0, %v9822_v5 }
 0x171   :  { %659 = vadd.xlane.f32.xlu1 %v658_v38  ;;  %9061 = vmatprep.mubr.msk.f32.mxu0 %vm242_vm0, %v9837_v10 }
 0x172   :  { %9087 = vmatprep.mubr.msk.f32.mxu1 %vm242_vm0, %v9834_v9 }
 0x173   :  { %v8748_v39 = vpop.f32.mrb[6].mxu0  ;;  %v8774_v42 = vpop.f32.mrb[6].mxu1 }
 0x174   :  { %v636_v47 = vmul.f32 %v8774_v42, %v8748_v39  ;;  %v387_v48 = vpop.f32.mrb[7].mxu0  ;;  %v580_v51 = vpop.f32.mrb[7].mxu1  ;;  %9062 = vmatmul.mubr.msk.f32.gmra.mrb[104].mxu0 %vm242_vm0, %v9849_v14  ;;  %9088 = vmatmul.mubr.msk.f32.gmra.mrb[104].mxu1 %vm242_vm0, %v9846_v13 }
 0x175   :  { %v635_v52 = vmul.f32 %v580_v51, %v387_v48  ;;  %9064 = vmatprep.mubr.msk.f32.mxu0 %vm242_vm0, %v9861_v18  ;;  %9090 = vmatprep.mubr.msk.f32.mxu1 %vm242_vm0, %v9858_v17 }
 0x176   :  { %v667_v55 = vsel %vm645_vm3, %v636_v47, 0.0 }
 0x177   :  { %668 = vadd.xlane.f32.xlu0 %v667_v55  ;;  %v664_v56 = vsel %vm645_vm3, %v635_v52, 0.0 }
 0x178   :  { %9065 = vmatmul.mubr.msk.f32.gmra.mrb[106].mxu0 %vm242_vm0, %v9873_v22  ;;  %9091 = vmatmul.mubr.msk.f32.gmra.mrb[106].mxu1 %vm242_vm0, %v9870_v21 }
 0x179   :  { %665 = vadd.xlane.f32.xlu1 %v664_v56  ;;  %9067 = vmatprep.mubr.msk.f32.mxu0 %vm242_vm0, %v9885_v26 }
 0x17a   :  { %9093 = vmatprep.mubr.msk.f32.mxu1 %vm242_vm0, %v9882_v25 }
 0x17b   :  { %v8751_v59 = vpop.f32.mrb[8].mxu0  ;;  %v8777_v60 = vpop.f32.mrb[8].mxu1 }
 0x17c   :  { %v638_v63 = vmul.f32 %v8777_v60, %v8751_v59  ;;  %v397_v0 = vpop.f32.mrb[9].mxu0  ;;  %v590_v3 = vpop.f32.mrb[9].mxu1  ;;  %9068 = vmatmul.mubr.msk.f32.gmra.mrb[108].mxu0 %vm242_vm0, %v9897_v30  ;;  %9094 = vmatmul.mubr.msk.f32.gmra.mrb[108].mxu1 %vm242_vm0, %v9894_v29 }
 0x17d   :  { %v637_v4 = vmul.f32 %v590_v3, %v397_v0  ;;  %9070 = vmatprep.mubr.msk.f32.mxu0 %vm242_vm0, %v9909_v34  ;;  %9096 = vmatprep.mubr.msk.f32.mxu1 %vm242_vm0, %v9906_v33 }
 0x17e   :  { %v673_v7 = vsel %vm645_vm3, %v638_v63, 0.0 }
 0x17f   :  { %674 = vadd.xlane.f32.xlu0 %v673_v7  ;;  %v670_v8 = vsel %vm645_vm3, %v637_v4, 0.0 }
 0x180   :  { %9071 = vmatmul.mubr.msk.f32.gmra.mrb[110].mxu0 %vm242_vm0, %v9921_v44  ;;  %9097 = vmatmul.mubr.msk.f32.gmra.mrb[110].mxu1 %vm242_vm0, %v9918_v43 }
 0x181   :  { %671 = vadd.xlane.f32.xlu1 %v670_v8  ;;  %9101 = vmatprep.mubr.msk.f32.mxu0 %vm242_vm0, %v9734_v41 }
 0x182   :  { %9127 = vmatprep.mubr.msk.f32.mxu1 %vm242_vm0, %v9751_v46 }
 0x183   :  { %v8754_v11 = vpop.f32.mrb[10].mxu0  ;;  %v8780_v12 = vpop.f32.mrb[10].mxu1 }
 0x184   :  { %v640_v16 = vmul.f32 %v8780_v12, %v8754_v11  ;;  %v407_v19 = vpop.f32.mrb[11].mxu0  ;;  %v600_v20 = vpop.f32.mrb[11].mxu1  ;;  %9102 = vmatmul.mubr.msk.f32.vlgmr.msra.gmra.mrb[112].mxu0 %vm242_vm0, %v9731_v40  ;;  %9128 = vmatmul.mubr.msk.f32.vlgmr.msra.gmra.mrb[112].mxu1 %vm242_vm0, %v9748_v45 }
 0x185   :  { %v639_v24 = vmul.f32 %v600_v20, %v407_v19  ;;  %9152 = vmatpush3.msra.mxu0 %v10277_v15  ;;  %9178 = vmatpush3.msra.mxu1 %v10277_v15 }
 0x186   :  { %9104 = vmatprep.mubr.msk.f32.mxu0 %vm242_vm0, %v9764_v50  ;;  %9130 = vmatprep.mubr.msk.f32.mxu1 %vm242_vm0, %v9761_v49  ;;  %v679_v27 = vsel %vm645_vm3, %v640_v16, 0.0 }
 0x187   :  { %680 = vadd.xlane.f32.xlu0 %v679_v27  ;;  %v676_v28 = vsel %vm645_vm3, %v639_v24, 0.0  ;;  %9203 = vmatprep.subr.mxu0 %v10356_v23 }
 0x188   :  { %9105 = vmatmul.mubr.msk.f32.gmra.mrb[114].mxu0 %vm242_vm0, %v9777_v54  ;;  %9131 = vmatmul.mubr.msk.f32.gmra.mrb[114].mxu1 %vm242_vm0, %v9774_v53 }
 0x189   :  { %677 = vadd.xlane.f32.xlu1 %v676_v28  ;;  %9107 = vmatprep.mubr.msk.f32.mxu0 %vm242_vm0, %v9789_v58 }
 0x18a   :  { %9133 = vmatprep.mubr.msk.f32.mxu1 %vm242_vm0, %v9786_v57  ;;  %9229 = vmatprep.subr.mxu1 %v10356_v23 }
 0x18b   :  { %v8757_v15 = vpop.f32.mrb[12].mxu0  ;;  %v8783_v31 = vpop.f32.mrb[12].mxu1 }
 0x18c   :  { %v642_v32 = vmul.f32 %v8783_v31, %v8757_v15  ;;  %v417_v37 = vpop.f32.mrb[13].mxu0  ;;  %v610_v38 = vpop.f32.mrb[13].mxu1  ;;  %9108 = vmatmul.mubr.msk.f32.gmra.mrb[116].mxu0 %vm242_vm0, %v9801_v62  ;;  %9134 = vmatmul.mubr.msk.f32.gmra.mrb[116].mxu1 %vm242_vm0, %v9798_v61 }
 0x18d   :  { %v641_v39 = vmul.f32 %v610_v38, %v417_v37  ;;  %9110 = vmatprep.mubr.msk.f32.mxu0 %vm242_vm0, %v9813_v2  ;;  %9136 = vmatprep.mubr.msk.f32.mxu1 %vm242_vm0, %v9810_v1 }
 0x18e   :  { %v685_v42 = vsel %vm645_vm3, %v642_v32, 0.0 }
 0x18f   :  { %686 = vadd.xlane.f32.xlu0 %v685_v42  ;;  %v682_v47 = vsel %vm645_vm3, %v641_v39, 0.0 }
 0x190   :  { %9111 = vmatmul.mubr.msk.f32.gmra.mrb[118].mxu0 %vm242_vm0, %v9825_v6  ;;  %9137 = vmatmul.mubr.msk.f32.gmra.mrb[118].mxu1 %vm242_vm0, %v9822_v5 }
 0x191   :  { %683 = vadd.xlane.f32.xlu1 %v682_v47  ;;  %9113 = vmatprep.mubr.msk.f32.mxu0 %vm242_vm0, %v9837_v10 }
 0x192   :  { %9139 = vmatprep.mubr.msk.f32.mxu1 %vm242_vm0, %v9834_v9 }
 0x193   :  { %v8760_v48 = vpop.f32.mrb[14].mxu0  ;;  %v8786_v51 = vpop.f32.mrb[14].mxu1 }
 0x194   :  { %v644_v52 = vmul.f32 %v8786_v51, %v8760_v48  ;;  %v427_v55 = vpop.f32.mrb[15].mxu0  ;;  %v620_v56 = vpop.f32.mrb[15].mxu1  ;;  %9114 = vmatmul.mubr.msk.f32.gmra.mrb[120].mxu0 %vm242_vm0, %v9849_v14  ;;  %9140 = vmatmul.mubr.msk.f32.gmra.mrb[120].mxu1 %vm242_vm0, %v9846_v13 }
 0x195   :  { %v643_v59 = vmul.f32 %v620_v56, %v427_v55  ;;  %9116 = vmatprep.mubr.msk.f32.mxu0 %vm242_vm0, %v9861_v18  ;;  %9142 = vmatprep.mubr.msk.f32.mxu1 %vm242_vm0, %v9858_v17 }
 0x196   :  { %v691_v60 = vsel %vm645_vm3, %v644_v52, 0.0 }
 0x197   :  { %v8817_v63 = vpop.f32.mrb[16].mxu1  ;;  %692 = vadd.xlane.f32.xlu0 %v691_v60  ;;  %v8791_v0 = vpop.f32.mrb[16].mxu0  ;;  %v688_v3 = vsel %vm645_vm3, %v643_v59, 0.0 }
 0x198   :  { %v1114_v4 = vmul.f32 %v8817_v63, %v8791_v0  ;;  %v889_v7 = vpop.f32.mrb[17].mxu0  ;;  %v1034_v8 = vpop.f32.mrb[17].mxu1  ;;  %9117 = vmatmul.mubr.msk.f32.gmra.mrb[122].mxu0 %vm242_vm0, %v9873_v22  ;;  %9143 = vmatmul.mubr.msk.f32.gmra.mrb[122].mxu1 %vm242_vm0, %v9870_v21 }
 0x199   :  { %v1113_v11 = vmul.f32 %v1034_v8, %v889_v7  ;;  %689 = vadd.xlane.f32.xlu1 %v688_v3  ;;  %9119 = vmatprep.mubr.msk.f32.mxu0 %vm242_vm0, %v9885_v26 }
 0x19a   :  { %9145 = vmatprep.mubr.msk.f32.mxu1 %vm242_vm0, %v9882_v25  ;;  %v1132_v12 = vsel %vm645_vm3, %v1114_v4, 0.0 }
 0x19b   :  { %v8820_v16 = vpop.f32.mrb[18].mxu1  ;;  %1133 = vadd.xlane.f32.xlu0 %v1132_v12  ;;  %v8794_v19 = vpop.f32.mrb[18].mxu0  ;;  %v1129_v20 = vsel %vm645_vm3, %v1113_v11, 0.0  ;;  %v10449_v11 = vld [vmem:[%s11842_s2 + $0x50] sm:$0xff] }
 0x19c   :  { %v1116_v24 = vmul.f32 %v8820_v16, %v8794_v19  ;;  %v899_v27 = vpop.f32.mrb[19].mxu0  ;;  %v1044_v28 = vpop.f32.mrb[19].mxu1  ;;  %9120 = vmatmul.mubr.msk.f32.gmra.mrb[124].mxu0 %vm242_vm0, %v9897_v30  ;;  %9146 = vmatmul.mubr.msk.f32.gmra.mrb[124].mxu1 %vm242_vm0, %v9894_v29 }
 0x19d   :  { %v1115_v15 = vmul.f32 %v1044_v28, %v899_v27  ;;  %1130 = vadd.xlane.f32.xlu1 %v1129_v20  ;;  %9122 = vmatprep.mubr.msk.f32.mxu0 %vm242_vm0, %v9909_v34 }
 0x19e   :  { %9148 = vmatprep.mubr.msk.f32.mxu1 %vm242_vm0, %v9906_v33  ;;  %v1138_v31 = vsel %vm645_vm3, %v1116_v24, 0.0 }
 0x19f   :  { %v8823_v32 = vpop.f32.mrb[20].mxu1  ;;  %1139 = vadd.xlane.f32.xlu0 %v1138_v31  ;;  %v8797_v37 = vpop.f32.mrb[20].mxu0  ;;  %v1135_v38 = vsel %vm645_vm3, %v1115_v15, 0.0 }
 0x1a0   :  { %v1118_v39 = vmul.f32 %v8823_v32, %v8797_v37  ;;  %v909_v42 = vpop.f32.mrb[21].mxu0  ;;  %v1054_v47 = vpop.f32.mrb[21].mxu1  ;;  %9123 = vmatmul.mubr.msk.f32.gmra.mrb[126].mxu0 %vm242_vm0, %v9921_v44  ;;  %9149 = vmatmul.mubr.msk.f32.gmra.mrb[126].mxu1 %vm242_vm0, %v9918_v43 }
 0x1a1   :  { %v1117_v48 = vmul.f32 %v1054_v47, %v909_v42  ;;  %1136 = vadd.xlane.f32.xlu1 %v1135_v38  ;;  %9153 = vmatprep.mubr.msk.f32.mxu0 %vm242_vm0, %v9734_v41 }
 0x1a2   :  { %9179 = vmatprep.mubr.msk.f32.mxu1 %vm242_vm0, %v9751_v46  ;;  %v1144_v51 = vsel %vm645_vm3, %v1118_v39, 0.0 }
 0x1a3   :  { %v8826_v52 = vpop.f32.mrb[22].mxu1  ;;  %1145 = vadd.xlane.f32.xlu0 %v1144_v51  ;;  %v8800_v55 = vpop.f32.mrb[22].mxu0  ;;  %v1141_v56 = vsel %vm645_vm3, %v1117_v48, 0.0 }
 0x1a4   :  { %v1120_v59 = vmul.f32 %v8826_v52, %v8800_v55  ;;  %v919_v60 = vpop.f32.mrb[23].mxu0  ;;  %v1064_v63 = vpop.f32.mrb[23].mxu1  ;;  %9154 = vmatmul.mubr.msk.f32.vlgmr.msra.gmra.mrb[128].mxu0 %vm242_vm0, %v9731_v40  ;;  %9180 = vmatmul.mubr.msk.f32.vlgmr.msra.gmra.mrb[128].mxu1 %vm242_vm0, %v9748_v45 }
 0x1a5   :  { %v1119_v0 = vmul.f32 %v1064_v63, %v919_v60  ;;  %9204 = vmatpush3.msra.mxu0 %v10356_v23  ;;  %9230 = vmatpush3.msra.mxu1 %v10356_v23 }
 0x1a6   :  { %1142 = vadd.xlane.f32.xlu1 %v1141_v56  ;;  %9156 = vmatprep.mubr.msk.f32.mxu0 %vm242_vm0, %v9764_v50  ;;  %v1150_v3 = vsel %vm645_vm3, %v1120_v59, 0.0 }
 0x1a7   :  { %9182 = vmatprep.mubr.msk.f32.mxu1 %vm242_vm0, %v9761_v49  ;;  %v8829_v4 = vpop.f32.mrb[24].mxu1  ;;  %1151 = vadd.xlane.f32.xlu0 %v1150_v3  ;;  %v8803_v7 = vpop.f32.mrb[24].mxu0  ;;  %v1147_v8 = vsel %vm645_vm3, %v1119_v0, 0.0 }
 0x1a8   :  { %v1122_v23 = vmul.f32 %v8829_v4, %v8803_v7  ;;  %v929_v12 = vpop.f32.mrb[25].mxu0  ;;  %v1074_v16 = vpop.f32.mrb[25].mxu1  ;;  %9157 = vmatmul.mubr.msk.f32.gmra.mrb[130].mxu0 %vm242_vm0, %v9777_v54  ;;  %9183 = vmatmul.mubr.msk.f32.gmra.mrb[130].mxu1 %vm242_vm0, %v9774_v53 }
 0x1a9   :  { %v1121_v19 = vmul.f32 %v1074_v16, %v929_v12  ;;  %9159 = vmatprep.mubr.msk.f32.mxu0 %vm242_vm0, %v9789_v58  ;;  %9185 = vmatprep.mubr.msk.f32.mxu1 %vm242_vm0, %v9786_v57 }
 0x1aa   :  { %1148 = vadd.xlane.f32.xlu1 %v1147_v8  ;;  %v1156_v20 = vsel %vm645_vm3, %v1122_v23, 0.0  ;;  %9255 = vmatprep.subr.mxu0 %v10449_v11 }
 0x1ab   :  { %v8832_v24 = vpop.f32.mrb[26].mxu1  ;;  %1157 = vadd.xlane.f32.xlu0 %v1156_v20  ;;  %v8806_v27 = vpop.f32.mrb[26].mxu0  ;;  %v1153_v28 = vsel %vm645_vm3, %v1121_v19, 0.0  ;;  %9281 = vmatprep.subr.mxu1 %v10449_v11 }
 0x1ac   :  { %v1124_v15 = vmul.f32 %v8832_v24, %v8806_v27  ;;  %v939_v31 = vpop.f32.mrb[27].mxu0  ;;  %v1084_v32 = vpop.f32.mrb[27].mxu1  ;;  %9160 = vmatmul.mubr.msk.f32.gmra.mrb[132].mxu0 %vm242_vm0, %v9801_v62  ;;  %9186 = vmatmul.mubr.msk.f32.gmra.mrb[132].mxu1 %vm242_vm0, %v9798_v61 }
 0x1ad   :  { %v1123_v37 = vmul.f32 %v1084_v32, %v939_v31  ;;  %9162 = vmatprep.mubr.msk.f32.mxu0 %vm242_vm0, %v9813_v2  ;;  %9188 = vmatprep.mubr.msk.f32.mxu1 %vm242_vm0, %v9810_v1 }
 0x1ae   :  { %1154 = vadd.xlane.f32.xlu1 %v1153_v28  ;;  %v1162_v38 = vsel %vm645_vm3, %v1124_v15, 0.0 }
 0x1af   :  { %v8835_v39 = vpop.f32.mrb[28].mxu1  ;;  %1163 = vadd.xlane.f32.xlu0 %v1162_v38  ;;  %v8809_v42 = vpop.f32.mrb[28].mxu0  ;;  %v1159_v47 = vsel %vm645_vm3, %v1123_v37, 0.0 }
 0x1b0   :  { %v1126_v48 = vmul.f32 %v8835_v39, %v8809_v42  ;;  %v949_v51 = vpop.f32.mrb[29].mxu0  ;;  %v1094_v52 = vpop.f32.mrb[29].mxu1  ;;  %9163 = vmatmul.mubr.msk.f32.gmra.mrb[134].mxu0 %vm242_vm0, %v9825_v6  ;;  %9189 = vmatmul.mubr.msk.f32.gmra.mrb[134].mxu1 %vm242_vm0, %v9822_v5 }
 0x1b1   :  { %v1125_v55 = vmul.f32 %v1094_v52, %v949_v51  ;;  %9165 = vmatprep.mubr.msk.f32.mxu0 %vm242_vm0, %v9837_v10  ;;  %9191 = vmatprep.mubr.msk.f32.mxu1 %vm242_vm0, %v9834_v9 }
 0x1b2   :  { %1160 = vadd.xlane.f32.xlu1 %v1159_v47  ;;  %v1168_v56 = vsel %vm645_vm3, %v1126_v48, 0.0 }
 0x1b3   :  { %v8838_v59 = vpop.f32.mrb[30].mxu1  ;;  %1169 = vadd.xlane.f32.xlu0 %v1168_v56  ;;  %v8812_v60 = vpop.f32.mrb[30].mxu0  ;;  %v1165_v63 = vsel %vm645_vm3, %v1125_v55, 0.0 }
 0x1b4   :  { %v1128_v0 = vmul.f32 %v8838_v59, %v8812_v60  ;;  %v959_v3 = vpop.f32.mrb[31].mxu0  ;;  %v1104_v4 = vpop.f32.mrb[31].mxu1  ;;  %9166 = vmatmul.mubr.msk.f32.gmra.mrb[136].mxu0 %vm242_vm0, %v9849_v14  ;;  %9192 = vmatmul.mubr.msk.f32.gmra.mrb[136].mxu1 %vm242_vm0, %v9846_v13 }
 0x1b5   :  { %v1127_v7 = vmul.f32 %v1104_v4, %v959_v3  ;;  %9168 = vmatprep.mubr.msk.f32.mxu0 %vm242_vm0, %v9861_v18  ;;  %9194 = vmatprep.mubr.msk.f32.mxu1 %vm242_vm0, %v9858_v17 }
 0x1b6   :  { %1166 = vadd.xlane.f32.xlu1 %v1165_v63  ;;  %v1174_v8 = vsel %vm645_vm3, %v1128_v0, 0.0 }
 0x1b7   :  { %v8869_v23 = vpop.f32.mrb[32].mxu1  ;;  %1175 = vadd.xlane.f32.xlu0 %v1174_v8  ;;  %v8843_v12 = vpop.f32.mrb[32].mxu0  ;;  %v1171_v16 = vsel %vm645_vm3, %v1127_v7, 0.0 }
 0x1b8   :  { %v1567_v19 = vmul.f32 %v8869_v23, %v8843_v12  ;;  %v1342_v20 = vpop.f32.mrb[33].mxu0  ;;  %v1487_v24 = vpop.f32.mrb[33].mxu1  ;;  %9169 = vmatmul.mubr.msk.f32.gmra.mrb[138].mxu0 %vm242_vm0, %v9873_v22  ;;  %9195 = vmatmul.mubr.msk.f32.gmra.mrb[138].mxu1 %vm242_vm0, %v9870_v21 }
 0x1b9   :  { %v1566_v27 = vmul.f32 %v1487_v24, %v1342_v20  ;;  %9171 = vmatprep.mubr.msk.f32.mxu0 %vm242_vm0, %v9885_v26  ;;  %9197 = vmatprep.mubr.msk.f32.mxu1 %vm242_vm0, %v9882_v25 }
 0x1ba   :  { %1172 = vadd.xlane.f32.xlu1 %v1171_v16  ;;  %v1585_v28 = vsel %vm645_vm3, %v1567_v19, 0.0 }
 0x1bb   :  { %v8872_v15 = vpop.f32.mrb[34].mxu1  ;;  %1586 = vadd.xlane.f32.xlu0 %v1585_v28  ;;  %v8846_v31 = vpop.f32.mrb[34].mxu0  ;;  %v1582_v32 = vsel %vm645_vm3, %v1566_v27, 0.0  ;;  %v10538_v27 = vld [vmem:[%s11842_s2 + $0x58] sm:$0xff] }
 0x1bc   :  { %v1569_v37 = vmul.f32 %v8872_v15, %v8846_v31  ;;  %v1352_v38 = vpop.f32.mrb[35].mxu0  ;;  %v1497_v39 = vpop.f32.mrb[35].mxu1  ;;  %9172 = vmatmul.mubr.msk.f32.gmra.mrb[140].mxu0 %vm242_vm0, %v9897_v30  ;;  %9198 = vmatmul.mubr.msk.f32.gmra.mrb[140].mxu1 %vm242_vm0, %v9894_v29 }
 0x1bd   :  { %v1568_v42 = vmul.f32 %v1497_v39, %v1352_v38  ;;  %9174 = vmatprep.mubr.msk.f32.mxu0 %vm242_vm0, %v9909_v34  ;;  %9200 = vmatprep.mubr.msk.f32.mxu1 %vm242_vm0, %v9906_v33 }
 0x1be   :  { %1583 = vadd.xlane.f32.xlu1 %v1582_v32  ;;  %v1591_v47 = vsel %vm645_vm3, %v1569_v37, 0.0 }
 0x1bf   :  { %v8875_v48 = vpop.f32.mrb[36].mxu1  ;;  %1592 = vadd.xlane.f32.xlu0 %v1591_v47  ;;  %v8849_v51 = vpop.f32.mrb[36].mxu0  ;;  %v1588_v52 = vsel %vm645_vm3, %v1568_v42, 0.0 }
 0x1c0   :  { %v1571_v55 = vmul.f32 %v8875_v48, %v8849_v51  ;;  %v1362_v56 = vpop.f32.mrb[37].mxu0  ;;  %v1507_v59 = vpop.f32.mrb[37].mxu1  ;;  %9175 = vmatmul.mubr.msk.f32.gmra.mrb[142].mxu0 %vm242_vm0, %v9921_v44  ;;  %9201 = vmatmul.mubr.msk.f32.gmra.mrb[142].mxu1 %vm242_vm0, %v9918_v43 }
 0x1c1   :  { %v1570_v60 = vmul.f32 %v1507_v59, %v1362_v56  ;;  %9205 = vmatprep.mubr.msk.f32.mxu0 %vm242_vm0, %v9734_v41  ;;  %9231 = vmatprep.mubr.msk.f32.mxu1 %vm242_vm0, %v9751_v46 }
 0x1c2   :  { %1589 = vadd.xlane.f32.xlu1 %v1588_v52  ;;  %v1597_v63 = vsel %vm645_vm3, %v1571_v55, 0.0 }
 0x1c3   :  { %v8878_v0 = vpop.f32.mrb[38].mxu1  ;;  %1598 = vadd.xlane.f32.xlu0 %v1597_v63  ;;  %v8852_v3 = vpop.f32.mrb[38].mxu0  ;;  %v1594_v4 = vsel %vm645_vm3, %v1570_v60, 0.0 }
 0x1c4   :  { %v1573_v7 = vmul.f32 %v8878_v0, %v8852_v3  ;;  %v1372_v8 = vpop.f32.mrb[39].mxu0  ;;  %v1517_v23 = vpop.f32.mrb[39].mxu1  ;;  %9206 = vmatmul.mubr.msk.f32.vlgmr.msra.gmra.mrb[144].mxu0 %vm242_vm0, %v9731_v40  ;;  %9232 = vmatmul.mubr.msk.f32.vlgmr.msra.gmra.mrb[144].mxu1 %vm242_vm0, %v9748_v45 }
 0x1c5   :  { %v1572_v12 = vmul.f32 %v1517_v23, %v1372_v8  ;;  %9256 = vmatpush3.msra.mxu0 %v10449_v11  ;;  %9282 = vmatpush3.msra.mxu1 %v10449_v11 }
 0x1c6   :  { %1595 = vadd.xlane.f32.xlu1 %v1594_v4  ;;  %9208 = vmatprep.mubr.msk.f32.mxu0 %vm242_vm0, %v9764_v50  ;;  %v1603_v16 = vsel %vm645_vm3, %v1573_v7, 0.0 }
 0x1c7   :  { %9234 = vmatprep.mubr.msk.f32.mxu1 %vm242_vm0, %v9761_v49  ;;  %v8881_v19 = vpop.f32.mrb[40].mxu1  ;;  %1604 = vadd.xlane.f32.xlu0 %v1603_v16  ;;  %v8855_v20 = vpop.f32.mrb[40].mxu0  ;;  %v1600_v24 = vsel %vm645_vm3, %v1572_v12, 0.0 }
 0x1c8   :  { %v1575_v11 = vmul.f32 %v8881_v19, %v8855_v20  ;;  %v1382_v28 = vpop.f32.mrb[41].mxu0  ;;  %v1527_v15 = vpop.f32.mrb[41].mxu1  ;;  %9209 = vmatmul.mubr.msk.f32.gmra.mrb[146].mxu0 %vm242_vm0, %v9777_v54  ;;  %9235 = vmatmul.mubr.msk.f32.gmra.mrb[146].mxu1 %vm242_vm0, %v9774_v53 }
 0x1c9   :  { %v1574_v31 = vmul.f32 %v1527_v15, %v1382_v28  ;;  %9211 = vmatprep.mubr.msk.f32.mxu0 %vm242_vm0, %v9789_v58  ;;  %9237 = vmatprep.mubr.msk.f32.mxu1 %vm242_vm0, %v9786_v57 }
 0x1ca   :  { %1601 = vadd.xlane.f32.xlu1 %v1600_v24  ;;  %v1609_v32 = vsel %vm645_vm3, %v1575_v11, 0.0  ;;  %9307 = vmatprep.subr.mxu0 %v10538_v27 }
 0x1cb   :  { %v8884_v37 = vpop.f32.mrb[42].mxu1  ;;  %1610 = vadd.xlane.f32.xlu0 %v1609_v32  ;;  %v8858_v38 = vpop.f32.mrb[42].mxu0  ;;  %v1606_v39 = vsel %vm645_vm3, %v1574_v31, 0.0  ;;  %9333 = vmatprep.subr.mxu1 %v10538_v27 }
 0x1cc   :  { %v1577_v42 = vmul.f32 %v8884_v37, %v8858_v38  ;;  %v1392_v47 = vpop.f32.mrb[43].mxu0  ;;  %v1537_v48 = vpop.f32.mrb[43].mxu1  ;;  %9212 = vmatmul.mubr.msk.f32.gmra.mrb[148].mxu0 %vm242_vm0, %v9801_v62  ;;  %9238 = vmatmul.mubr.msk.f32.gmra.mrb[148].mxu1 %vm242_vm0, %v9798_v61 }
 0x1cd   :  { %v1576_v51 = vmul.f32 %v1537_v48, %v1392_v47  ;;  %9214 = vmatprep.mubr.msk.f32.mxu0 %vm242_vm0, %v9813_v2  ;;  %9240 = vmatprep.mubr.msk.f32.mxu1 %vm242_vm0, %v9810_v1 }
 0x1ce   :  { %1607 = vadd.xlane.f32.xlu1 %v1606_v39  ;;  %v1615_v52 = vsel %vm645_vm3, %v1577_v42, 0.0 }
 0x1cf   :  { %v8887_v55 = vpop.f32.mrb[44].mxu1  ;;  %1616 = vadd.xlane.f32.xlu0 %v1615_v52  ;;  %v8861_v56 = vpop.f32.mrb[44].mxu0  ;;  %v1612_v59 = vsel %vm645_vm3, %v1576_v51, 0.0 }
 0x1d0   :  { %v1579_v60 = vmul.f32 %v8887_v55, %v8861_v56  ;;  %v1402_v63 = vpop.f32.mrb[45].mxu0  ;;  %v1547_v0 = vpop.f32.mrb[45].mxu1  ;;  %9215 = vmatmul.mubr.msk.f32.gmra.mrb[150].mxu0 %vm242_vm0, %v9825_v6  ;;  %9241 = vmatmul.mubr.msk.f32.gmra.mrb[150].mxu1 %vm242_vm0, %v9822_v5 }
 0x1d1   :  { %v1578_v3 = vmul.f32 %v1547_v0, %v1402_v63  ;;  %9217 = vmatprep.mubr.msk.f32.mxu0 %vm242_vm0, %v9837_v10  ;;  %9243 = vmatprep.mubr.msk.f32.mxu1 %vm242_vm0, %v9834_v9 }
 0x1d2   :  { %1613 = vadd.xlane.f32.xlu1 %v1612_v59  ;;  %v1621_v4 = vsel %vm645_vm3, %v1579_v60, 0.0 }
 0x1d3   :  { %v8890_v7 = vpop.f32.mrb[46].mxu1  ;;  %1622 = vadd.xlane.f32.xlu0 %v1621_v4  ;;  %v8864_v8 = vpop.f32.mrb[46].mxu0  ;;  %v1618_v23 = vsel %vm645_vm3, %v1578_v3, 0.0 }
 0x1d4   :  { %v1581_v12 = vmul.f32 %v8890_v7, %v8864_v8  ;;  %v1412_v16 = vpop.f32.mrb[47].mxu0  ;;  %v1557_v19 = vpop.f32.mrb[47].mxu1  ;;  %9218 = vmatmul.mubr.msk.f32.gmra.mrb[152].mxu0 %vm242_vm0, %v9849_v14  ;;  %9244 = vmatmul.mubr.msk.f32.gmra.mrb[152].mxu1 %vm242_vm0, %v9846_v13 }
 0x1d5   :  { %v1580_v20 = vmul.f32 %v1557_v19, %v1412_v16  ;;  %9220 = vmatprep.mubr.msk.f32.mxu0 %vm242_vm0, %v9861_v18  ;;  %9246 = vmatprep.mubr.msk.f32.mxu1 %vm242_vm0, %v9858_v17 }
 0x1d6   :  { %1619 = vadd.xlane.f32.xlu1 %v1618_v23  ;;  %v1627_v24 = vsel %vm645_vm3, %v1581_v12, 0.0 }
 0x1d7   :  { %v8921_v11 = vpop.f32.mrb[48].mxu1  ;;  %1628 = vadd.xlane.f32.xlu0 %v1627_v24  ;;  %v8895_v28 = vpop.f32.mrb[48].mxu0  ;;  %v1624_v15 = vsel %vm645_vm3, %v1580_v20, 0.0 }
 0x1d8   :  { %v2020_v31 = vmul.f32 %v8921_v11, %v8895_v28  ;;  %v1795_v32 = vpop.f32.mrb[49].mxu0  ;;  %v1940_v37 = vpop.f32.mrb[49].mxu1  ;;  %9221 = vmatmul.mubr.msk.f32.gmra.mrb[154].mxu0 %vm242_vm0, %v9873_v22  ;;  %9247 = vmatmul.mubr.msk.f32.gmra.mrb[154].mxu1 %vm242_vm0, %v9870_v21 }
 0x1d9   :  { %v2019_v38 = vmul.f32 %v1940_v37, %v1795_v32  ;;  %9223 = vmatprep.mubr.msk.f32.mxu0 %vm242_vm0, %v9885_v26  ;;  %9249 = vmatprep.mubr.msk.f32.mxu1 %vm242_vm0, %v9882_v25 }
 0x1da   :  { %1625 = vadd.xlane.f32.xlu1 %v1624_v15  ;;  %v2038_v39 = vsel %vm645_vm3, %v2020_v31, 0.0 }
 0x1db   :  { %v8924_v42 = vpop.f32.mrb[50].mxu1  ;;  %2039 = vadd.xlane.f32.xlu0 %v2038_v39  ;;  %v8898_v47 = vpop.f32.mrb[50].mxu0  ;;  %v2035_v48 = vsel %vm645_vm3, %v2019_v38, 0.0  ;;  %v10627_v38 = vld [vmem:[%s11842_s2 + $0x60] sm:$0xff] }
 0x1dc   :  { %v2022_v51 = vmul.f32 %v8924_v42, %v8898_v47  ;;  %v1805_v52 = vpop.f32.mrb[51].mxu0  ;;  %v1950_v55 = vpop.f32.mrb[51].mxu1  ;;  %9224 = vmatmul.mubr.msk.f32.gmra.mrb[156].mxu0 %vm242_vm0, %v9897_v30  ;;  %9250 = vmatmul.mubr.msk.f32.gmra.mrb[156].mxu1 %vm242_vm0, %v9894_v29 }
 0x1dd   :  { %v2021_v56 = vmul.f32 %v1950_v55, %v1805_v52  ;;  %9226 = vmatprep.mubr.msk.f32.mxu0 %vm242_vm0, %v9909_v34  ;;  %9252 = vmatprep.mubr.msk.f32.mxu1 %vm242_vm0, %v9906_v33 }
 0x1de   :  { %2036 = vadd.xlane.f32.xlu1 %v2035_v48  ;;  %v2044_v59 = vsel %vm645_vm3, %v2022_v51, 0.0 }
 0x1df   :  { %v8927_v60 = vpop.f32.mrb[52].mxu1  ;;  %2045 = vadd.xlane.f32.xlu0 %v2044_v59  ;;  %v8901_v63 = vpop.f32.mrb[52].mxu0  ;;  %v2041_v0 = vsel %vm645_vm3, %v2021_v56, 0.0 }
 0x1e0   :  { %v2024_v3 = vmul.f32 %v8927_v60, %v8901_v63  ;;  %v1815_v4 = vpop.f32.mrb[53].mxu0  ;;  %v1960_v7 = vpop.f32.mrb[53].mxu1  ;;  %9227 = vmatmul.mubr.msk.f32.gmra.mrb[158].mxu0 %vm242_vm0, %v9921_v44  ;;  %9253 = vmatmul.mubr.msk.f32.gmra.mrb[158].mxu1 %vm242_vm0, %v9918_v43 }
 0x1e1   :  { %v2023_v8 = vmul.f32 %v1960_v7, %v1815_v4  ;;  %9257 = vmatprep.mubr.msk.f32.mxu0 %vm242_vm0, %v9734_v41  ;;  %9283 = vmatprep.mubr.msk.f32.mxu1 %vm242_vm0, %v9751_v46 }
 0x1e2   :  { %2042 = vadd.xlane.f32.xlu1 %v2041_v0  ;;  %v2050_v23 = vsel %vm645_vm3, %v2024_v3, 0.0 }
 0x1e3   :  { %v8930_v12 = vpop.f32.mrb[54].mxu1  ;;  %2051 = vadd.xlane.f32.xlu0 %v2050_v23  ;;  %v8904_v16 = vpop.f32.mrb[54].mxu0  ;;  %v2047_v19 = vsel %vm645_vm3, %v2023_v8, 0.0 }
 0x1e4   :  { %v2026_v20 = vmul.f32 %v8930_v12, %v8904_v16  ;;  %v1825_v24 = vpop.f32.mrb[55].mxu0  ;;  %v1970_v11 = vpop.f32.mrb[55].mxu1  ;;  %9258 = vmatmul.mubr.msk.f32.vlgmr.msra.gmra.mrb[160].mxu0 %vm242_vm0, %v9731_v40  ;;  %9284 = vmatmul.mubr.msk.f32.vlgmr.msra.gmra.mrb[160].mxu1 %vm242_vm0, %v9748_v45 }
 0x1e5   :  { %v2025_v28 = vmul.f32 %v1970_v11, %v1825_v24  ;;  %9308 = vmatpush3.msra.mxu0 %v10538_v27  ;;  %9334 = vmatpush3.msra.mxu1 %v10538_v27 }
 0x1e6   :  { %2048 = vadd.xlane.f32.xlu1 %v2047_v19  ;;  %9260 = vmatprep.mubr.msk.f32.mxu0 %vm242_vm0, %v9764_v50  ;;  %v2056_v15 = vsel %vm645_vm3, %v2026_v20, 0.0 }
 0x1e7   :  { %9286 = vmatprep.mubr.msk.f32.mxu1 %vm242_vm0, %v9761_v49  ;;  %v8933_v31 = vpop.f32.mrb[56].mxu1  ;;  %2057 = vadd.xlane.f32.xlu0 %v2056_v15  ;;  %v8907_v32 = vpop.f32.mrb[56].mxu0  ;;  %v2053_v37 = vsel %vm645_vm3, %v2025_v28, 0.0 }
 0x1e8   :  { %v2028_v27 = vmul.f32 %v8933_v31, %v8907_v32  ;;  %v1835_v39 = vpop.f32.mrb[57].mxu0  ;;  %v1980_v42 = vpop.f32.mrb[57].mxu1  ;;  %9261 = vmatmul.mubr.msk.f32.gmra.mrb[162].mxu0 %vm242_vm0, %v9777_v54  ;;  %9287 = vmatmul.mubr.msk.f32.gmra.mrb[162].mxu1 %vm242_vm0, %v9774_v53 }
 0x1e9   :  { %v2027_v47 = vmul.f32 %v1980_v42, %v1835_v39  ;;  %9263 = vmatprep.mubr.msk.f32.mxu0 %vm242_vm0, %v9789_v58  ;;  %9289 = vmatprep.mubr.msk.f32.mxu1 %vm242_vm0, %v9786_v57 }
 0x1ea   :  { %2054 = vadd.xlane.f32.xlu1 %v2053_v37  ;;  %v2062_v48 = vsel %vm645_vm3, %v2028_v27, 0.0  ;;  %9359 = vmatprep.subr.mxu0 %v10627_v38 }
 0x1eb   :  { %v8936_v51 = vpop.f32.mrb[58].mxu1  ;;  %2063 = vadd.xlane.f32.xlu0 %v2062_v48  ;;  %v8910_v52 = vpop.f32.mrb[58].mxu0  ;;  %v2059_v55 = vsel %vm645_vm3, %v2027_v47, 0.0  ;;  %9385 = vmatprep.subr.mxu1 %v10627_v38 }
 0x1ec   :  { %v2030_v56 = vmul.f32 %v8936_v51, %v8910_v52  ;;  %v1845_v59 = vpop.f32.mrb[59].mxu0  ;;  %v1990_v60 = vpop.f32.mrb[59].mxu1  ;;  %9264 = vmatmul.mubr.msk.f32.gmra.mrb[164].mxu0 %vm242_vm0, %v9801_v62  ;;  %9290 = vmatmul.mubr.msk.f32.gmra.mrb[164].mxu1 %vm242_vm0, %v9798_v61 }
 0x1ed   :  { %v2029_v63 = vmul.f32 %v1990_v60, %v1845_v59  ;;  %9266 = vmatprep.mubr.msk.f32.mxu0 %vm242_vm0, %v9813_v2  ;;  %9292 = vmatprep.mubr.msk.f32.mxu1 %vm242_vm0, %v9810_v1 }
 0x1ee   :  { %2060 = vadd.xlane.f32.xlu1 %v2059_v55  ;;  %v2068_v0 = vsel %vm645_vm3, %v2030_v56, 0.0 }
 0x1ef   :  { %v8939_v3 = vpop.f32.mrb[60].mxu1  ;;  %2069 = vadd.xlane.f32.xlu0 %v2068_v0  ;;  %v2065_v4 = vsel %vm645_vm3, %v2029_v63, 0.0  ;;  %v8913_v7 = vpop.f32.mrb[60].mxu0 }
 0x1f0   :  { %v2000_v8 = vpop.f32.mrb[61].mxu1  ;;  %9267 = vmatmul.mubr.msk.f32.gmra.mrb[166].mxu0 %vm242_vm0, %v9825_v6  ;;  %9293 = vmatmul.mubr.msk.f32.gmra.mrb[166].mxu1 %vm242_vm0, %v9822_v5  ;;  %v2032_v23 = vmul.f32 %v8939_v3, %v8913_v7  ;;  %v1855_v12 = vpop.f32.mrb[61].mxu0 }
 0x1f1   :  { %9269 = vmatprep.mubr.msk.f32.mxu0 %vm242_vm0, %v9837_v10  ;;  %9295 = vmatprep.mubr.msk.f32.mxu1 %vm242_vm0, %v9834_v9  ;;  %v2031_v16 = vmul.f32 %v2000_v8, %v1855_v12  ;;  %v10677_v52 = vpop.xlane.xlu0 %647 }
 0x1f2   :  { %2066 = vadd.xlane.f32.xlu1 %v2065_v4  ;;  %v2074_v20 = vsel %vm645_vm3, %v2032_v23, 0.0 }
 0x1f3   :  { %v8942_v19 = vpop.f32.mrb[62].mxu1  ;;  %v8916_v24 = vpop.f32.mrb[62].mxu0  ;;  %2075 = vadd.xlane.f32.xlu0 %v2074_v20  ;;  %v2071_v15 = vsel %vm645_vm3, %v2031_v16, 0.0 }
 0x1f4   :  { %v2034_v11 = vmul.f32 %v8942_v19, %v8916_v24  ;;  %v2010_v28 = vpop.f32.mrb[63].mxu1  ;;  %9270 = vmatmul.mubr.msk.f32.gmra.mrb[168].mxu0 %vm242_vm0, %v9849_v14  ;;  %9296 = vmatmul.mubr.msk.f32.gmra.mrb[168].mxu1 %vm242_vm0, %v9846_v13  ;;  %v1865_v31 = vpop.f32.mrb[63].mxu0 }
 0x1f5   :  { %9272 = vmatprep.mubr.msk.f32.mxu0 %vm242_vm0, %v9861_v18  ;;  %v2033_v32 = vmul.f32 %v2010_v28, %v1865_v31  ;;  %9298 = vmatprep.mubr.msk.f32.mxu1 %vm242_vm0, %v9858_v17  ;;  %v10689_v7 = vpop.xlane.xlu0 %656 }
 0x1f6   :  { %2072 = vadd.xlane.f32.xlu1 %v2071_v15  ;;  %v2080_v37 = vsel %vm645_vm3, %v2034_v11, 0.0 }
 0x1f7   :  { %v8973_v27 = vpop.f32.mrb[64].mxu1  ;;  %v8947_v39 = vpop.f32.mrb[64].mxu0  ;;  %2081 = vadd.xlane.f32.xlu0 %v2080_v37  ;;  %v2077_v48 = vsel %vm645_vm3, %v2033_v32, 0.0 }
 0x1f8   :  { %v2473_v42 = vmul.f32 %v8973_v27, %v8947_v39  ;;  %v2393_v47 = vpop.f32.mrb[65].mxu1  ;;  %9273 = vmatmul.mubr.msk.f32.gmra.mrb[170].mxu0 %vm242_vm0, %v9873_v22  ;;  %9299 = vmatmul.mubr.msk.f32.gmra.mrb[170].mxu1 %vm242_vm0, %v9870_v21  ;;  %v2248_v51 = vpop.f32.mrb[65].mxu0  ;;  %v10706_v27 = vshrl.u32 %v15_v35, 7  ;;  %v714_v39 = vadd.s32 4294967288, %v9726_v36 }
 0x1f9   :  { %9275 = vmatprep.mubr.msk.f32.mxu0 %vm242_vm0, %v9885_v26  ;;  %v2472_v55 = vmul.f32 %v2393_v47, %v2248_v51  ;;  %9301 = vmatprep.mubr.msk.f32.mxu1 %vm242_vm0, %v9882_v25 }
 0x1fa   :  { %2078 = vadd.xlane.f32.xlu1 %v2077_v48  ;;  %v2491_v56 = vsel %vm645_vm3, %v2473_v42, 0.0  ;;  %v721_v48 = vadd.s32 4294967280, %v9726_v36 }
 0x1fb   :  { %v8976_v59 = vpop.f32.mrb[66].mxu1  ;;  %v8950_v60 = vpop.f32.mrb[66].mxu0  ;;  %2492 = vadd.xlane.f32.xlu0 %v2491_v56  ;;  %v2488_v3 = vsel %vm645_vm3, %v2472_v55, 0.0 }
 0x1fc   :  { %v2475_v63 = vmul.f32 %v8976_v59, %v8950_v60  ;;  %v2403_v0 = vpop.f32.mrb[67].mxu1  ;;  %9276 = vmatmul.mubr.msk.f32.gmra.mrb[172].mxu0 %vm242_vm0, %v9897_v30  ;;  %9302 = vmatmul.mubr.msk.f32.gmra.mrb[172].mxu1 %vm242_vm0, %v9894_v29  ;;  %v2258_v4 = vpop.f32.mrb[67].mxu0 }
 0x1fd   :  { %9278 = vmatprep.mubr.msk.f32.mxu0 %vm242_vm0, %v9909_v34  ;;  %v2474_v8 = vmul.f32 %v2403_v0, %v2258_v4  ;;  %9304 = vmatprep.mubr.msk.f32.mxu1 %vm242_vm0, %v9906_v33  ;;  %v10715_v55 = vpop.xlane.xlu0 %653  ;;  %v10728_v0 = vsub.s32 %v9726_v36, %v10706_v27 }
 0x1fe   :  { %2489 = vadd.xlane.f32.xlu1 %v2488_v3  ;;  %v2497_v23 = vsel %vm645_vm3, %v2475_v63, 0.0  ;;  %v10724_v63 = vsub.s32 %v714_v39, %v10706_v27  ;;  %v749_v39 = vadd.s32 4294967248, %v9726_v36 }
 0x1ff   :  { %v8979_v12 = vpop.f32.mrb[68].mxu1  ;;  %v8953_v16 = vpop.f32.mrb[68].mxu0  ;;  %2498 = vadd.xlane.f32.xlu0 %v2497_v23  ;;  %v2494_v11 = vsel %vm645_vm3, %v2474_v8, 0.0  ;;  %v10736_v23 = vld [vmem:[%s11842_s2 + $0x68] sm:$0xff] }
 0x200   :  { %v2477_v19 = vmul.f32 %v8979_v12, %v8953_v16  ;;  %v2268_v20 = vpop.f32.mrb[69].mxu0  ;;  %v2413_v24 = vpop.f32.mrb[69].mxu1  ;;  %9279 = vmatmul.mubr.msk.f32.gmra.mrb[174].mxu0 %vm242_vm0, %v9921_v44  ;;  %9305 = vmatmul.mubr.msk.f32.gmra.mrb[174].mxu1 %vm242_vm0, %v9918_v43  ;;  %v728_v16 = vadd.s32 4294967272, %v9726_v36 }
 0x201   :  { %v2476_v28 = vmul.f32 %v2413_v24, %v2268_v20  ;;  %9309 = vmatprep.mubr.msk.f32.mxu0 %vm242_vm0, %v9734_v41  ;;  %9335 = vmatprep.mubr.msk.f32.mxu1 %vm242_vm0, %v9751_v46  ;;  %v651_v12 = vpop.xlane.xlu1 %650  ;;  %v735_v20 = vadd.s32 4294967264, %v9726_v36 }
 0x202   :  { %2495 = vadd.xlane.f32.xlu1 %v2494_v11  ;;  %v2503_v15 = vsel %vm645_vm3, %v2477_v19, 0.0  ;;  %v10740_v19 = vsub.s32 %v721_v48, %v10706_v27  ;;  %v10760_v48 = vsub.s32 %v728_v16, %v10706_v27  ;;  %v10780_v16 = vsub.s32 %v749_v39, %v10706_v27 }
 0x203   :  { %v8982_v31 = vpop.f32.mrb[70].mxu1  ;;  %v8956_v32 = vpop.f32.mrb[70].mxu0  ;;  %v2500_v37 = vsel %vm645_vm3, %v2476_v28, 0.0  ;;  %2504 = vadd.xlane.f32.xlu0 %v2503_v15 }
 0x204   :  { %v2479_v42 = vmul.f32 %v8982_v31, %v8956_v32  ;;  %v2423_v47 = vpop.f32.mrb[71].mxu1  ;;  %9310 = vmatmul.mubr.msk.f32.vlgmr.msra.gmra.mrb[176].mxu0 %vm242_vm0, %v9731_v40  ;;  %9336 = vmatmul.mubr.msk.f32.vlgmr.msra.gmra.mrb[176].mxu1 %vm242_vm0, %v9748_v45  ;;  %v2278_v51 = vpop.f32.mrb[71].mxu0  ;;  %v718_v32 = vrot.slane %v651_v12, %v10724_v63  ;;  %11866 = vst [vmem:[#allocation9_spill] sm:$0xff] %v10780_v16 }
 0x205   :  { %9360 = vmatpush3.msra.mxu0 %v10627_v38  ;;  %9386 = vmatpush3.msra.mxu1 %v10627_v38  ;;  %v2478_v35 = vmul.f32 %v2423_v47, %v2278_v51  ;;  %v725_v51 = vrot.slane %v10715_v55, %v10740_v19 }
 0x206   :  { %2501 = vadd.xlane.f32.xlu1 %v2500_v37  ;;  %v2509_v56 = vsel %vm645_vm3, %v2479_v42, 0.0  ;;  %9312 = vmatprep.mubr.msk.f32.mxu0 %vm242_vm0, %v9764_v50  ;;  %v713_v37 = vrot.slane %v10677_v52, %v10728_v0 }
 0x207   :  { %9338 = vmatprep.mubr.msk.f32.mxu1 %vm242_vm0, %v9761_v49  ;;  %v8985_v59 = vpop.f32.mrb[72].mxu1  ;;  %v8959_v60 = vpop.f32.mrb[72].mxu0  ;;  %2510 = vadd.xlane.f32.xlu0 %v2509_v56  ;;  %v2506_v8 = vsel %vm645_vm3, %v2478_v35, 0.0  ;;  %v10765_v35 = vsub.s32 %v735_v20, %v10706_v27  ;;  %v742_v56 = vadd.s32 4294967256, %v9726_v36 }
 0x208   :  { %v2481_v38 = vmul.f32 %v8985_v59, %v8959_v60  ;;  %v2288_v3 = vpop.f32.mrb[73].mxu0  ;;  %v2433_v4 = vpop.f32.mrb[73].mxu1  ;;  %9313 = vmatmul.mubr.msk.f32.gmra.mrb[178].mxu0 %vm242_vm0, %v9777_v54  ;;  %9339 = vmatmul.mubr.msk.f32.gmra.mrb[178].mxu1 %vm242_vm0, %v9774_v53  ;;  %v720_v12 = vsel %vm719_vm4, %v718_v32, %v713_v37  ;;  %v732_v32 = vrot.slane %v10689_v7, %v10760_v48 }
 0x209   :  { %v2480_v24 = vmul.f32 %v2433_v4, %v2288_v3  ;;  %9315 = vmatprep.mubr.msk.f32.mxu0 %vm242_vm0, %v9789_v58  ;;  %9341 = vmatprep.mubr.msk.f32.mxu1 %vm242_vm0, %v9786_v57  ;;  %v10772_v59 = vpop.xlane.xlu0 %662  ;;  %v660_v60 = vpop.xlane.xlu1 %659  ;;  %v756_v3 = vadd.s32 4294967240, %v9726_v36  ;;  %v10795_v37 = vsub.s32 %v742_v56, %v10706_v27 }
 0x20a   :  { %2507 = vadd.xlane.f32.xlu1 %v2506_v8  ;;  %v2515_v11 = vsel %vm645_vm3, %v2481_v38, 0.0  ;;  %9411 = vmatprep.subr.mxu0 %v10736_v23 }
 0x20b   :  { %v8988_v28 = vpop.f32.mrb[74].mxu1  ;;  %v8962_v15 = vpop.f32.mrb[74].mxu0  ;;  %v2512_v31 = vsel %vm645_vm3, %v2480_v24, 0.0  ;;  %9437 = vmatprep.subr.mxu1 %v10736_v23  ;;  %2516 = vadd.xlane.f32.xlu0 %v2515_v11  ;;  %11867 = vst [vmem:[#allocation10_spill] sm:$0xff] %v10795_v37  ;;  %v10803_v7 = vsub.s32 %v756_v3, %v10706_v27 }
 0x20c   :  { %v2483_v42 = vmul.f32 %v8988_v28, %v8962_v15  ;;  %v2443_v47 = vpop.f32.mrb[75].mxu1  ;;  %9316 = vmatmul.mubr.msk.f32.gmra.mrb[180].mxu0 %vm242_vm0, %v9801_v62  ;;  %9342 = vmatmul.mubr.msk.f32.gmra.mrb[180].mxu1 %vm242_vm0, %v9798_v61  ;;  %v2298_v52 = vpop.f32.mrb[75].mxu0  ;;  %v727_v15 = vsel %vm726_vm5, %v725_v51, %v720_v12  ;;  %v777_v12 = vadd.s32 4294967216, %v9726_v36 }
 0x20d   :  { %9318 = vmatprep.mubr.msk.f32.mxu0 %vm242_vm0, %v9813_v2  ;;  %v2482_v38 = vmul.f32 %v2443_v47, %v2298_v52  ;;  %9344 = vmatprep.mubr.msk.f32.mxu1 %vm242_vm0, %v9810_v1  ;;  %v669_v39 = vpop.xlane.xlu0 %668  ;;  %v666_v51 = vpop.xlane.xlu1 %665 }
 0x20e   :  { %2513 = vadd.xlane.f32.xlu1 %v2512_v31  ;;  %v2521_v55 = vsel %vm645_vm3, %v2483_v42, 0.0  ;;  %v739_v31 = vrot.slane %v660_v60, %v10765_v35  ;;  %v763_v42 = vadd.s32 4294967232, %v9726_v36 }
 0x20f   :  { %v8991_v4 = vpop.f32.mrb[76].mxu1  ;;  %v8965_v8 = vpop.f32.mrb[76].mxu0  ;;  %2522 = vadd.xlane.f32.xlu0 %v2521_v55  ;;  %v2518_v28 = vsel %vm645_vm3, %v2482_v38, 0.0 }
 0x210   :  { %v2485_v20 = vmul.f32 %v8991_v4, %v8965_v8  ;;  %v2308_v24 = vpop.f32.mrb[77].mxu0  ;;  %v2453_v11 = vpop.f32.mrb[77].mxu1  ;;  %9319 = vmatmul.mubr.msk.f32.gmra.mrb[182].mxu0 %vm242_vm0, %v9825_v6  ;;  %9345 = vmatmul.mubr.msk.f32.gmra.mrb[182].mxu1 %vm242_vm0, %v9822_v5  ;;  %v734_v4 = vsel %vm733_vm6, %v732_v32, %v727_v15  ;;  %v770_v15 = vadd.s32 4294967224, %v9726_v36 }
 0x211   :  { %v2484_v47 = vmul.f32 %v2453_v11, %v2308_v24  ;;  %9321 = vmatprep.mubr.msk.f32.mxu0 %vm242_vm0, %v9837_v10  ;;  %9347 = vmatprep.mubr.msk.f32.mxu1 %vm242_vm0, %v9834_v9  ;;  %v753_v24 = vrot.slane %v666_v51, %v10780_v16  ;;  %v10811_v11 = vsub.s32 %v763_v42, %v10706_v27  ;;  %v784_v51 = vadd.s32 4294967208, %v9726_v36 }
 0x212   :  { %2519 = vadd.xlane.f32.xlu1 %v2518_v28  ;;  %v2527_v52 = vsel %vm645_vm3, %v2485_v20, 0.0  ;;  %v741_v20 = vsel %vm740_vm7, %v739_v31, %v734_v4  ;;  %v746_v28 = vrot.slane %v10772_v59, %v10795_v37  ;;  %v672_v31 = vpop.xlane.xlu1 %671  ;;  %v10826_v59 = vsub.s32 %v777_v12, %v10706_v27 }
 0x213   :  { %v8994_v60 = vpop.f32.mrb[78].mxu1  ;;  %v8968_v38 = vpop.f32.mrb[78].mxu0  ;;  %v2524_v55 = vsel %vm645_vm3, %v2484_v47, 0.0  ;;  %2528 = vadd.xlane.f32.xlu0 %v2527_v52  ;;  %v791_v12 = vadd.s32 4294967200, %v9726_v36 }
 0x214   :  { %v2487_v56 = vmul.f32 %v8994_v60, %v8968_v38  ;;  %v2463_v8 = vpop.f32.mrb[79].mxu1  ;;  %9322 = vmatmul.mubr.msk.f32.gmra.mrb[184].mxu0 %vm242_vm0, %v9849_v14  ;;  %9348 = vmatmul.mubr.msk.f32.gmra.mrb[184].mxu1 %vm242_vm0, %v9846_v13  ;;  %v2318_v3 = vpop.f32.mrb[79].mxu0  ;;  %v748_v38 = vsel %vm747_vm8, %v746_v28, %v741_v20  ;;  %11868 = vst [vmem:[#allocation11_spill] sm:$0xff] %v10826_v59 }
 0x215   :  { %9324 = vmatprep.mubr.msk.f32.mxu0 %vm242_vm0, %v9861_v18  ;;  %v675_v47 = vpop.xlane.xlu0 %674  ;;  %v2486_v32 = vmul.f32 %v2463_v8, %v2318_v3  ;;  %9350 = vmatprep.mubr.msk.f32.mxu1 %vm242_vm0, %v9858_v17  ;;  %v767_v3 = vrot.slane %v672_v31, %v10811_v11  ;;  %v760_v20 = vrot.slane %v669_v39, %v10803_v7 }
 0x216   :  { %2525 = vadd.xlane.f32.xlu1 %v2524_v55  ;;  %v2533_v42 = vsel %vm645_vm3, %v2487_v56, 0.0  ;;  %v755_v56 = vsel %vm754_vm9, %v753_v24, %v748_v38  ;;  %v10840_v28 = vsub.s32 %v770_v15, %v10706_v27  ;;  %v10848_v39 = vsub.s32 %v784_v51, %v10706_v27 }
 0x217   :  { %v9025_v52 = vpop.f32.mrb[80].mxu1  ;;  %v8999_v60 = vpop.f32.mrb[80].mxu0  ;;  %2534 = vadd.xlane.f32.xlu0 %v2533_v42  ;;  %v2530_v55 = vsel %vm645_vm3, %v2486_v32, 0.0  ;;  %v10859_v51 = vsub.s32 %v791_v12, %v10706_v27 }
 0x218   :  { %v2926_v4 = vmul.f32 %v9025_v52, %v8999_v60  ;;  %v2701_v16 = vpop.f32.mrb[81].mxu0  ;;  %v2846_v8 = vpop.f32.mrb[81].mxu1  ;;  %9325 = vmatmul.mubr.msk.f32.gmra.mrb[186].mxu0 %vm242_vm0, %v9873_v22  ;;  %9351 = vmatmul.mubr.msk.f32.gmra.mrb[186].mxu1 %vm242_vm0, %v9870_v21  ;;  %11869 = vst [vmem:[#allocation12_spill] sm:$0xff] %v10840_v28  ;;  %v762_v60 = vsel %vm761_vm10, %v760_v20, %v755_v56  ;;  %v798_v56 = vadd.s32 4294967192, %v9726_v36 }
 0x219   :  { %v2925_v37 = vmul.f32 %v2846_v8, %v2701_v16  ;;  %9327 = vmatprep.mubr.msk.f32.mxu0 %vm242_vm0, %v9885_v26  ;;  %v681_v32 = vpop.xlane.xlu0 %680  ;;  %v678_v42 = vpop.xlane.xlu1 %677  ;;  %9353 = vmatprep.mubr.msk.f32.mxu1 %vm242_vm0, %v9882_v25  ;;  %v769_v8 = vsel %vm768_vm11, %v767_v3, %v762_v60  ;;  %v805_v60 = vadd.s32 4294967184, %v9726_v36 }
 0x21a   :  { %2531 = vadd.xlane.f32.xlu1 %v2530_v55  ;;  %v2944_v16 = vsel %vm645_vm3, %v2926_v4, 0.0  ;;  %v781_v4 = vrot.slane %v678_v42, %v10826_v59  ;;  %v774_v55 = vrot.slane %v675_v47, %v10840_v28 }
 0x21b   :  { %v9028_v24 = vpop.f32.mrb[82].mxu1  ;;  %v9002_v31 = vpop.f32.mrb[82].mxu0  ;;  %v2941_v52 = vsel %vm645_vm3, %v2925_v37, 0.0  ;;  %2945 = vadd.xlane.f32.xlu0 %v2944_v16 }
 0x21c   :  { %v2928_v15 = vmul.f32 %v9028_v24, %v9002_v31  ;;  %v2856_v38 = vpop.f32.mrb[83].mxu1  ;;  %9328 = vmatmul.mubr.msk.f32.gmra.mrb[188].mxu0 %vm242_vm0, %v9897_v30  ;;  %9354 = vmatmul.mubr.msk.f32.gmra.mrb[188].mxu1 %vm242_vm0, %v9894_v29  ;;  %v2711_v37 = vpop.f32.mrb[83].mxu0  ;;  %v776_v12 = vsel %vm775_vm12, %v774_v55, %v769_v8  ;;  %v788_v8 = vrot.slane %v681_v32, %v10848_v39 }
 0x21d   :  { %9330 = vmatprep.mubr.msk.f32.mxu0 %vm242_vm0, %v9909_v34  ;;  %v687_v20 = vpop.xlane.xlu0 %686  ;;  %v2927_v16 = vmul.f32 %v2856_v38, %v2711_v37  ;;  %9356 = vmatprep.mubr.msk.f32.mxu1 %vm242_vm0, %v9906_v33  ;;  %v812_v38 = vadd.s32 4294967176, %v9726_v36  ;;  %v783_v37 = vsel %vm11859_vm13, %v781_v4, %v776_v12  ;;  %v10880_v55 = vsub.s32 %v798_v56, %v10706_v27 }
 0x21e   :  { %2942 = vadd.xlane.f32.xlu1 %v2941_v52  ;;  %v684_v3 = vpop.xlane.xlu1 %683  ;;  %v2950_v42 = vsel %vm645_vm3, %v2928_v15, 0.0 }
 0x21f   :  { %v9031_v24 = vpop.f32.mrb[84].mxu1  ;;  %v9005_v31 = vpop.f32.mrb[84].mxu0  ;;  %2951 = vadd.xlane.f32.xlu0 %v2950_v42  ;;  %v2947_v52 = vsel %vm645_vm3, %v2927_v16, 0.0  ;;  %v795_v15 = vrot.slane %v684_v3, %v10859_v51  ;;  %v10887_v3 = vsub.s32 %v805_v60, %v10706_v27  ;;  %v790_v42 = vsel %vm789_vm14, %v788_v8, %v783_v37 }
 0x220   :  { %v2930_v59 = vmul.f32 %v9031_v24, %v9005_v31  ;;  %v2721_v47 = vpop.f32.mrb[85].mxu0  ;;  %v2866_v28 = vpop.f32.mrb[85].mxu1  ;;  %9331 = vmatmul.mubr.msk.f32.gmra.mrb[190].mxu0 %vm242_vm0, %v9921_v44  ;;  %9357 = vmatmul.mubr.msk.f32.gmra.mrb[190].mxu1 %vm242_vm0, %v9918_v43  ;;  %v10893_v24 = vsub.s32 %v812_v38, %v10706_v27  ;;  %v802_v60 = vrot.slane %v687_v20, %v10880_v55 }
 0x221   :  { %v2929_v33 = vmul.f32 %v2866_v28, %v2721_v47  ;;  %9361 = vmatprep.mubr.msk.f32.mxu0 %vm242_vm0, %v9734_v41  ;;  %9387 = vmatprep.mubr.msk.f32.mxu1 %vm242_vm0, %v9751_v46 }
 0x222   :  { %2948 = vadd.xlane.f32.xlu1 %v2947_v52  ;;  %v2956_v36 = vsel %vm645_vm3, %v2930_v59, 0.0  ;;  %v797_v59 = vsel %vm11854_vm15, %v795_v15, %v790_v42  ;;  %vm817_vm15 = vcmask 1048512  }
 0x223   :  { %v9034_v4 = vpop.f32.mrb[86].mxu1  ;;  %v9008_v28 = vpop.f32.mrb[86].mxu0  ;;  %v2953_v16 = vsel %vm645_vm3, %v2929_v33, 0.0  ;;  %2957 = vadd.xlane.f32.xlu0 %v2956_v36 }
 0x224   :  { %v2932_v32 = vmul.f32 %v9034_v4, %v9008_v28  ;;  %v2876_v56 = vpop.f32.mrb[87].mxu1  ;;  %9362 = vmatmul.mubr.msk.f32.vlgmr.msra.gmra.mrb[192].mxu0 %vm242_vm0, %v9731_v40  ;;  %v693_v31 = vpop.xlane.xlu0 %692  ;;  %9388 = vmatmul.mubr.msk.f32.vlgmr.msra.gmra.mrb[192].mxu1 %vm242_vm0, %v9748_v45  ;;  %v10915_v28 = vld [vmem:[%s11842_s2 + $0x70] sm:$0xff] }
 0x225   :  { %9412 = vmatpush3.msra.mxu0 %v10736_v23  ;;  %v2731_v33 = vpop.f32.mrb[87].mxu0  ;;  %9438 = vmatpush3.msra.mxu1 %v10736_v23  ;;  %v816_v20 = vrot.slane %v693_v31, %v10893_v24  ;;  %v804_v23 = vsel %vm803_vm1, %v802_v60, %v797_v59 }
 0x226   :  { %v2931_v12 = vmul.f32 %v2876_v56, %v2731_v33  ;;  %2954 = vadd.xlane.f32.xlu1 %v2953_v16  ;;  %v690_v47 = vpop.xlane.xlu1 %689  ;;  %v2962_v27 = vsel %vm645_vm3, %v2932_v32, 0.0  ;;  %9364 = vmatprep.mubr.msk.f32.mxu0 %vm242_vm0, %v9764_v50 }
 0x227   :  { %9390 = vmatprep.mubr.msk.f32.mxu1 %vm242_vm0, %v9761_v49  ;;  %v809_v52 = vrot.slane %v690_v47, %v10887_v3  ;;  %v9037_v38 = vpop.f32.mrb[88].mxu1  ;;  %v9011_v37 = vpop.f32.mrb[88].mxu0  ;;  %2963 = vadd.xlane.f32.xlu0 %v2962_v27 }
 0x228   :  { %v2934_v15 = vmul.f32 %v9037_v38, %v9011_v37  ;;  %v2886_v8 = vpop.f32.mrb[89].mxu1  ;;  %9365 = vmatmul.mubr.msk.f32.gmra.mrb[194].mxu0 %vm242_vm0, %v9777_v54  ;;  %v1134_v36 = vpop.xlane.xlu0 %1133  ;;  %v2959_v4 = vsel %vm645_vm3, %v2931_v12, 0.0  ;;  %9391 = vmatmul.mubr.msk.f32.gmra.mrb[194].mxu1 %vm242_vm0, %v9774_v53 }
 0x229   :  { %v811_v16 = vsel %vm810_vm2, %v809_v52, %v804_v23  ;;  %v2741_v42 = vpop.f32.mrb[89].mxu0  ;;  %9367 = vmatprep.mubr.msk.f32.mxu0 %vm242_vm0, %v9789_v58  ;;  %9393 = vmatprep.mubr.msk.f32.mxu1 %vm242_vm0, %v9786_v57  ;;  %v1200_v38 = vrot.slane %v1134_v36, %v10724_v63 }
 0x22a   :  { %v818_v32 = vsel %vm817_vm15, %v816_v20, %v811_v16  ;;  %v2933_v56 = vmul.f32 %v2886_v8, %v2741_v42  ;;  %2960 = vadd.xlane.f32.xlu1 %v2959_v4  ;;  %v1131_v31 = vpop.xlane.xlu1 %1130  ;;  %v2968_v59 = vsel %vm645_vm3, %v2934_v15, 0.0  ;;  %9463 = vmatprep.subr.mxu0 %v10915_v28 }
 0x22b   :  { %820 = vst [vmem:[#allocation2] sm:$0x1] %v818_v32  ;;  %v9040_v33 = vpop.f32.mrb[90].mxu1  ;;  %v9014_v60 = vpop.f32.mrb[90].mxu0  ;;  %9489 = vmatprep.subr.mxu1 %v10915_v28  ;;  %2969 = vadd.xlane.f32.xlu0 %v2968_v59  ;;  %v1196_v37 = vrot.slane %v1131_v31, %v10728_v0 }
 0x22c   :  { %v2936_v12 = vmul.f32 %v9040_v33, %v9014_v60  ;;  %v2896_v47 = vpop.f32.mrb[91].mxu1  ;;  %9368 = vmatmul.mubr.msk.f32.gmra.mrb[196].mxu0 %vm242_vm0, %v9801_v62  ;;  %v1140_v27 = vpop.xlane.xlu0 %1139  ;;  %v2965_v52 = vsel %vm645_vm3, %v2933_v56, 0.0  ;;  %9394 = vmatmul.mubr.msk.f32.gmra.mrb[196].mxu1 %vm242_vm0, %v9798_v61 }
 0x22d   :  { %v2751_v20 = vpop.f32.mrb[91].mxu0  ;;  %9370 = vmatprep.mubr.msk.f32.mxu0 %vm242_vm0, %v9813_v2  ;;  %9396 = vmatprep.mubr.msk.f32.mxu1 %vm242_vm0, %v9810_v1  ;;  %v1201_v59 = vsel %vm719_vm4, %v1200_v38, %v1196_v37 }
 0x22e   :  { %v2935_v23 = vmul.f32 %v2896_v47, %v2751_v20  ;;  %2966 = vadd.xlane.f32.xlu1 %v2965_v52  ;;  %v1137_v15 = vpop.xlane.xlu1 %1136  ;;  %v2974_v8 = vsel %vm645_vm3, %v2936_v12, 0.0  ;;  %v1210_v52 = vrot.slane %v1140_v27, %v10760_v48 }
 0x22f   :  { %v1205_v4 = vrot.slane %v1137_v15, %v10740_v19  ;;  %v9043_v36 = vpop.f32.mrb[92].mxu1  ;;  %v9017_v16 = vpop.f32.mrb[92].mxu0  ;;  %2975 = vadd.xlane.f32.xlu0 %v2974_v8 }
 0x230   :  { %v2938_v42 = vmul.f32 %v9043_v36, %v9017_v16  ;;  %v2906_v32 = vpop.f32.mrb[93].mxu1  ;;  %9371 = vmatmul.mubr.msk.f32.gmra.mrb[198].mxu0 %vm242_vm0, %v9825_v6  ;;  %v1146_v56 = vpop.xlane.xlu0 %1145  ;;  %v2971_v31 = vsel %vm645_vm3, %v2935_v23, 0.0  ;;  %9397 = vmatmul.mubr.msk.f32.gmra.mrb[198].mxu1 %vm242_vm0, %v9822_v5 }
 0x231   :  { %v2761_v33 = vpop.f32.mrb[93].mxu0  ;;  %9373 = vmatprep.mubr.msk.f32.mxu0 %vm242_vm0, %v9837_v10  ;;  %v1206_v60 = vsel %vm726_vm5, %v1205_v4, %v1201_v59  ;;  %9399 = vmatprep.mubr.msk.f32.mxu1 %vm242_vm0, %v9834_v9 }
 0x232   :  { %v2937_v12 = vmul.f32 %v2906_v32, %v2761_v33  ;;  %2972 = vadd.xlane.f32.xlu1 %v2971_v31  ;;  %v2980_v47 = vsel %vm645_vm3, %v2938_v42, 0.0  ;;  %v1211_v4 = vsel %vm733_vm6, %v1210_v52, %v1206_v60  ;;  %v11870_v31 = vld [vmem:[#allocation10_spill] sm:$0xff] }
 0x233   :  { %v1143_v20 = vpop.xlane.xlu1 %1142  ;;  %v9046_v38 = vpop.f32.mrb[94].mxu1  ;;  %2981 = vadd.xlane.f32.xlu0 %v2980_v47  ;;  %v1220_v59 = vrot.slane %v1146_v56, %v11870_v31  ;;  %v11871_v47 = vld [vmem:[#allocation9_spill] sm:$0xff] }
 0x234   :  { %v1215_v37 = vrot.slane %v1143_v20, %v10765_v35  ;;  %v9020_v23 = vpop.f32.mrb[94].mxu0  ;;  %v2916_v15 = vpop.f32.mrb[95].mxu1  ;;  %9374 = vmatmul.mubr.msk.f32.gmra.mrb[200].mxu0 %vm242_vm0, %v9849_v14  ;;  %v2977_v8 = vsel %vm645_vm3, %v2937_v12, 0.0  ;;  %9400 = vmatmul.mubr.msk.f32.gmra.mrb[200].mxu1 %vm242_vm0, %v9846_v13 }
 0x235   :  { %v2940_v36 = vmul.f32 %v9046_v38, %v9020_v23  ;;  %v1152_v16 = vpop.xlane.xlu0 %1151  ;;  %v2771_v27 = vpop.f32.mrb[95].mxu0  ;;  %9376 = vmatprep.mubr.msk.f32.mxu0 %vm242_vm0, %v9861_v18  ;;  %9402 = vmatprep.mubr.msk.f32.mxu1 %vm242_vm0, %v9858_v17 }
 0x236   :  { %v1216_v42 = vsel %vm740_vm7, %v1215_v37, %v1211_v4  ;;  %v2939_v32 = vmul.f32 %v2916_v15, %v2771_v27  ;;  %2978 = vadd.xlane.f32.xlu1 %v2977_v8  ;;  %v1230_v27 = vrot.slane %v1152_v16, %v10803_v7 }
 0x237   :  { %v1149_v33 = vpop.xlane.xlu1 %1148  ;;  %v9077_v60 = vpop.f32.mrb[96].mxu1  ;;  %v2986_v12 = vsel %vm645_vm3, %v2940_v36, 0.0  ;;  %v1221_v23 = vsel %vm747_vm8, %v1220_v59, %v1216_v42 }
 0x238   :  { %v1225_v52 = vrot.slane %v1149_v33, %v11871_v47  ;;  %2987 = vadd.xlane.f32.xlu0 %v2986_v12  ;;  %v9051_v20 = vpop.f32.mrb[96].mxu0  ;;  %v3299_v38 = vpop.f32.mrb[97].mxu1  ;;  %9377 = vmatmul.mubr.msk.f32.gmra.mrb[202].mxu0 %vm242_vm0, %v9873_v22  ;;  %v2983_v37 = vsel %vm645_vm3, %v2939_v32, 0.0 }
 0x239   :  { %v3379_v15 = vmul.f32 %v9077_v60, %v9051_v20  ;;  %9403 = vmatmul.mubr.msk.f32.gmra.mrb[202].mxu1 %vm242_vm0, %v9870_v21  ;;  %v1158_v56 = vpop.xlane.xlu0 %1157  ;;  %v3154_v8 = vpop.f32.mrb[97].mxu0  ;;  %9379 = vmatprep.mubr.msk.f32.mxu0 %vm242_vm0, %v9885_v26 }
 0x23a   :  { %v1226_v4 = vsel %vm754_vm9, %v1225_v52, %v1221_v23  ;;  %v3378_v36 = vmul.f32 %v3299_v38, %v3154_v8  ;;  %2984 = vadd.xlane.f32.xlu1 %v2983_v37  ;;  %9405 = vmatprep.mubr.msk.f32.mxu1 %vm242_vm0, %v9882_v25  ;;  %v11872_v8 = vld [vmem:[#allocation8_spill] sm:$0xff] }
 0x23b   :  { %v1155_v32 = vpop.xlane.xlu1 %1154  ;;  %v9080_v42 = vpop.f32.mrb[98].mxu1  ;;  %v3397_v59 = vsel %vm645_vm3, %v3379_v15, 0.0  ;;  %v1231_v20 = vsel %vm761_vm10, %v1230_v27, %v1226_v4 }
 0x23c   :  { %v1235_v33 = vrot.slane %v1155_v32, %v10811_v11  ;;  %3398 = vadd.xlane.f32.xlu0 %v3397_v59  ;;  %v9054_v60 = vpop.f32.mrb[98].mxu0  ;;  %v3309_v12 = vpop.f32.mrb[99].mxu1  ;;  %9380 = vmatmul.mubr.msk.f32.gmra.mrb[204].mxu0 %vm242_vm0, %v9897_v30  ;;  %v3394_v52 = vsel %vm645_vm3, %v3378_v36, 0.0  ;;  %v11873_v32 = vld [vmem:[#allocation12_spill] sm:$0xff] }
 0x23d   :  { %v3381_v38 = vmul.f32 %v9080_v42, %v9054_v60  ;;  %9406 = vmatmul.mubr.msk.f32.gmra.mrb[204].mxu1 %vm242_vm0, %v9894_v29  ;;  %v1164_v16 = vpop.xlane.xlu0 %1163  ;;  %v3164_v37 = vpop.f32.mrb[99].mxu0  ;;  %9382 = vmatprep.mubr.msk.f32.mxu0 %vm242_vm0, %v9909_v34  ;;  %v1240_v36 = vrot.slane %v1158_v56, %v11873_v32  ;;  %v11874_v42 = vld [vmem:[#allocation11_spill] sm:$0xff] }
 0x23e   :  { %v1236_v23 = vsel %vm768_vm11, %v1235_v33, %v1231_v20  ;;  %v3380_v15 = vmul.f32 %v3309_v12, %v3164_v37  ;;  %3395 = vadd.xlane.f32.xlu1 %v3394_v52  ;;  %9408 = vmatprep.mubr.msk.f32.mxu1 %vm242_vm0, %v11872_v8 }
 0x23f   :  { %v1161_v59 = vpop.xlane.xlu1 %1160  ;;  %v9083_v4 = vpop.f32.mrb[100].mxu1  ;;  %v3403_v27 = vsel %vm645_vm3, %v3381_v38, 0.0  ;;  %v1241_v12 = vsel %vm775_vm12, %v1240_v36, %v1236_v23 }
 0x240   :  { %v1245_v60 = vrot.slane %v1161_v59, %v11874_v42  ;;  %3404 = vadd.xlane.f32.xlu0 %v3403_v27  ;;  %v9057_v29 = vpop.f32.mrb[100].mxu0  ;;  %v3319_v30 = vpop.f32.mrb[101].mxu1  ;;  %9383 = vmatmul.mubr.msk.f32.gmra.mrb[206].mxu0 %vm242_vm0, %v9921_v44  ;;  %v3400_v33 = vsel %vm645_vm3, %v3380_v15, 0.0  ;;  %v1250_v15 = vrot.slane %v1164_v16, %v10848_v39 }
 0x241   :  { %v3383_v52 = vmul.f32 %v9083_v4, %v9057_v29  ;;  %9409 = vmatmul.mubr.msk.f32.gmra.mrb[206].mxu1 %vm242_vm0, %v9918_v43  ;;  %v1170_v56 = vpop.xlane.xlu0 %1169  ;;  %v3174_v20 = vpop.f32.mrb[101].mxu0  ;;  %9413 = vmatprep.mubr.msk.f32.mxu0 %vm242_vm0, %v9734_v41 }
 0x242   :  { %v1246_v38 = vsel %vm11859_vm13, %v1245_v60, %v1241_v12  ;;  %v3382_v37 = vmul.f32 %v3319_v30, %v3174_v20  ;;  %3401 = vadd.xlane.f32.xlu1 %v3400_v33  ;;  %9439 = vmatprep.mubr.msk.f32.mxu1 %vm242_vm0, %v9751_v46  ;;  %vm11875_vm13 = vcmask 851712  }
 0x243   :  { %v1167_v59 = vpop.xlane.xlu1 %1166  ;;  %v9086_v23 = vpop.f32.mrb[102].mxu1  ;;  %v3409_v29 = vsel %vm645_vm3, %v3383_v52, 0.0  ;;  %v1251_v60 = vsel %vm789_vm14, %v1250_v15, %v1246_v38 }
 0x244   :  { %v1255_v36 = vrot.slane %v1167_v59, %v10859_v51  ;;  %3410 = vadd.xlane.f32.xlu0 %v3409_v29  ;;  %v9060_v4 = vpop.f32.mrb[102].mxu0  ;;  %v3329_v27 = vpop.f32.mrb[103].mxu1  ;;  %9414 = vmatmul.mubr.msk.f32.vlgmr.msra.gmra.mrb[208].mxu0 %vm242_vm0, %v9731_v40  ;;  %v3406_v30 = vsel %vm645_vm3, %v3382_v37, 0.0  ;;  %v1260_v59 = vrot.slane %v1170_v56, %v10880_v55  ;;  %v11033_v56 = vld [vmem:[%s11842_s2 + $0x78] sm:$0xff]  ;;  %s9600_s2 = smov [#allocation2]  }
 0x245   :  { %v3385_v33 = vmul.f32 %v9086_v23, %v9060_v4  ;;  %9440 = vmatmul.mubr.msk.f32.vlgmr.msra.gmra.mrb[208].mxu1 %vm242_vm0, %v9748_v45  ;;  %9464 = vmatpush3.msra.mxu0 %v10915_v28  ;;  %v1176_v16 = vpop.xlane.xlu0 %1175  ;;  %v3184_v12 = vpop.f32.mrb[103].mxu0  ;;  %s7621_s25 = sshll.u32 %s9600_s2, 4  ;;  %s7622_s25 = int_to_ptr.vmem [resolvable:$true] %s7621_s25 }
 0x246   :  { %v1256_v52 = vsel %vm11875_vm13, %v1255_v36, %v1251_v60  ;;  %9490 = vmatpush3.msra.mxu1 %v10915_v28  ;;  %v3384_v20 = vmul.f32 %v3329_v27, %v3184_v12  ;;  %3407 = vadd.xlane.f32.xlu1 %v3406_v30  ;;  %v1270_v4 = vrot.slane %v1176_v16, %v10893_v24  ;;  %vm11878_vm13 = vcmask 720512   ;;  %s9574_s0 = scalar_lea.vmem %s7622_s25, 256  ;;  %p9579_p1 = scmp.lt.s32.totalorder %s7622_s25, %s7622_s25 }
 0x247   :  { %9416 = vmatprep.mubr.msk.f32.mxu0 %vm242_vm0, %v9764_v50  ;;  %9442 = vmatprep.mubr.msk.f32.mxu1 %vm242_vm0, %v9761_v49  ;;  %v1173_v38 = vpop.xlane.xlu1 %1172  ;;  %v9089_v37 = vpop.f32.mrb[104].mxu1  ;;  %v3415_v15 = vsel %vm645_vm3, %v3385_v33, 0.0  ;;  %v1261_v27 = vsel %vm803_vm1, %v1260_v59, %v1256_v52  ;;  %p9575_p0 = scmp.ne.s32.totalorder %s7622_s25, %s9574_s0  ;;  %p9580_p2 = scmp.lt.s32.totalorder %s9574_s0, %s9574_s0 }
 0x248   :  { %v1265_v23 = vrot.slane %v1173_v38, %v10887_v3  ;;  %3416 = vadd.xlane.f32.xlu0 %v3415_v15  ;;  %v9063_v29 = vpop.f32.mrb[104].mxu0  ;;  %v3339_v36 = vpop.f32.mrb[105].mxu1  ;;  %9417 = vmatmul.mubr.msk.f32.gmra.mrb[210].mxu0 %vm242_vm0, %v9777_v54  ;;  %v3412_v28 = vsel %vm645_vm3, %v3384_v20, 0.0 }
 0x249   :  { %v3387_v30 = vmul.f32 %v9089_v37, %v9063_v29  ;;  %9443 = vmatmul.mubr.msk.f32.gmra.mrb[210].mxu1 %vm242_vm0, %v9774_v53  ;;  %v1587_v60 = vpop.xlane.xlu0 %1586  ;;  %v3194_v33 = vpop.f32.mrb[105].mxu0  ;;  %9419 = vmatprep.mubr.msk.f32.mxu0 %vm242_vm0, %v9789_v58  ;;  %p9581_p3 = por %p9580_p2, %p9579_p1 }
 0x24a   :  { %v1266_v12 = vsel %vm810_vm2, %v1265_v23, %v1261_v27  ;;  %v3386_v20 = vmul.f32 %v3339_v36, %v3194_v33  ;;  %3413 = vadd.xlane.f32.xlu1 %v3412_v28  ;;  %9445 = vmatprep.mubr.msk.f32.mxu1 %vm242_vm0, %v9786_v57  ;;  %v1653_v29 = vrot.slane %v1587_v60, %v10724_v63 }
 0x24b   :  { %v1271_v16 = vsel %vm817_vm15, %v1270_v4, %v1266_v12  ;;  %v1584_v38 = vpop.xlane.xlu1 %1583  ;;  %v9092_v52 = vpop.f32.mrb[106].mxu1  ;;  %v3421_v59 = vsel %vm645_vm3, %v3387_v30, 0.0  ;;  %9515 = vmatprep.subr.mxu0 %v11033_v56  ;;  %9541 = vmatprep.subr.mxu1 %v11033_v56  ;;  %p9582_p4 = pnand %p9581_p3, %p9575_p0 }
 0x24c   :  { %1273 = vst [vmem:[#allocation2 + $0x1] sm:$0x1] %v1271_v16  ;;  %3422 = vadd.xlane.f32.xlu0 %v3421_v59  ;;  %v9066_v37 = vpop.f32.mrb[106].mxu0  ;;  %v3349_v15 = vpop.f32.mrb[107].mxu1  ;;  %9420 = vmatmul.mubr.msk.f32.gmra.mrb[212].mxu0 %vm242_vm0, %v9801_v62  ;;  %v3418_v23 = vsel %vm645_vm3, %v3386_v20, 0.0  ;;  %v1649_v36 = vrot.slane %v1584_v38, %v10728_v0 }
 0x24d   :  { %v3389_v28 = vmul.f32 %v9092_v52, %v9066_v37  ;;  %9446 = vmatmul.mubr.msk.f32.gmra.mrb[212].mxu1 %vm242_vm0, %v9798_v61  ;;  %v1593_v4 = vpop.xlane.xlu0 %1592  ;;  %v3204_v27 = vpop.f32.mrb[107].mxu0  ;;  %9422 = vmatprep.mubr.msk.f32.mxu0 %vm242_vm0, %v9813_v2 }
 0x24e   :  { %v3388_v30 = vmul.f32 %v3349_v15, %v3204_v27  ;;  %3419 = vadd.xlane.f32.xlu1 %v3418_v23  ;;  %9448 = vmatprep.mubr.msk.f32.mxu1 %vm242_vm0, %v9810_v1  ;;  %v1654_v59 = vsel %vm719_vm4, %v1653_v29, %v1649_v36 }
 0x24f   :  { %v1590_v33 = vpop.xlane.xlu1 %1589  ;;  %v9095_v12 = vpop.f32.mrb[108].mxu1  ;;  %v3427_v60 = vsel %vm645_vm3, %v3389_v28, 0.0 }
 0x250   :  { %v1658_v20 = vrot.slane %v1590_v33, %v10740_v19  ;;  %3428 = vadd.xlane.f32.xlu0 %v3427_v60  ;;  %v9069_v16 = vpop.f32.mrb[108].mxu0  ;;  %v3359_v38 = vpop.f32.mrb[109].mxu1  ;;  %9423 = vmatmul.mubr.msk.f32.gmra.mrb[214].mxu0 %vm242_vm0, %v9825_v6  ;;  %v3424_v52 = vsel %vm645_vm3, %v3388_v30, 0.0  ;;  %v1663_v30 = vrot.slane %v1593_v4, %v10760_v48 }
 0x251   :  { %v3391_v37 = vmul.f32 %v9095_v12, %v9069_v16  ;;  %9449 = vmatmul.mubr.msk.f32.gmra.mrb[214].mxu1 %vm242_vm0, %v9822_v5  ;;  %v1599_v15 = vpop.xlane.xlu0 %1598  ;;  %v3214_v23 = vpop.f32.mrb[109].mxu0  ;;  %9425 = vmatprep.mubr.msk.f32.mxu0 %vm242_vm0, %v9837_v10 }
 0x252   :  { %v1659_v28 = vsel %vm726_vm5, %v1658_v20, %v1654_v59  ;;  %v3390_v27 = vmul.f32 %v3359_v38, %v3214_v23  ;;  %3425 = vadd.xlane.f32.xlu1 %v3424_v52  ;;  %9451 = vmatprep.mubr.msk.f32.mxu1 %vm242_vm0, %v9834_v9 }
 0x253   :  { %v1596_v33 = vpop.xlane.xlu1 %1595  ;;  %v9098_v29 = vpop.f32.mrb[110].mxu1  ;;  %v3433_v36 = vsel %vm645_vm3, %v3391_v37, 0.0  ;;  %v1664_v38 = vsel %vm733_vm6, %v1663_v30, %v1659_v28 }
 0x254   :  { %v1668_v12 = vrot.slane %v1596_v33, %v10765_v35  ;;  %3434 = vadd.xlane.f32.xlu0 %v3433_v36  ;;  %v9072_v60 = vpop.f32.mrb[110].mxu0  ;;  %v3369_v16 = vpop.f32.mrb[111].mxu1  ;;  %9426 = vmatmul.mubr.msk.f32.gmra.mrb[216].mxu0 %vm242_vm0, %v9849_v14  ;;  %v3430_v20 = vsel %vm645_vm3, %v3390_v27, 0.0  ;;  %v1673_v27 = vrot.slane %v1599_v15, %v11870_v31 }
 0x255   :  { %v3393_v52 = vmul.f32 %v9098_v29, %v9072_v60  ;;  %9452 = vmatmul.mubr.msk.f32.gmra.mrb[216].mxu1 %vm242_vm0, %v9846_v13  ;;  %v1605_v4 = vpop.xlane.xlu0 %1604  ;;  %v3224_v59 = vpop.f32.mrb[111].mxu0  ;;  %9428 = vmatprep.mubr.msk.f32.mxu0 %vm242_vm0, %v9861_v18 }
 0x256   :  { %v1669_v37 = vsel %vm740_vm7, %v1668_v12, %v1664_v38  ;;  %v3392_v23 = vmul.f32 %v3369_v16, %v3224_v59  ;;  %3431 = vadd.xlane.f32.xlu1 %v3430_v20  ;;  %9454 = vmatprep.mubr.msk.f32.mxu1 %vm242_vm0, %v9858_v17 }
 0x257   :  { %v1602_v33 = vpop.xlane.xlu1 %1601  ;;  %v9129_v28 = vpop.f32.mrb[112].mxu1  ;;  %v3439_v30 = vsel %vm645_vm3, %v3393_v52, 0.0  ;;  %v1674_v16 = vsel %vm747_vm8, %v1673_v27, %v1669_v37 }
 0x258   :  { %v1678_v29 = vrot.slane %v1602_v33, %v11871_v47  ;;  %3440 = vadd.xlane.f32.xlu0 %v3439_v30  ;;  %v9103_v36 = vpop.f32.mrb[112].mxu0  ;;  %v3752_v60 = vpop.f32.mrb[113].mxu1  ;;  %9429 = vmatmul.mubr.msk.f32.gmra.mrb[218].mxu0 %vm242_vm0, %v9873_v22  ;;  %v3436_v12 = vsel %vm645_vm3, %v3392_v23, 0.0  ;;  %v1683_v23 = vrot.slane %v1605_v4, %v10803_v7 }
 0x259   :  { %v3832_v20 = vmul.f32 %v9129_v28, %v9103_v36  ;;  %9455 = vmatmul.mubr.msk.f32.gmra.mrb[218].mxu1 %vm242_vm0, %v9870_v21  ;;  %v1611_v15 = vpop.xlane.xlu0 %1610  ;;  %v3607_v38 = vpop.f32.mrb[113].mxu0  ;;  %9431 = vmatprep.mubr.msk.f32.mxu0 %vm242_vm0, %v9885_v26  ;;  %v11876_v21 = vld [vmem:[#allocation7_spill] sm:$0xff] }
 0x25a   :  { %v1679_v52 = vsel %vm754_vm9, %v1678_v29, %v1674_v16  ;;  %v3831_v59 = vmul.f32 %v3752_v60, %v3607_v38  ;;  %3437 = vadd.xlane.f32.xlu1 %v3436_v12  ;;  %9457 = vmatprep.mubr.msk.f32.mxu1 %vm242_vm0, %v9882_v25  ;;  %v11877_v16 = vld [vmem:[#allocation6_spill] sm:$0xff] }
 0x25b   :  { %v1608_v33 = vpop.xlane.xlu1 %1607  ;;  %v9132_v37 = vpop.f32.mrb[114].mxu1  ;;  %v3850_v27 = vsel %vm645_vm3, %v3832_v20, 0.0  ;;  %v1684_v60 = vsel %vm761_vm10, %v1683_v23, %v1679_v52 }
 0x25c   :  { %v1688_v28 = vrot.slane %v1608_v33, %v10811_v11  ;;  %3851 = vadd.xlane.f32.xlu0 %v3850_v27  ;;  %v9106_v30 = vpop.f32.mrb[114].mxu0  ;;  %v3762_v36 = vpop.f32.mrb[115].mxu1  ;;  %9432 = vmatmul.mubr.msk.f32.gmra.mrb[220].mxu0 %vm242_vm0, %v11876_v21  ;;  %v3847_v29 = vsel %vm645_vm3, %v3831_v59, 0.0  ;;  %v1693_v59 = vrot.slane %v1611_v15, %v11873_v32 }
 0x25d   :  { %v3834_v12 = vmul.f32 %v9132_v37, %v9106_v30  ;;  %9458 = vmatmul.mubr.msk.f32.gmra.mrb[220].mxu1 %vm242_vm0, %v11877_v16  ;;  %v1617_v4 = vpop.xlane.xlu0 %1616  ;;  %v3617_v38 = vpop.f32.mrb[115].mxu0  ;;  %9434 = vmatprep.mubr.msk.f32.mxu0 %vm242_vm0, %v9909_v34 }
 0x25e   :  { %v1689_v20 = vsel %vm768_vm11, %v1688_v28, %v1684_v60  ;;  %v3833_v33 = vmul.f32 %v3762_v36, %v3617_v38  ;;  %3848 = vadd.xlane.f32.xlu1 %v3847_v29  ;;  %9460 = vmatprep.mubr.msk.f32.mxu1 %vm242_vm0, %v11872_v8 }
 0x25f   :  { %v1614_v27 = vpop.xlane.xlu1 %1613  ;;  %v9135_v52 = vpop.f32.mrb[116].mxu1  ;;  %v3856_v23 = vsel %vm645_vm3, %v3834_v12, 0.0  ;;  %v1694_v36 = vsel %vm775_vm12, %v1693_v59, %v1689_v20 }
 0x260   :  { %v1698_v37 = vrot.slane %v1614_v27, %v11874_v42  ;;  %3857 = vadd.xlane.f32.xlu0 %v3856_v23  ;;  %v9109_v30 = vpop.f32.mrb[116].mxu0  ;;  %v3772_v16 = vpop.f32.mrb[117].mxu1  ;;  %9435 = vmatmul.mubr.msk.f32.gmra.mrb[222].mxu0 %vm242_vm0, %v9921_v44  ;;  %v3853_v28 = vsel %vm645_vm3, %v3833_v33, 0.0  ;;  %v1703_v33 = vrot.slane %v1617_v4, %v10848_v39 }
 0x261   :  { %v3836_v29 = vmul.f32 %v9135_v52, %v9109_v30  ;;  %9461 = vmatmul.mubr.msk.f32.gmra.mrb[222].mxu1 %vm242_vm0, %v9918_v43  ;;  %v1623_v15 = vpop.xlane.xlu0 %1622  ;;  %v3627_v60 = vpop.f32.mrb[117].mxu0  ;;  %9465 = vmatprep.mubr.msk.f32.mxu0 %vm242_vm0, %v9734_v41 }
 0x262   :  { %v1699_v12 = vsel %vm11878_vm13, %v1698_v37, %v1694_v36  ;;  %v3835_v38 = vmul.f32 %v3772_v16, %v3627_v60  ;;  %3854 = vadd.xlane.f32.xlu1 %v3853_v28  ;;  %9491 = vmatprep.mubr.msk.f32.mxu1 %vm242_vm0, %v9751_v46  ;;  %vm11879_vm13 = vcmask 851712  }
 0x263   :  { %v1620_v27 = vpop.xlane.xlu1 %1619  ;;  %v9138_v20 = vpop.f32.mrb[118].mxu1  ;;  %v3862_v59 = vsel %vm645_vm3, %v3836_v29, 0.0  ;;  %v1704_v37 = vsel %vm789_vm14, %v1703_v33, %v1699_v12 }
 0x264   :  { %v1708_v52 = vrot.slane %v1620_v27, %v10859_v51  ;;  %3863 = vadd.xlane.f32.xlu0 %v3862_v59  ;;  %v9112_v23 = vpop.f32.mrb[118].mxu0  ;;  %v3782_v30 = vpop.f32.mrb[119].mxu1  ;;  %9466 = vmatmul.mubr.msk.f32.vlgmr.msra.gmra.mrb[224].mxu0 %vm242_vm0, %v9731_v40  ;;  %v3859_v16 = vsel %vm645_vm3, %v3835_v38, 0.0  ;;  %v1713_v27 = vrot.slane %v1623_v15, %v10880_v55 }
 0x265   :  { %v3838_v28 = vmul.f32 %v9138_v20, %v9112_v23  ;;  %9492 = vmatmul.mubr.msk.f32.vlgmr.msra.gmra.mrb[224].mxu1 %vm242_vm0, %v9748_v45  ;;  %9516 = vmatpush3.msra.mxu0 %v11033_v56  ;;  %v1629_v4 = vpop.xlane.xlu0 %1628  ;;  %v3637_v36 = vpop.f32.mrb[119].mxu0 }
 0x266   :  { %v1709_v29 = vsel %vm11879_vm13, %v1708_v52, %v1704_v37  ;;  %9542 = vmatpush3.msra.mxu1 %v11033_v56  ;;  %v3837_v60 = vmul.f32 %v3782_v30, %v3637_v36  ;;  %3860 = vadd.xlane.f32.xlu1 %v3859_v16  ;;  %v1723_v15 = vrot.slane %v1629_v4, %v10893_v24  ;;  %vm11882_vm13 = vcmask 720512  }
 0x267   :  { %9468 = vmatprep.mubr.msk.f32.mxu0 %vm242_vm0, %v9764_v50  ;;  %9494 = vmatprep.mubr.msk.f32.mxu1 %vm242_vm0, %v9761_v49  ;;  %v1626_v12 = vpop.xlane.xlu1 %1625  ;;  %v9141_v38 = vpop.f32.mrb[120].mxu1  ;;  %v3868_v33 = vsel %vm645_vm3, %v3838_v28, 0.0  ;;  %v1714_v23 = vsel %vm803_vm1, %v1713_v27, %v1709_v29 }
 0x268   :  { %v1718_v20 = vrot.slane %v1626_v12, %v10887_v3  ;;  %3869 = vadd.xlane.f32.xlu0 %v3868_v33  ;;  %v9115_v59 = vpop.f32.mrb[120].mxu0  ;;  %v3792_v52 = vpop.f32.mrb[121].mxu1  ;;  %9469 = vmatmul.mubr.msk.f32.gmra.mrb[226].mxu0 %vm242_vm0, %v9777_v54  ;;  %v3865_v56 = vsel %vm645_vm3, %v3837_v60, 0.0 }
 0x269   :  { %v3840_v30 = vmul.f32 %v9141_v38, %v9115_v59  ;;  %9495 = vmatmul.mubr.msk.f32.gmra.mrb[226].mxu1 %vm242_vm0, %v9774_v53  ;;  %v2040_v16 = vpop.xlane.xlu0 %2039  ;;  %v3647_v37 = vpop.f32.mrb[121].mxu0  ;;  %9471 = vmatprep.mubr.msk.f32.mxu0 %vm242_vm0, %v9789_v58 }
 0x26a   :  { %v1719_v28 = vsel %vm810_vm2, %v1718_v20, %v1714_v23  ;;  %v3839_v36 = vmul.f32 %v3792_v52, %v3647_v37  ;;  %3866 = vadd.xlane.f32.xlu1 %v3865_v56  ;;  %9497 = vmatprep.mubr.msk.f32.mxu1 %vm242_vm0, %v9786_v57  ;;  %v2106_v20 = vrot.slane %v2040_v16, %v10724_v63 }
 0x26b   :  { %v1724_v4 = vsel %vm817_vm15, %v1723_v15, %v1719_v28  ;;  %v2037_v60 = vpop.xlane.xlu1 %2036  ;;  %v9144_v29 = vpop.f32.mrb[122].mxu1  ;;  %v3874_v27 = vsel %vm645_vm3, %v3840_v30, 0.0 }
 0x26c   :  { %1726 = vst [vmem:[#allocation2 + $0x2] sm:$0x1] %v1724_v4  ;;  %3875 = vadd.xlane.f32.xlu0 %v3874_v27  ;;  %v9118_v12 = vpop.f32.mrb[122].mxu0  ;;  %v3802_v38 = vpop.f32.mrb[123].mxu1  ;;  %9472 = vmatmul.mubr.msk.f32.gmra.mrb[228].mxu0 %vm242_vm0, %v9801_v62  ;;  %v3871_v33 = vsel %vm645_vm3, %v3839_v36, 0.0  ;;  %v2102_v59 = vrot.slane %v2037_v60, %v10728_v0 }
 0x26d   :  { %v3842_v52 = vmul.f32 %v9144_v29, %v9118_v12  ;;  %9498 = vmatmul.mubr.msk.f32.gmra.mrb[228].mxu1 %vm242_vm0, %v9798_v61  ;;  %v2046_v56 = vpop.xlane.xlu0 %2045  ;;  %v3657_v15 = vpop.f32.mrb[123].mxu0  ;;  %9474 = vmatprep.mubr.msk.f32.mxu0 %vm242_vm0, %v9813_v2 }
 0x26e   :  { %v3841_v23 = vmul.f32 %v3802_v38, %v3657_v15  ;;  %3872 = vadd.xlane.f32.xlu1 %v3871_v33  ;;  %9500 = vmatprep.mubr.msk.f32.mxu1 %vm242_vm0, %v9810_v1  ;;  %v2107_v29 = vsel %vm719_vm4, %v2106_v20, %v2102_v59  ;;  %v2116_v15 = vrot.slane %v2046_v56, %v10760_v48 }
 0x26f   :  { %v2043_v30 = vpop.xlane.xlu1 %2042  ;;  %v9147_v37 = vpop.f32.mrb[124].mxu1  ;;  %v3880_v16 = vsel %vm645_vm3, %v3842_v52, 0.0 }
 0x270   :  { %v2111_v28 = vrot.slane %v2043_v30, %v10740_v19  ;;  %3881 = vadd.xlane.f32.xlu0 %v3880_v16  ;;  %v9121_v36 = vpop.f32.mrb[124].mxu0  ;;  %v3812_v4 = vpop.f32.mrb[125].mxu1  ;;  %9475 = vmatmul.mubr.msk.f32.gmra.mrb[230].mxu0 %vm242_vm0, %v9825_v6  ;;  %v3877_v60 = vsel %vm645_vm3, %v3841_v23, 0.0 }
 0x271   :  { %v3844_v27 = vmul.f32 %v9147_v37, %v9121_v36  ;;  %9501 = vmatmul.mubr.msk.f32.gmra.mrb[230].mxu1 %vm242_vm0, %v9822_v5  ;;  %v2052_v12 = vpop.xlane.xlu0 %2051  ;;  %v3667_v38 = vpop.f32.mrb[125].mxu0  ;;  %9477 = vmatprep.mubr.msk.f32.mxu0 %vm242_vm0, %v9837_v10 }
 0x272   :  { %v2112_v33 = vsel %vm726_vm5, %v2111_v28, %v2107_v29  ;;  %v3843_v52 = vmul.f32 %v3812_v4, %v3667_v38  ;;  %3878 = vadd.xlane.f32.xlu1 %v3877_v60  ;;  %9503 = vmatprep.mubr.msk.f32.mxu1 %vm242_vm0, %v9834_v9  ;;  %v2126_v38 = vrot.slane %v2052_v12, %v11870_v31 }
 0x273   :  { %v2049_v23 = vpop.xlane.xlu1 %2048  ;;  %v9150_v20 = vpop.f32.mrb[126].mxu1  ;;  %v3886_v59 = vsel %vm645_vm3, %v3844_v27, 0.0  ;;  %v2117_v36 = vsel %vm733_vm6, %v2116_v15, %v2112_v33 }
 0x274   :  { %v2121_v30 = vrot.slane %v2049_v23, %v10765_v35  ;;  %3887 = vadd.xlane.f32.xlu0 %v3886_v59  ;;  %v9124_v37 = vpop.f32.mrb[126].mxu0  ;;  %v3822_v16 = vpop.f32.mrb[127].mxu1  ;;  %9478 = vmatmul.mubr.msk.f32.gmra.mrb[232].mxu0 %vm242_vm0, %v9849_v14  ;;  %v3883_v28 = vsel %vm645_vm3, %v3843_v52, 0.0 }
 0x275   :  { %v3846_v4 = vmul.f32 %v9150_v20, %v9124_v37  ;;  %9504 = vmatmul.mubr.msk.f32.gmra.mrb[232].mxu1 %vm242_vm0, %v9846_v13  ;;  %v2058_v56 = vpop.xlane.xlu0 %2057  ;;  %v3677_v60 = vpop.f32.mrb[127].mxu0  ;;  %9480 = vmatprep.mubr.msk.f32.mxu0 %vm242_vm0, %v9861_v18 }
 0x276   :  { %v2122_v29 = vsel %vm740_vm7, %v2121_v30, %v2117_v36  ;;  %v3845_v27 = vmul.f32 %v3822_v16, %v3677_v60  ;;  %3884 = vadd.xlane.f32.xlu1 %v3883_v28  ;;  %9506 = vmatprep.mubr.msk.f32.mxu1 %vm242_vm0, %v9858_v17  ;;  %v11880_v28 = vld [vmem:[#allocation5_spill] sm:$0xff] }
 0x277   :  { %v2055_v52 = vpop.xlane.xlu1 %2054  ;;  %v9181_v33 = vpop.f32.mrb[128].mxu1  ;;  %v3892_v15 = vsel %vm645_vm3, %v3846_v4, 0.0  ;;  %v2127_v37 = vsel %vm747_vm8, %v2126_v38, %v2122_v29 }
 0x278   :  { %v2131_v23 = vrot.slane %v2055_v52, %v11871_v47  ;;  %3893 = vadd.xlane.f32.xlu0 %v3892_v15  ;;  %v9155_v20 = vpop.f32.mrb[128].mxu0  ;;  %v4205_v59 = vpop.f32.mrb[129].mxu1  ;;  %9481 = vmatmul.mubr.msk.f32.gmra.mrb[234].mxu0 %vm242_vm0, %v9873_v22  ;;  %v3889_v30 = vsel %vm645_vm3, %v3845_v27, 0.0  ;;  %v2136_v27 = vrot.slane %v2058_v56, %v10803_v7 }
 0x279   :  { %v4285_v16 = vmul.f32 %v9181_v33, %v9155_v20  ;;  %9507 = vmatmul.mubr.msk.f32.gmra.mrb[234].mxu1 %vm242_vm0, %v11880_v28  ;;  %v2064_v12 = vpop.xlane.xlu0 %2063  ;;  %v4060_v36 = vpop.f32.mrb[129].mxu0  ;;  %9483 = vmatprep.mubr.msk.f32.mxu0 %vm242_vm0, %v9885_v26 }
 0x27a   :  { %v2132_v4 = vsel %vm754_vm9, %v2131_v23, %v2127_v37  ;;  %v4284_v60 = vmul.f32 %v4205_v59, %v4060_v36  ;;  %3890 = vadd.xlane.f32.xlu1 %v3889_v30  ;;  %9509 = vmatprep.mubr.msk.f32.mxu1 %vm242_vm0, %v9882_v25  ;;  %v11881_v37 = vld [vmem:[#allocation6_spill] sm:$0xff] }
 0x27b   :  { %v2061_v52 = vpop.xlane.xlu1 %2060  ;;  %v9184_v29 = vpop.f32.mrb[130].mxu1  ;;  %v4303_v38 = vsel %vm645_vm3, %v4285_v16, 0.0  ;;  %v2137_v59 = vsel %vm761_vm10, %v2136_v27, %v2132_v4 }
 0x27c   :  { %v2141_v33 = vrot.slane %v2061_v52, %v10811_v11  ;;  %4304 = vadd.xlane.f32.xlu0 %v4303_v38  ;;  %v9158_v15 = vpop.f32.mrb[130].mxu0  ;;  %v4215_v20 = vpop.f32.mrb[131].mxu1  ;;  %9484 = vmatmul.mubr.msk.f32.gmra.mrb[236].mxu0 %vm242_vm0, %v11876_v21  ;;  %v4300_v23 = vsel %vm645_vm3, %v4284_v60, 0.0  ;;  %v2146_v60 = vrot.slane %v2064_v12, %v11873_v32 }
 0x27d   :  { %v4287_v30 = vmul.f32 %v9184_v29, %v9158_v15  ;;  %9510 = vmatmul.mubr.msk.f32.gmra.mrb[236].mxu1 %vm242_vm0, %v11881_v37  ;;  %v2070_v56 = vpop.xlane.xlu0 %2069  ;;  %v4070_v36 = vpop.f32.mrb[131].mxu0  ;;  %9486 = vmatprep.mubr.msk.f32.mxu0 %vm242_vm0, %v9909_v34 }
 0x27e   :  { %v2142_v16 = vsel %vm768_vm11, %v2141_v33, %v2137_v59  ;;  %v4286_v52 = vmul.f32 %v4215_v20, %v4070_v36  ;;  %4301 = vadd.xlane.f32.xlu1 %v4300_v23  ;;  %9512 = vmatprep.mubr.msk.f32.mxu1 %vm242_vm0, %v11872_v8 }
 0x27f   :  { %v2067_v38 = vpop.xlane.xlu1 %2066  ;;  %v9187_v4 = vpop.f32.mrb[132].mxu1  ;;  %v4309_v27 = vsel %vm645_vm3, %v4287_v30, 0.0  ;;  %v2147_v20 = vsel %vm775_vm12, %v2146_v60, %v2142_v16 }
 0x280   :  { %v2151_v29 = vrot.slane %v2067_v38, %v11874_v42  ;;  %4310 = vadd.xlane.f32.xlu0 %v4309_v27  ;;  %v9161_v15 = vpop.f32.mrb[132].mxu0  ;;  %v4225_v37 = vpop.f32.mrb[133].mxu1  ;;  %9487 = vmatmul.mubr.msk.f32.gmra.mrb[238].mxu0 %vm242_vm0, %v9921_v44  ;;  %v4306_v33 = vsel %vm645_vm3, %v4286_v52, 0.0  ;;  %v2156_v52 = vrot.slane %v2070_v56, %v10848_v39 }
 0x281   :  { %v4289_v23 = vmul.f32 %v9187_v4, %v9161_v15  ;;  %9513 = vmatmul.mubr.msk.f32.gmra.mrb[238].mxu1 %vm242_vm0, %v9918_v43  ;;  %v2076_v12 = vpop.xlane.xlu0 %2075  ;;  %v4080_v59 = vpop.f32.mrb[133].mxu0  ;;  %9517 = vmatprep.mubr.msk.f32.mxu0 %vm242_vm0, %v9734_v41 }
 0x282   :  { %v2152_v30 = vsel %vm11882_vm13, %v2151_v29, %v2147_v20  ;;  %v4288_v36 = vmul.f32 %v4225_v37, %v4080_v59  ;;  %4307 = vadd.xlane.f32.xlu1 %v4306_v33  ;;  %9543 = vmatprep.mubr.msk.f32.mxu1 %vm242_vm0, %v9751_v46  ;;  %vm11883_vm13 = vcmask 851712  }
 0x283   :  { %v2073_v38 = vpop.xlane.xlu1 %2072  ;;  %v9190_v16 = vpop.f32.mrb[134].mxu1  ;;  %v4315_v60 = vsel %vm645_vm3, %v4289_v23, 0.0  ;;  %v2157_v37 = vsel %vm789_vm14, %v2156_v52, %v2152_v30 }
 0x284   :  { %v2161_v4 = vrot.slane %v2073_v38, %v10859_v51  ;;  %4316 = vadd.xlane.f32.xlu0 %v4315_v60  ;;  %v9164_v27 = vpop.f32.mrb[134].mxu0  ;;  %v4235_v15 = vpop.f32.mrb[135].mxu1  ;;  %9518 = vmatmul.mubr.msk.f32.vlgmr.msra.gmra.mrb[240].mxu0 %vm242_vm0, %v9731_v40  ;;  %v4312_v41 = vsel %vm645_vm3, %v4288_v36, 0.0  ;;  %v2166_v40 = vrot.slane %v2076_v12, %v10880_v55 }
 0x285   :  { %v4291_v29 = vmul.f32 %v9190_v16, %v9164_v27  ;;  %9544 = vmatmul.mubr.msk.f32.vlgmr.msra.gmra.mrb[240].mxu1 %vm242_vm0, %v9748_v45  ;;  %v2082_v46 = vpop.xlane.xlu0 %2081  ;;  %v4090_v56 = vpop.f32.mrb[135].mxu0  ;;  %9520 = vmatprep.mubr.msk.f32.mxu0 %vm242_vm0, %v9764_v50 }
 0x286   :  { %v2162_v33 = vsel %vm11883_vm13, %v2161_v4, %v2157_v37  ;;  %v4290_v20 = vmul.f32 %v4235_v15, %v4090_v56  ;;  %4313 = vadd.xlane.f32.xlu1 %v4312_v41  ;;  %9546 = vmatprep.mubr.msk.f32.mxu1 %vm242_vm0, %v9761_v49  ;;  %v2176_v38 = vrot.slane %v2082_v46, %v10893_v24  ;;  %vm11885_vm13 = vcmask 720512  }
 0x287   :  { %v2079_v23 = vpop.xlane.xlu1 %2078  ;;  %v9193_v59 = vpop.f32.mrb[136].mxu1  ;;  %v4321_v30 = vsel %vm645_vm3, %v4291_v29, 0.0  ;;  %v2167_v49 = vsel %vm803_vm1, %v2166_v40, %v2162_v33 }
 0x288   :  { %v2171_v45 = vrot.slane %v2079_v23, %v10887_v3  ;;  %4322 = vadd.xlane.f32.xlu0 %v4321_v30  ;;  %v9167_v36 = vpop.f32.mrb[136].mxu0  ;;  %v4245_v52 = vpop.f32.mrb[137].mxu1  ;;  %9521 = vmatmul.mubr.msk.f32.gmra.mrb[242].mxu0 %vm242_vm0, %v9777_v54  ;;  %v4318_v50 = vsel %vm645_vm3, %v4290_v20, 0.0 }
 0x289   :  { %v4293_v16 = vmul.f32 %v9193_v59, %v9167_v36  ;;  %9547 = vmatmul.mubr.msk.f32.gmra.mrb[242].mxu1 %vm242_vm0, %v9774_v53  ;;  %v2493_v12 = vpop.xlane.xlu0 %2492  ;;  %v4100_v60 = vpop.f32.mrb[137].mxu0  ;;  %9523 = vmatprep.mubr.msk.f32.mxu0 %vm242_vm0, %v9789_v58 }
 0x28a   :  { %v2172_v4 = vsel %vm810_vm2, %v2171_v45, %v2167_v49  ;;  %v4292_v27 = vmul.f32 %v4245_v52, %v4100_v60  ;;  %4319 = vadd.xlane.f32.xlu1 %v4318_v50  ;;  %9549 = vmatprep.mubr.msk.f32.mxu1 %vm242_vm0, %v9786_v57  ;;  %v2559_v46 = vrot.slane %v2493_v12, %v10724_v63 }
 0x28b   :  { %v2177_v54 = vsel %vm817_vm15, %v2176_v38, %v2172_v4  ;;  %v2490_v15 = vpop.xlane.xlu1 %2489  ;;  %v9196_v41 = vpop.f32.mrb[138].mxu1  ;;  %v4327_v37 = vsel %vm645_vm3, %v4293_v16, 0.0 }
 0x28c   :  { %2179 = vst [vmem:[#allocation2 + $0x3] sm:$0x1] %v2177_v54  ;;  %4328 = vadd.xlane.f32.xlu0 %v4327_v37  ;;  %v9170_v53 = vpop.f32.mrb[138].mxu0  ;;  %v4255_v29 = vpop.f32.mrb[139].mxu1  ;;  %9524 = vmatmul.mubr.msk.f32.gmra.mrb[244].mxu0 %vm242_vm0, %v9801_v62  ;;  %v4324_v58 = vsel %vm645_vm3, %v4292_v27, 0.0  ;;  %v2555_v56 = vrot.slane %v2490_v15, %v10728_v0 }
 0x28d   :  { %v4295_v57 = vmul.f32 %v9196_v41, %v9170_v53  ;;  %9550 = vmatmul.mubr.msk.f32.gmra.mrb[244].mxu1 %vm242_vm0, %v9798_v61  ;;  %v2499_v33 = vpop.xlane.xlu0 %2498  ;;  %v4110_v20 = vpop.f32.mrb[139].mxu0  ;;  %9526 = vmatprep.mubr.msk.f32.mxu0 %vm242_vm0, %v9813_v2 }
 0x28e   :  { %v4294_v40 = vmul.f32 %v4255_v29, %v4110_v20  ;;  %4325 = vadd.xlane.f32.xlu1 %v4324_v58  ;;  %9552 = vmatprep.mubr.msk.f32.mxu1 %vm242_vm0, %v9810_v1  ;;  %v2560_v2 = vsel %vm719_vm4, %v2559_v46, %v2555_v56 }
 0x28f   :  { %v2496_v62 = vpop.xlane.xlu1 %2495  ;;  %v9199_v23 = vpop.f32.mrb[140].mxu1  ;;  %v4333_v59 = vsel %vm645_vm3, %v4295_v57, 0.0 }
 0x290   :  { %v2564_v30 = vrot.slane %v2496_v62, %v10740_v19  ;;  %4334 = vadd.xlane.f32.xlu0 %v4333_v59  ;;  %v9173_v45 = vpop.f32.mrb[140].mxu0  ;;  %v4265_v36 = vpop.f32.mrb[141].mxu1  ;;  %9527 = vmatmul.mubr.msk.f32.gmra.mrb[246].mxu0 %vm242_vm0, %v9825_v6  ;;  %v4330_v61 = vsel %vm645_vm3, %v4294_v40, 0.0  ;;  %v2569_v6 = vrot.slane %v2499_v33, %v10760_v48 }
 0x291   :  { %v4297_v52 = vmul.f32 %v9199_v23, %v9173_v45  ;;  %9553 = vmatmul.mubr.msk.f32.gmra.mrb[246].mxu1 %vm242_vm0, %v9822_v5  ;;  %v2505_v1 = vpop.xlane.xlu0 %2504  ;;  %v4120_v50 = vpop.f32.mrb[141].mxu0  ;;  %9529 = vmatprep.mubr.msk.f32.mxu0 %vm242_vm0, %v9837_v10 }
 0x292   :  { %v2565_v38 = vsel %vm726_vm5, %v2564_v30, %v2560_v2  ;;  %v4296_v49 = vmul.f32 %v4265_v36, %v4120_v50  ;;  %4331 = vadd.xlane.f32.xlu1 %v4330_v61  ;;  %9555 = vmatprep.mubr.msk.f32.mxu1 %vm242_vm0, %v9834_v9 }
 0x293   :  { %v2502_v16 = vpop.xlane.xlu1 %2501  ;;  %v9202_v12 = vpop.f32.mrb[142].mxu1  ;;  %v4339_v60 = vsel %vm645_vm3, %v4297_v52, 0.0  ;;  %v2570_v54 = vsel %vm733_vm6, %v2569_v6, %v2565_v38 }
 0x294   :  { %v2574_v5 = vrot.slane %v2502_v16, %v10765_v35  ;;  %4340 = vadd.xlane.f32.xlu0 %v4339_v60  ;;  %v9176_v4 = vpop.f32.mrb[142].mxu0  ;;  %v4275_v27 = vpop.f32.mrb[143].mxu1  ;;  %9530 = vmatmul.mubr.msk.f32.gmra.mrb[248].mxu0 %vm242_vm0, %v9849_v14  ;;  %v4336_v10 = vsel %vm645_vm3, %v4296_v49, 0.0  ;;  %v2579_v14 = vrot.slane %v2505_v1, %v11870_v31 }
 0x295   :  { %v4299_v15 = vmul.f32 %v9202_v12, %v9176_v4  ;;  %9556 = vmatmul.mubr.msk.f32.gmra.mrb[248].mxu1 %vm242_vm0, %v9846_v13  ;;  %v2511_v9 = vpop.xlane.xlu0 %2510  ;;  %v4130_v41 = vpop.f32.mrb[143].mxu0  ;;  %9532 = vmatprep.mubr.msk.f32.mxu0 %vm242_vm0, %v9861_v18 }
 0x296   :  { %v2575_v37 = vsel %vm740_vm7, %v2574_v5, %v2570_v54  ;;  %v4298_v53 = vmul.f32 %v4275_v27, %v4130_v41  ;;  %4337 = vadd.xlane.f32.xlu1 %v4336_v10  ;;  %9558 = vmatprep.mubr.msk.f32.mxu1 %vm242_vm0, %v9858_v17 }
 0x297   :  { %v2508_v29 = vpop.xlane.xlu1 %2507  ;;  %v9233_v58 = vpop.f32.mrb[144].mxu1  ;;  %v4345_v46 = vsel %vm645_vm3, %v4299_v15, 0.0  ;;  %v2580_v33 = vsel %vm747_vm8, %v2579_v14, %v2575_v37 }
 0x298   :  { %v2584_v13 = vrot.slane %v2508_v29, %v11871_v47  ;;  %4346 = vadd.xlane.f32.xlu0 %v4345_v46  ;;  %v9207_v56 = vpop.f32.mrb[144].mxu0  ;;  %v4658_v57 = vpop.f32.mrb[145].mxu1  ;;  %9533 = vmatmul.mubr.msk.f32.gmra.mrb[250].mxu0 %vm242_vm0, %v9873_v22  ;;  %v4342_v18 = vsel %vm645_vm3, %v4298_v53, 0.0  ;;  %v2589_v22 = vrot.slane %v2511_v9, %v10803_v7 }
 0x299   :  { %v4738_v20 = vmul.f32 %v9233_v58, %v9207_v56  ;;  %9559 = vmatmul.mubr.msk.f32.gmra.mrb[250].mxu1 %vm242_vm0, %v11880_v28  ;;  %v2517_v17 = vpop.xlane.xlu0 %2516  ;;  %v4513_v40 = vpop.f32.mrb[145].mxu0  ;;  %9535 = vmatprep.mubr.msk.f32.mxu0 %vm242_vm0, %v9885_v26 }
 0x29a   :  { %v2585_v62 = vsel %vm754_vm9, %v2584_v13, %v2580_v33  ;;  %v4737_v23 = vmul.f32 %v4658_v57, %v4513_v40  ;;  %4343 = vadd.xlane.f32.xlu1 %v4342_v18  ;;  %9561 = vmatprep.mubr.msk.f32.mxu1 %vm242_vm0, %v9882_v25  ;;  %v11884_v25 = vld [vmem:[#allocation6_spill] sm:$0xff] }
 0x29b   :  { %v2514_v59 = vpop.xlane.xlu1 %2513  ;;  %v9236_v30 = vpop.f32.mrb[146].mxu1  ;;  %v4756_v45 = vsel %vm645_vm3, %v4738_v20, 0.0  ;;  %v2590_v2 = vsel %vm761_vm10, %v2589_v22, %v2585_v62 }
 0x29c   :  { %v2594_v28 = vrot.slane %v2514_v59, %v10811_v11  ;;  %4757 = vadd.xlane.f32.xlu0 %v4756_v45  ;;  %v9210_v36 = vpop.f32.mrb[146].mxu0  ;;  %v4668_v61 = vpop.f32.mrb[147].mxu1  ;;  %9536 = vmatmul.mubr.msk.f32.gmra.mrb[252].mxu0 %vm242_vm0, %v11876_v21  ;;  %v4753_v26 = vsel %vm645_vm3, %v4737_v23, 0.0  ;;  %v2599_v21 = vrot.slane %v2517_v17, %v11873_v32 }
 0x29d   :  { %v4740_v52 = vmul.f32 %v9236_v30, %v9210_v36  ;;  %9562 = vmatmul.mubr.msk.f32.gmra.mrb[252].mxu1 %vm242_vm0, %v11884_v25  ;;  %v2523_v1 = vpop.xlane.xlu0 %2522  ;;  %v4523_v50 = vpop.f32.mrb[147].mxu0  ;;  %9538 = vmatprep.mubr.msk.f32.mxu0 %vm242_vm0, %v9909_v34 }
 0x29e   :  { %v2595_v38 = vsel %vm768_vm11, %v2594_v28, %v2590_v2  ;;  %v4739_v49 = vmul.f32 %v4668_v61, %v4523_v50  ;;  %4754 = vadd.xlane.f32.xlu1 %v4753_v26  ;;  %9564 = vmatprep.mubr.msk.f32.mxu1 %vm242_vm0, %v11872_v8  ;;  %v2609_v41 = vrot.slane %v2523_v1, %v10848_v39 }
 0x29f   :  { %v2520_v6 = vpop.xlane.xlu1 %2519  ;;  %v9239_v16 = vpop.f32.mrb[148].mxu1  ;;  %v4762_v12 = vsel %vm645_vm3, %v4740_v52, 0.0  ;;  %v2600_v27 = vsel %vm775_vm12, %v2599_v21, %v2595_v38 }
 0x2a0   :  { %v2604_v60 = vrot.slane %v2520_v6, %v11874_v42  ;;  %4763 = vadd.xlane.f32.xlu0 %v4762_v12  ;;  %v9213_v5 = vpop.f32.mrb[148].mxu0  ;;  %v4678_v4 = vpop.f32.mrb[149].mxu1  ;;  %9539 = vmatmul.mubr.msk.f32.gmra.mrb[254].mxu0 %vm242_vm0, %v9921_v44  ;;  %v4759_v34 = vsel %vm645_vm3, %v4739_v49, 0.0 }
 0x2a1   :  { %v4742_v10 = vmul.f32 %v9239_v16, %v9213_v5  ;;  %9565 = vmatmul.mubr.msk.f32.gmra.mrb[254].mxu1 %vm242_vm0, %v9918_v43  ;;  %v2529_v8 = vpop.xlane.xlu0 %2528  ;;  %v4533_v54 = vpop.f32.mrb[149].mxu0  ;;  %vm11886_vm0 = vcmask 851712  }
 0x2a2   :  { %v2605_v15 = vsel %vm11885_vm13, %v2604_v60, %v2600_v27  ;;  %v4741_v9 = vmul.f32 %v4678_v4, %v4533_v54  ;;  %4760 = vadd.xlane.f32.xlu1 %v4759_v34  ;;  %v2619_v20 = vrot.slane %v2529_v8, %v10880_v55 }
 0x2a3   :  { %v2526_v37 = vpop.xlane.xlu1 %2525  ;;  %v9242_v53 = vpop.f32.mrb[150].mxu1  ;;  %v4768_v44 = vsel %vm645_vm3, %v4742_v10, 0.0  ;;  %v2610_v43 = vsel %vm789_vm14, %v2609_v41, %v2605_v15 }
 0x2a4   :  { %v2614_v14 = vrot.slane %v2526_v37, %v10859_v51  ;;  %4769 = vadd.xlane.f32.xlu0 %v4768_v44  ;;  %v9216_v29 = vpop.f32.mrb[150].mxu0  ;;  %v4688_v58 = vpop.f32.mrb[151].mxu1  ;;  %v4765_v46 = vsel %vm645_vm3, %v4741_v9, 0.0 }
 0x2a5   :  { %v4744_v13 = vmul.f32 %v9242_v53, %v9216_v29  ;;  %v2535_v56 = vpop.xlane.xlu0 %2534  ;;  %v4543_v57 = vpop.f32.mrb[151].mxu0 }
 0x2a6   :  { %v2615_v18 = vsel %vm11886_vm0, %v2614_v14, %v2610_v43  ;;  %v4743_v33 = vmul.f32 %v4688_v58, %v4543_v57  ;;  %4766 = vadd.xlane.f32.xlu1 %v4765_v46  ;;  %v2629_v45 = vrot.slane %v2535_v56, %v10893_v24 }
 0x2a7   :  { %v2532_v17 = vpop.xlane.xlu1 %2531  ;;  %v9245_v40 = vpop.f32.mrb[152].mxu1  ;;  %v4774_v62 = vsel %vm645_vm3, %v4744_v13, 0.0  ;;  %v2620_v28 = vsel %vm803_vm1, %v2619_v20, %v2615_v18 }
 0x2a8   :  { %v2624_v23 = vrot.slane %v2532_v17, %v10887_v3  ;;  %4775 = vadd.xlane.f32.xlu0 %v4774_v62  ;;  %v9219_v22 = vpop.f32.mrb[152].mxu0  ;;  %v4698_v59 = vpop.f32.mrb[153].mxu1  ;;  %v4771_v30 = vsel %vm645_vm3, %v4743_v33, 0.0 }
 0x2a9   :  { %v4746_v36 = vmul.f32 %v9245_v40, %v9219_v22  ;;  %v2946_v61 = vpop.xlane.xlu0 %2945  ;;  %v4553_v26 = vpop.f32.mrb[153].mxu0 }
 0x2aa   :  { %v2625_v2 = vsel %vm810_vm2, %v2624_v23, %v2620_v28  ;;  %v4745_v52 = vmul.f32 %v4698_v59, %v4553_v26  ;;  %4772 = vadd.xlane.f32.xlu1 %v4771_v30  ;;  %v3012_v16 = vrot.slane %v2946_v61, %v10724_v63 }
 0x2ab   :  { %v2630_v25 = vsel %vm817_vm15, %v2629_v45, %v2625_v2  ;;  %v2943_v1 = vpop.xlane.xlu1 %2942  ;;  %v9248_v50 = vpop.f32.mrb[154].mxu1  ;;  %v4780_v38 = vsel %vm645_vm3, %v4746_v36, 0.0 }
 0x2ac   :  { %2632 = vst [vmem:[#allocation2 + $0x4] sm:$0x1] %v2630_v25  ;;  %4781 = vadd.xlane.f32.xlu0 %v4780_v38  ;;  %v9222_v49 = vpop.f32.mrb[154].mxu0  ;;  %v4708_v21 = vpop.f32.mrb[155].mxu1  ;;  %v4777_v6 = vsel %vm645_vm3, %v4745_v52, 0.0  ;;  %v3008_v12 = vrot.slane %v2943_v1, %v10728_v0 }
 0x2ad   :  { %v4748_v60 = vmul.f32 %v9248_v50, %v9222_v49  ;;  %v2952_v5 = vpop.xlane.xlu0 %2951  ;;  %v4563_v4 = vpop.f32.mrb[155].mxu0 }
 0x2ae   :  { %v4747_v34 = vmul.f32 %v4708_v21, %v4563_v4  ;;  %4778 = vadd.xlane.f32.xlu1 %v4777_v6  ;;  %v3013_v37 = vsel %vm719_vm4, %v3012_v16, %v3008_v12  ;;  %v3022_v46 = vrot.slane %v2952_v5, %v10760_v48 }
 0x2af   :  { %v2949_v27 = vpop.xlane.xlu1 %2948  ;;  %v9251_v10 = vpop.f32.mrb[156].mxu1  ;;  %v4786_v8 = vsel %vm645_vm3, %v4748_v60, 0.0 }
 0x2b0   :  { %v3017_v54 = vrot.slane %v2949_v27, %v10740_v19  ;;  %4787 = vadd.xlane.f32.xlu0 %v4786_v8  ;;  %v9225_v15 = vpop.f32.mrb[156].mxu0  ;;  %v4718_v9 = vpop.f32.mrb[157].mxu1  ;;  %v4783_v41 = vsel %vm645_vm3, %v4747_v34, 0.0 }
 0x2b1   :  { %v4750_v53 = vmul.f32 %v9251_v10, %v9225_v15  ;;  %v2958_v44 = vpop.xlane.xlu0 %2957  ;;  %v4573_v14 = vpop.f32.mrb[157].mxu0 }
 0x2b2   :  { %v3018_v29 = vsel %vm726_vm5, %v3017_v54, %v3013_v37  ;;  %v4749_v58 = vmul.f32 %v4718_v9, %v4573_v14  ;;  %4784 = vadd.xlane.f32.xlu1 %v4783_v41  ;;  %v3032_v30 = vrot.slane %v2958_v44, %v11870_v31 }
 0x2b3   :  { %v2955_v43 = vpop.xlane.xlu1 %2954  ;;  %v9254_v13 = vpop.f32.mrb[158].mxu1  ;;  %v4792_v56 = vsel %vm645_vm3, %v4750_v53, 0.0  ;;  %v3023_v17 = vsel %vm733_vm6, %v3022_v46, %v3018_v29 }
 0x2b4   :  { %v3027_v57 = vrot.slane %v2955_v43, %v10765_v35  ;;  %4793 = vadd.xlane.f32.xlu0 %v4792_v56  ;;  %v9228_v18 = vpop.f32.mrb[158].mxu0  ;;  %v4728_v33 = vpop.f32.mrb[159].mxu1  ;;  %v4789_v20 = vsel %vm645_vm3, %v4749_v58, 0.0 }
 0x2b5   :  { %v4752_v40 = vmul.f32 %v9254_v13, %v9228_v18  ;;  %v2964_v62 = vpop.xlane.xlu0 %2963  ;;  %v4583_v23 = vpop.f32.mrb[159].mxu0 }
 0x2b6   :  { %v3028_v22 = vsel %vm740_vm7, %v3027_v57, %v3023_v17  ;;  %v4751_v59 = vmul.f32 %v4728_v33, %v4583_v23  ;;  %4790 = vadd.xlane.f32.xlu1 %v4789_v20  ;;  %v3042_v6 = vrot.slane %v2964_v62, %v10803_v7 }
 0x2b7   :  { %v2961_v45 = vpop.xlane.xlu1 %2960  ;;  %v9285_v28 = vpop.f32.mrb[160].mxu1  ;;  %v4798_v36 = vsel %vm645_vm3, %v4752_v40, 0.0  ;;  %v3033_v25 = vsel %vm747_vm8, %v3032_v30, %v3028_v22 }
 0x2b8   :  { %v3037_v61 = vrot.slane %v2961_v45, %v11871_v47  ;;  %4799 = vadd.xlane.f32.xlu0 %v4798_v36  ;;  %v9259_v26 = vpop.f32.mrb[160].mxu0  ;;  %v5111_v2 = vpop.f32.mrb[161].mxu1  ;;  %v4795_v52 = vsel %vm645_vm3, %v4751_v59, 0.0 }
 0x2b9   :  { %v5191_v1 = vmul.f32 %v9285_v28, %v9259_v26  ;;  %v2970_v50 = vpop.xlane.xlu0 %2969  ;;  %v4966_v38 = vpop.f32.mrb[161].mxu0 }
 0x2ba   :  { %v3038_v49 = vsel %vm754_vm9, %v3037_v61, %v3033_v25  ;;  %v5190_v21 = vmul.f32 %v5111_v2, %v4966_v38  ;;  %4796 = vadd.xlane.f32.xlu1 %v4795_v52  ;;  %v3052_v37 = vrot.slane %v2970_v50, %v11873_v32 }
 0x2bb   :  { %v2967_v16 = vpop.xlane.xlu1 %2966  ;;  %v9288_v12 = vpop.f32.mrb[162].mxu1  ;;  %v5209_v60 = vsel %vm645_vm3, %v5191_v1, 0.0  ;;  %v3043_v10 = vsel %vm761_vm10, %v3042_v6, %v3038_v49 }
 0x2bc   :  { %v3047_v5 = vrot.slane %v2967_v16, %v10811_v11  ;;  %5210 = vadd.xlane.f32.xlu0 %v5209_v60  ;;  %v9262_v4 = vpop.f32.mrb[162].mxu0  ;;  %v5121_v34 = vpop.f32.mrb[163].mxu1  ;;  %v5206_v27 = vsel %vm645_vm3, %v5190_v21, 0.0 }
 0x2bd   :  { %v5193_v8 = vmul.f32 %v9288_v12, %v9262_v4  ;;  %v2976_v54 = vpop.xlane.xlu0 %2975  ;;  %v4976_v15 = vpop.f32.mrb[163].mxu0 }
 0x2be   :  { %v3048_v9 = vsel %vm768_vm11, %v3047_v5, %v3043_v10  ;;  %v5192_v41 = vmul.f32 %v5121_v34, %v4976_v15  ;;  %5207 = vadd.xlane.f32.xlu1 %v5206_v27  ;;  %v3062_v17 = vrot.slane %v2976_v54, %v10848_v39 }
 0x2bf   :  { %v2973_v53 = vpop.xlane.xlu1 %2972  ;;  %v9291_v44 = vpop.f32.mrb[164].mxu1  ;;  %v5215_v14 = vsel %vm645_vm3, %v5193_v8, 0.0  ;;  %v3053_v13 = vsel %vm775_vm12, %v3052_v37, %v3048_v9 }
 0x2c0   :  { %v3057_v29 = vrot.slane %v2973_v53, %v11874_v42  ;;  %5216 = vadd.xlane.f32.xlu0 %v5215_v14  ;;  %v9265_v58 = vpop.f32.mrb[164].mxu0  ;;  %v5131_v46 = vpop.f32.mrb[165].mxu1  ;;  %v5212_v43 = vsel %vm645_vm3, %v5192_v41, 0.0 }
 0x2c1   :  { %v5195_v56 = vmul.f32 %v9291_v44, %v9265_v58  ;;  %v2982_v57 = vpop.xlane.xlu0 %2981  ;;  %v4986_v18 = vpop.f32.mrb[165].mxu0 }
 0x2c2   :  { %v3058_v33 = vsel %vm11885_vm13, %v3057_v29, %v3053_v13  ;;  %v5194_v20 = vmul.f32 %v5131_v46, %v4986_v18  ;;  %5213 = vadd.xlane.f32.xlu1 %v5212_v43  ;;  %v3072_v25 = vrot.slane %v2982_v57, %v10880_v55 }
 0x2c3   :  { %v2979_v40 = vpop.xlane.xlu1 %2978  ;;  %v9294_v62 = vpop.f32.mrb[166].mxu1  ;;  %v5221_v23 = vsel %vm645_vm3, %v5195_v56, 0.0  ;;  %v3063_v28 = vsel %vm789_vm14, %v3062_v17, %v3058_v33 }
 0x2c4   :  { %v3067_v22 = vrot.slane %v2979_v40, %v10859_v51  ;;  %5222 = vadd.xlane.f32.xlu0 %v5221_v23  ;;  %v9268_v59 = vpop.f32.mrb[166].mxu0  ;;  %v5141_v30 = vpop.f32.mrb[167].mxu1  ;;  %v5218_v45 = vsel %vm645_vm3, %v5194_v20, 0.0 }
 0x2c5   :  { %v5197_v36 = vmul.f32 %v9294_v62, %v9268_v59  ;;  %v2988_v61 = vpop.xlane.xlu0 %2987  ;;  %v4996_v26 = vpop.f32.mrb[167].mxu0 }
 0x2c6   :  { %v3068_v2 = vsel %vm11886_vm0, %v3067_v22, %v3063_v28  ;;  %v5196_v52 = vmul.f32 %v5141_v30, %v4996_v26  ;;  %5219 = vadd.xlane.f32.xlu1 %v5218_v45  ;;  %v3082_v12 = vrot.slane %v2988_v61, %v10893_v24 }
 0x2c7   :  { %v2985_v1 = vpop.xlane.xlu1 %2984  ;;  %v5227_v50 = vsel %vm645_vm3, %v5197_v36, 0.0  ;;  %v9271_v38 = vpop.f32.mrb[168].mxu0  ;;  %v3073_v60 = vsel %vm803_vm1, %v3072_v25, %v3068_v2 }
 0x2c8   :  { %v3077_v49 = vrot.slane %v2985_v1, %v10887_v3  ;;  %v9297_v21 = vpop.f32.mrb[168].mxu1  ;;  %5228 = vadd.xlane.f32.xlu0 %v5227_v50  ;;  %v5006_v6 = vpop.f32.mrb[169].mxu0  ;;  %v5224_v16 = vsel %vm645_vm3, %v5196_v52, 0.0 }
 0x2c9   :  { %v5199_v5 = vmul.f32 %v9297_v21, %v9271_v38  ;;  %v5151_v4 = vpop.f32.mrb[169].mxu1  ;;  %v3399_v34 = vpop.xlane.xlu0 %3398 }
 0x2ca   :  { %v3078_v27 = vsel %vm810_vm2, %v3077_v49, %v3073_v60  ;;  %v5198_v10 = vmul.f32 %v5151_v4, %v5006_v6  ;;  %5225 = vadd.xlane.f32.xlu1 %v5224_v16  ;;  %v3465_v44 = vrot.slane %v3399_v34, %v10724_v63 }
 0x2cb   :  { %v3083_v8 = vsel %vm817_vm15, %v3082_v12, %v3078_v27  ;;  %v3396_v54 = vpop.xlane.xlu1 %3395  ;;  %v5233_v15 = vsel %vm645_vm3, %v5199_v5, 0.0  ;;  %v9274_v9 = vpop.f32.mrb[170].mxu0 }
 0x2cc   :  { %3085 = vst [vmem:[#allocation2 + $0x5] sm:$0x1] %v3083_v8  ;;  %v9300_v41 = vpop.f32.mrb[170].mxu1  ;;  %5234 = vadd.xlane.f32.xlu0 %v5233_v15  ;;  %v5016_v37 = vpop.f32.mrb[171].mxu0  ;;  %v5230_v53 = vsel %vm645_vm3, %v5198_v10, 0.0  ;;  %v3461_v14 = vrot.slane %v3396_v54, %v10728_v0 }
 0x2cd   :  { %v5201_v29 = vmul.f32 %v9300_v41, %v9274_v9  ;;  %v5161_v58 = vpop.f32.mrb[171].mxu1  ;;  %v3405_v46 = vpop.xlane.xlu0 %3404 }
 0x2ce   :  { %v5200_v43 = vmul.f32 %v5161_v58, %v5016_v37  ;;  %5231 = vadd.xlane.f32.xlu1 %v5230_v53  ;;  %v3466_v40 = vsel %vm719_vm4, %v3465_v44, %v3461_v14  ;;  %v3475_v45 = vrot.slane %v3405_v46, %v10760_v48 }
 0x2cf   :  { %v3402_v13 = vpop.xlane.xlu1 %3401  ;;  %v5239_v56 = vsel %vm645_vm3, %v5201_v29, 0.0  ;;  %v9277_v57 = vpop.f32.mrb[172].mxu0 }
 0x2d0   :  { %v3470_v18 = vrot.slane %v3402_v13, %v10740_v19  ;;  %v9303_v33 = vpop.f32.mrb[172].mxu1  ;;  %5240 = vadd.xlane.f32.xlu0 %v5239_v56  ;;  %v5026_v20 = vpop.f32.mrb[173].mxu0  ;;  %v5236_v17 = vsel %vm645_vm3, %v5200_v43, 0.0 }
 0x2d1   :  { %v5203_v62 = vmul.f32 %v9303_v33, %v9277_v57  ;;  %v5171_v23 = vpop.f32.mrb[173].mxu1  ;;  %v3411_v22 = vpop.xlane.xlu0 %3410 }
 0x2d2   :  { %v3471_v59 = vsel %vm726_vm5, %v3470_v18, %v3466_v40  ;;  %v5202_v30 = vmul.f32 %v5171_v23, %v5026_v20  ;;  %5237 = vadd.xlane.f32.xlu1 %v5236_v17  ;;  %v3485_v16 = vrot.slane %v3411_v22, %v11870_v31 }
 0x2d3   :  { %v3408_v28 = vpop.xlane.xlu1 %3407  ;;  %v5245_v36 = vsel %vm645_vm3, %v5203_v62, 0.0  ;;  %v9280_v61 = vpop.f32.mrb[174].mxu0  ;;  %v3476_v1 = vsel %vm733_vm6, %v3475_v45, %v3471_v59 }
 0x2d4   :  { %v3480_v26 = vrot.slane %v3408_v28, %v10765_v35  ;;  %v9306_v2 = vpop.f32.mrb[174].mxu1  ;;  %5246 = vadd.xlane.f32.xlu0 %v5245_v36  ;;  %v5036_v52 = vpop.f32.mrb[175].mxu0  ;;  %v5242_v25 = vsel %vm645_vm3, %v5202_v30, 0.0 }
 0x2d5   :  { %v5205_v50 = vmul.f32 %v9306_v2, %v9280_v61  ;;  %v5181_v38 = vpop.f32.mrb[175].mxu1  ;;  %v3417_v49 = vpop.xlane.xlu0 %3416 }
 0x2d6   :  { %v3481_v21 = vsel %vm740_vm7, %v3480_v26, %v3476_v1  ;;  %v5204_v6 = vmul.f32 %v5181_v38, %v5036_v52  ;;  %5243 = vadd.xlane.f32.xlu1 %v5242_v25  ;;  %v3495_v53 = vrot.slane %v3417_v49, %v10803_v7 }
 0x2d7   :  { %v3414_v12 = vpop.xlane.xlu1 %3413  ;;  %v5251_v60 = vsel %vm645_vm3, %v5205_v50, 0.0  ;;  %v9311_v5 = vpop.f32.mrb[176].mxu0  ;;  %v3486_v8 = vsel %vm747_vm8, %v3485_v16, %v3481_v21 }
 0x2d8   :  { %v3490_v4 = vrot.slane %v3414_v12, %v11871_v47  ;;  %v9337_v34 = vpop.f32.mrb[176].mxu1  ;;  %5252 = vadd.xlane.f32.xlu0 %v5251_v60  ;;  %v5419_v27 = vpop.f32.mrb[177].mxu0  ;;  %v5248_v10 = vsel %vm645_vm3, %v5204_v6, 0.0 }
 0x2d9   :  { %v5644_v54 = vmul.f32 %v9337_v34, %v9311_v5  ;;  %v5564_v15 = vpop.f32.mrb[177].mxu1  ;;  %v3423_v9 = vpop.xlane.xlu0 %3422 }
 0x2da   :  { %v3491_v41 = vsel %vm754_vm9, %v3490_v4, %v3486_v8  ;;  %v5643_v37 = vmul.f32 %v5564_v15, %v5419_v27  ;;  %5249 = vadd.xlane.f32.xlu1 %v5248_v10  ;;  %v3505_v40 = vrot.slane %v3423_v9, %v11873_v32 }
 0x2db   :  { %v3420_v44 = vpop.xlane.xlu1 %3419  ;;  %v5662_v14 = vsel %vm645_vm3, %v5644_v54, 0.0  ;;  %v9314_v29 = vpop.f32.mrb[178].mxu0  ;;  %v3496_v56 = vsel %vm761_vm10, %v3495_v53, %v3491_v41 }
 0x2dc   :  { %v3500_v58 = vrot.slane %v3420_v44, %v10811_v11  ;;  %v9340_v46 = vpop.f32.mrb[178].mxu1  ;;  %5663 = vadd.xlane.f32.xlu0 %v5662_v14  ;;  %v5429_v43 = vpop.f32.mrb[179].mxu0  ;;  %v5659_v13 = vsel %vm645_vm3, %v5643_v37, 0.0 }
 0x2dd   :  { %v5646_v57 = vmul.f32 %v9340_v46, %v9314_v29  ;;  %v5574_v18 = vpop.f32.mrb[179].mxu1  ;;  %v3429_v33 = vpop.xlane.xlu0 %3428 }
 0x2de   :  { %v3501_v20 = vsel %vm768_vm11, %v3500_v58, %v3496_v56  ;;  %v5645_v17 = vmul.f32 %v5574_v18, %v5429_v43  ;;  %5660 = vadd.xlane.f32.xlu1 %v5659_v13  ;;  %v3515_v1 = vrot.slane %v3429_v33, %v10848_v39 }
 0x2df   :  { %v3426_v62 = vpop.xlane.xlu1 %3425  ;;  %v5668_v23 = vsel %vm645_vm3, %v5646_v57, 0.0  ;;  %v9317_v22 = vpop.f32.mrb[180].mxu0  ;;  %v3506_v36 = vsel %vm775_vm12, %v3505_v40, %v3501_v20 }
 0x2e0   :  { %v3510_v59 = vrot.slane %v3426_v62, %v11874_v42  ;;  %v9343_v30 = vpop.f32.mrb[180].mxu1  ;;  %5669 = vadd.xlane.f32.xlu0 %v5668_v23  ;;  %v5439_v45 = vpop.f32.mrb[181].mxu0  ;;  %v5665_v28 = vsel %vm645_vm3, %v5645_v17, 0.0 }
 0x2e1   :  { %v5648_v61 = vmul.f32 %v9343_v30, %v9317_v22  ;;  %v5584_v26 = vpop.f32.mrb[181].mxu1  ;;  %v3435_v2 = vpop.xlane.xlu0 %3434 }
 0x2e2   :  { %v3511_v52 = vsel %vm11885_vm13, %v3510_v59, %v3506_v36  ;;  %v5647_v25 = vmul.f32 %v5584_v26, %v5439_v45  ;;  %5666 = vadd.xlane.f32.xlu1 %v5665_v28  ;;  %v3525_v8 = vrot.slane %v3435_v2, %v10880_v55 }
 0x2e3   :  { %v3432_v50 = vpop.xlane.xlu1 %3431  ;;  %v5674_v38 = vsel %vm645_vm3, %v5648_v61, 0.0  ;;  %v9320_v49 = vpop.f32.mrb[182].mxu0  ;;  %v3516_v60 = vsel %vm789_vm14, %v3515_v1, %v3511_v52 }
 0x2e4   :  { %v3520_v21 = vrot.slane %v3432_v50, %v10859_v51  ;;  %v9346_v6 = vpop.f32.mrb[182].mxu1  ;;  %5675 = vadd.xlane.f32.xlu0 %v5674_v38  ;;  %v5449_v16 = vpop.f32.mrb[183].mxu0  ;;  %v5671_v12 = vsel %vm645_vm3, %v5647_v25, 0.0 }
 0x2e5   :  { %v5650_v5 = vmul.f32 %v9346_v6, %v9320_v49  ;;  %v5594_v4 = vpop.f32.mrb[183].mxu1  ;;  %v3441_v34 = vpop.xlane.xlu0 %3440 }
 0x2e6   :  { %v3521_v27 = vsel %vm11886_vm0, %v3520_v21, %v3516_v60  ;;  %v5649_v10 = vmul.f32 %v5594_v4, %v5449_v16  ;;  %5672 = vadd.xlane.f32.xlu1 %v5671_v12  ;;  %v3535_v14 = vrot.slane %v3441_v34, %v10893_v24 }
 0x2e7   :  { %v3438_v54 = vpop.xlane.xlu1 %3437  ;;  %v5680_v15 = vsel %vm645_vm3, %v5650_v5, 0.0  ;;  %v9323_v9 = vpop.f32.mrb[184].mxu0  ;;  %v3526_v29 = vsel %vm803_vm1, %v3525_v8, %v3521_v27 }
 0x2e8   :  { %v3530_v41 = vrot.slane %v3438_v54, %v10887_v3  ;;  %v9349_v37 = vpop.f32.mrb[184].mxu1  ;;  %5681 = vadd.xlane.f32.xlu0 %v5680_v15  ;;  %v5459_v53 = vpop.f32.mrb[185].mxu0  ;;  %v5677_v44 = vsel %vm645_vm3, %v5649_v10, 0.0 }
 0x2e9   :  { %v5652_v58 = vmul.f32 %v9349_v37, %v9323_v9  ;;  %v5604_v46 = vpop.f32.mrb[185].mxu1  ;;  %v3852_v43 = vpop.xlane.xlu0 %3851 }
 0x2ea   :  { %v3531_v13 = vsel %vm810_vm2, %v3530_v41, %v3526_v29  ;;  %v5651_v56 = vmul.f32 %v5604_v46, %v5459_v53  ;;  %5678 = vadd.xlane.f32.xlu1 %v5677_v44  ;;  %v3918_v23 = vrot.slane %v3852_v43, %v10724_v63 }
 0x2eb   :  { %v3536_v57 = vsel %vm817_vm15, %v3535_v14, %v3531_v13  ;;  %v3849_v18 = vpop.xlane.xlu1 %3848  ;;  %v5686_v33 = vsel %vm645_vm3, %v5652_v58, 0.0  ;;  %v9326_v20 = vpop.f32.mrb[186].mxu0 }
 0x2ec   :  { %3538 = vst [vmem:[#allocation2 + $0x6] sm:$0x1] %v3536_v57  ;;  %v9352_v17 = vpop.f32.mrb[186].mxu1  ;;  %5687 = vadd.xlane.f32.xlu0 %v5686_v33  ;;  %v5469_v40 = vpop.f32.mrb[187].mxu0  ;;  %v5683_v62 = vsel %vm645_vm3, %v5651_v56, 0.0  ;;  %v3914_v22 = vrot.slane %v3849_v18, %v10728_v0 }
 0x2ed   :  { %v5654_v59 = vmul.f32 %v9352_v17, %v9326_v20  ;;  %v5614_v30 = vpop.f32.mrb[187].mxu1  ;;  %v3858_v45 = vpop.xlane.xlu0 %3857 }
 0x2ee   :  { %v5653_v28 = vmul.f32 %v5614_v30, %v5469_v40  ;;  %5684 = vadd.xlane.f32.xlu1 %v5683_v62  ;;  %v3919_v50 = vsel %vm719_vm4, %v3918_v23, %v3914_v22  ;;  %v3928_v12 = vrot.slane %v3858_v45, %v10760_v48 }
 0x2ef   :  { %v3855_v36 = vpop.xlane.xlu1 %3854  ;;  %v5692_v61 = vsel %vm645_vm3, %v5654_v59, 0.0  ;;  %v9329_v26 = vpop.f32.mrb[188].mxu0 }
 0x2f0   :  { %v3923_v2 = vrot.slane %v3855_v36, %v10740_v19  ;;  %v9355_v52 = vpop.f32.mrb[188].mxu1  ;;  %5693 = vadd.xlane.f32.xlu0 %v5692_v61  ;;  %v5479_v25 = vpop.f32.mrb[189].mxu0  ;;  %v5689_v1 = vsel %vm645_vm3, %v5653_v28, 0.0 }
 0x2f1   :  { %v5656_v38 = vmul.f32 %v9355_v52, %v9329_v26  ;;  %v5624_v49 = vpop.f32.mrb[189].mxu1  ;;  %v3864_v21 = vpop.xlane.xlu0 %3863 }
 0x2f2   :  { %v3924_v6 = vsel %vm726_vm5, %v3923_v2, %v3919_v50  ;;  %v5655_v16 = vmul.f32 %v5624_v49, %v5479_v25  ;;  %5690 = vadd.xlane.f32.xlu1 %v5689_v1  ;;  %v3938_v44 = vrot.slane %v3864_v21, %v11870_v31 }
 0x2f3   :  { %v3861_v60 = vpop.xlane.xlu1 %3860  ;;  %v5698_v5 = vsel %vm645_vm3, %v5656_v38, 0.0  ;;  %v9332_v4 = vpop.f32.mrb[190].mxu0  ;;  %v3929_v54 = vsel %vm733_vm6, %v3928_v12, %v3924_v6 }
 0x2f4   :  { %v3933_v34 = vrot.slane %v3861_v60, %v10765_v35  ;;  %v9358_v27 = vpop.f32.mrb[190].mxu1  ;;  %5699 = vadd.xlane.f32.xlu0 %v5698_v5  ;;  %v5489_v10 = vpop.f32.mrb[191].mxu0  ;;  %v5695_v8 = vsel %vm645_vm3, %v5655_v16, 0.0 }
 0x2f5   :  { %v5658_v15 = vmul.f32 %v9358_v27, %v9332_v4  ;;  %v5634_v9 = vpop.f32.mrb[191].mxu1  ;;  %v3870_v41 = vpop.xlane.xlu0 %3869 }
 0x2f6   :  { %v3934_v37 = vsel %vm740_vm7, %v3933_v34, %v3929_v54  ;;  %v5657_v53 = vmul.f32 %v5634_v9, %v5489_v10  ;;  %5696 = vadd.xlane.f32.xlu1 %v5695_v8  ;;  %v3948_v62 = vrot.slane %v3870_v41, %v10803_v7 }
 0x2f7   :  { %v3867_v14 = vpop.xlane.xlu1 %3866  ;;  %v5704_v29 = vsel %vm645_vm3, %v5658_v15, 0.0  ;;  %v9363_v58 = vpop.f32.mrb[192].mxu0  ;;  %v3939_v57 = vsel %vm747_vm8, %v3938_v44, %v3934_v37 }
 0x2f8   :  { %v3943_v46 = vrot.slane %v3867_v14, %v11871_v47  ;;  %v9389_v43 = vpop.f32.mrb[192].mxu1  ;;  %5705 = vadd.xlane.f32.xlu0 %v5704_v29  ;;  %v5872_v13 = vpop.f32.mrb[193].mxu0  ;;  %v5701_v56 = vsel %vm645_vm3, %v5657_v53, 0.0 }
 0x2f9   :  { %v6097_v18 = vmul.f32 %v9389_v43, %v9363_v58  ;;  %v6017_v33 = vpop.f32.mrb[193].mxu1  ;;  %v3876_v20 = vpop.xlane.xlu0 %3875 }
 0x2fa   :  { %v3944_v17 = vsel %vm754_vm9, %v3943_v46, %v3939_v57  ;;  %v6096_v40 = vmul.f32 %v6017_v33, %v5872_v13  ;;  %5702 = vadd.xlane.f32.xlu1 %v5701_v56  ;;  %v3958_v50 = vrot.slane %v3876_v20, %v11873_v32 }
 0x2fb   :  { %v3873_v23 = vpop.xlane.xlu1 %3872  ;;  %v6115_v22 = vsel %vm645_vm3, %v6097_v18, 0.0  ;;  %v9366_v59 = vpop.f32.mrb[194].mxu0  ;;  %v3949_v61 = vsel %vm761_vm10, %v3948_v62, %v3944_v17 }
 0x2fc   :  { %v3953_v30 = vrot.slane %v3873_v23, %v10811_v11  ;;  %v9392_v45 = vpop.f32.mrb[194].mxu1  ;;  %6116 = vadd.xlane.f32.xlu0 %v6115_v22  ;;  %v5882_v28 = vpop.f32.mrb[195].mxu0  ;;  %v6112_v36 = vsel %vm645_vm3, %v6096_v40, 0.0 }
 0x2fd   :  { %v6099_v26 = vmul.f32 %v9392_v45, %v9366_v59  ;;  %v6027_v2 = vpop.f32.mrb[195].mxu1  ;;  %v3882_v52 = vpop.xlane.xlu0 %3881 }
 0x2fe   :  { %v3954_v25 = vsel %vm768_vm11, %v3953_v30, %v3949_v61  ;;  %v6098_v1 = vmul.f32 %v6027_v2, %v5882_v28  ;;  %6113 = vadd.xlane.f32.xlu1 %v6112_v36  ;;  %v3968_v54 = vrot.slane %v3882_v52, %v10848_v39 }
 0x2ff   :  { %v3879_v38 = vpop.xlane.xlu1 %3878  ;;  %v6121_v49 = vsel %vm645_vm3, %v6099_v26, 0.0  ;;  %v9369_v21 = vpop.f32.mrb[196].mxu0  ;;  %v3959_v5 = vsel %vm775_vm12, %v3958_v50, %v3954_v25 }
 0x300   :  { %v3963_v6 = vrot.slane %v3879_v38, %v11874_v42  ;;  %v9395_v16 = vpop.f32.mrb[196].mxu1  ;;  %6122 = vadd.xlane.f32.xlu0 %v6121_v49  ;;  %v5892_v12 = vpop.f32.mrb[197].mxu0  ;;  %v6118_v60 = vsel %vm645_vm3, %v6098_v1, 0.0 }
 0x301   :  { %v6101_v4 = vmul.f32 %v9395_v16, %v9369_v21  ;;  %v6037_v34 = vpop.f32.mrb[197].mxu1  ;;  %v3888_v27 = vpop.xlane.xlu0 %3887 }
 0x302   :  { %v3964_v10 = vsel %vm11885_vm13, %v3963_v6, %v3959_v5  ;;  %v6100_v8 = vmul.f32 %v6037_v34, %v5892_v12  ;;  %6119 = vadd.xlane.f32.xlu1 %v6118_v60  ;;  %v3978_v57 = vrot.slane %v3888_v27, %v10880_v55 }
 0x303   :  { %v3885_v15 = vpop.xlane.xlu1 %3884  ;;  %v6127_v9 = vsel %vm645_vm3, %v6101_v4, 0.0  ;;  %v9372_v41 = vpop.f32.mrb[198].mxu0  ;;  %v3969_v29 = vsel %vm789_vm14, %v3968_v54, %v3964_v10 }
 0x304   :  { %v3973_v37 = vrot.slane %v3885_v15, %v10859_v51  ;;  %v9398_v53 = vpop.f32.mrb[198].mxu1  ;;  %6128 = vadd.xlane.f32.xlu0 %v6127_v9  ;;  %v5902_v44 = vpop.f32.mrb[199].mxu0  ;;  %v6124_v14 = vsel %vm645_vm3, %v6100_v8, 0.0 }
 0x305   :  { %v6103_v58 = vmul.f32 %v9398_v53, %v9372_v41  ;;  %v6047_v46 = vpop.f32.mrb[199].mxu1  ;;  %v3894_v43 = vpop.xlane.xlu0 %3893 }
 0x306   :  { %v3974_v13 = vsel %vm11886_vm0, %v3973_v37, %v3969_v29  ;;  %v6102_v56 = vmul.f32 %v6047_v46, %v5902_v44  ;;  %6125 = vadd.xlane.f32.xlu1 %v6124_v14  ;;  %v3988_v22 = vrot.slane %v3894_v43, %v10893_v24 }
 0x307   :  { %v3891_v18 = vpop.xlane.xlu1 %3890  ;;  %v6133_v33 = vsel %vm645_vm3, %v6103_v58, 0.0  ;;  %v9375_v20 = vpop.f32.mrb[200].mxu0  ;;  %v3979_v59 = vsel %vm803_vm1, %v3978_v57, %v3974_v13 }
 0x308   :  { %v3983_v17 = vrot.slane %v3891_v18, %v10887_v3  ;;  %v9401_v40 = vpop.f32.mrb[200].mxu1  ;;  %6134 = vadd.xlane.f32.xlu0 %v6133_v33  ;;  %v5912_v62 = vpop.f32.mrb[201].mxu0  ;;  %v6130_v23 = vsel %vm645_vm3, %v6102_v56, 0.0 }
 0x309   :  { %v6105_v30 = vmul.f32 %v9401_v40, %v9375_v20  ;;  %v6057_v45 = vpop.f32.mrb[201].mxu1  ;;  %v4305_v28 = vpop.xlane.xlu0 %4304 }
 0x30a   :  { %v3984_v36 = vsel %vm810_vm2, %v3983_v17, %v3979_v59  ;;  %v6104_v61 = vmul.f32 %v6057_v45, %v5912_v62  ;;  %6131 = vadd.xlane.f32.xlu1 %v6130_v23  ;;  %v4371_v49 = vrot.slane %v4305_v28, %v10724_v63 }
 0x30b   :  { %v3989_v26 = vsel %vm817_vm15, %v3988_v22, %v3984_v36  ;;  %v4302_v2 = vpop.xlane.xlu1 %4301  ;;  %v6139_v52 = vsel %vm645_vm3, %v6105_v30, 0.0  ;;  %v9378_v25 = vpop.f32.mrb[202].mxu0 }
 0x30c   :  { %3991 = vst [vmem:[#allocation2 + $0x7] sm:$0x1] %v3989_v26  ;;  %v9404_v1 = vpop.f32.mrb[202].mxu1  ;;  %6140 = vadd.xlane.f32.xlu0 %v6139_v52  ;;  %v5922_v50 = vpop.f32.mrb[203].mxu0  ;;  %v6136_v38 = vsel %vm645_vm3, %v6104_v61, 0.0  ;;  %v4367_v21 = vrot.slane %v4302_v2, %v10728_v0 }
 0x30d   :  { %v6107_v6 = vmul.f32 %v9404_v1, %v9378_v25  ;;  %v6067_v16 = vpop.f32.mrb[203].mxu1  ;;  %v4311_v12 = vpop.xlane.xlu0 %4310 }
 0x30e   :  { %v6106_v60 = vmul.f32 %v6067_v16, %v5922_v50  ;;  %6137 = vadd.xlane.f32.xlu1 %v6136_v38  ;;  %v4372_v15 = vsel %vm719_vm4, %v4371_v49, %v4367_v21  ;;  %v4381_v14 = vrot.slane %v4311_v12, %v10760_v48 }
 0x30f   :  { %v4308_v5 = vpop.xlane.xlu1 %4307  ;;  %v6145_v4 = vsel %vm645_vm3, %v6107_v6, 0.0  ;;  %v9381_v34 = vpop.f32.mrb[204].mxu0 }
 0x310   :  { %v4376_v27 = vrot.slane %v4308_v5, %v10740_v19  ;;  %v9407_v10 = vpop.f32.mrb[204].mxu1  ;;  %6146 = vadd.xlane.f32.xlu0 %v6145_v4  ;;  %v5932_v8 = vpop.f32.mrb[205].mxu0  ;;  %v6142_v54 = vsel %vm645_vm3, %v6106_v60, 0.0 }
 0x311   :  { %v6109_v9 = vmul.f32 %v9407_v10, %v9381_v34  ;;  %v6077_v41 = vpop.f32.mrb[205].mxu1  ;;  %v4317_v37 = vpop.xlane.xlu0 %4316 }
 0x312   :  { %v4377_v53 = vsel %vm726_vm5, %v4376_v27, %v4372_v15  ;;  %v6108_v44 = vmul.f32 %v6077_v41, %v5932_v8  ;;  %6143 = vadd.xlane.f32.xlu1 %v6142_v54  ;;  %v4391_v23 = vrot.slane %v4317_v37, %v11870_v31 }
 0x313   :  { %v4314_v29 = vpop.xlane.xlu1 %4313  ;;  %v6151_v58 = vsel %vm645_vm3, %v6109_v9, 0.0  ;;  %v9384_v46 = vpop.f32.mrb[206].mxu0  ;;  %v4382_v18 = vsel %vm733_vm6, %v4381_v14, %v4377_v53 }
 0x314   :  { %v4386_v43 = vrot.slane %v4314_v29, %v10765_v35  ;;  %v9410_v13 = vpop.f32.mrb[206].mxu1  ;;  %6152 = vadd.xlane.f32.xlu0 %v6151_v58  ;;  %v5942_v56 = vpop.f32.mrb[207].mxu0  ;;  %v6148_v57 = vsel %vm645_vm3, %v6108_v44, 0.0 }
 0x315   :  { %v6111_v33 = vmul.f32 %v9410_v13, %v9384_v46  ;;  %v6087_v20 = vpop.f32.mrb[207].mxu1  ;;  %v4323_v17 = vpop.xlane.xlu0 %4322 }
 0x316   :  { %v4387_v40 = vsel %vm740_vm7, %v4386_v43, %v4382_v18  ;;  %v6110_v62 = vmul.f32 %v6087_v20, %v5942_v56  ;;  %6149 = vadd.xlane.f32.xlu1 %v6148_v57  ;;  %v4401_v38 = vrot.slane %v4323_v17, %v10803_v7 }
 0x317   :  { %v4320_v22 = vpop.xlane.xlu1 %4319  ;;  %v6157_v59 = vsel %vm645_vm3, %v6111_v33, 0.0  ;;  %v9415_v30 = vpop.f32.mrb[208].mxu0  ;;  %v4392_v26 = vsel %vm747_vm8, %v4391_v23, %v4387_v40 }
 0x318   :  { %v4396_v45 = vrot.slane %v4320_v22, %v11871_v47  ;;  %v9441_v28 = vpop.f32.mrb[208].mxu1  ;;  %6158 = vadd.xlane.f32.xlu0 %v6157_v59  ;;  %v6325_v36 = vpop.f32.mrb[209].mxu0  ;;  %v6154_v61 = vsel %vm645_vm3, %v6110_v62, 0.0 }
 0x319   :  { %v6550_v2 = vmul.f32 %v9441_v28, %v9415_v30  ;;  %v6470_v52 = vpop.f32.mrb[209].mxu1  ;;  %v4329_v25 = vpop.xlane.xlu0 %4328 }
 0x31a   :  { %v4397_v1 = vsel %vm754_vm9, %v4396_v45, %v4392_v26  ;;  %v6549_v50 = vmul.f32 %v6470_v52, %v6325_v36  ;;  %6155 = vadd.xlane.f32.xlu1 %v6154_v61  ;;  %v4411_v15 = vrot.slane %v4329_v25, %v11873_v32 }
 0x31b   :  { %v4326_v49 = vpop.xlane.xlu1 %4325  ;;  %v6568_v21 = vsel %vm645_vm3, %v6550_v2, 0.0  ;;  %v9418_v6 = vpop.f32.mrb[210].mxu0  ;;  %v4402_v4 = vsel %vm761_vm10, %v4401_v38, %v4397_v1 }
 0x31c   :  { %v4406_v16 = vrot.slane %v4326_v49, %v10811_v11  ;;  %v9444_v12 = vpop.f32.mrb[210].mxu1  ;;  %6569 = vadd.xlane.f32.xlu0 %v6568_v21  ;;  %v6335_v60 = vpop.f32.mrb[211].mxu0  ;;  %v6565_v5 = vsel %vm645_vm3, %v6549_v50, 0.0 }
 0x31d   :  { %v6552_v34 = vmul.f32 %v9444_v12, %v9418_v6  ;;  %v6480_v27 = vpop.f32.mrb[211].mxu1  ;;  %v4335_v10 = vpop.xlane.xlu0 %4334 }
 0x31e   :  { %v4407_v8 = vsel %vm768_vm11, %v4406_v16, %v4402_v4  ;;  %v6551_v54 = vmul.f32 %v6480_v27, %v6335_v60  ;;  %6566 = vadd.xlane.f32.xlu1 %v6565_v5  ;;  %v4421_v18 = vrot.slane %v4335_v10, %v10848_v39 }
 0x31f   :  { %v4332_v9 = vpop.xlane.xlu1 %4331  ;;  %v6574_v41 = vsel %vm645_vm3, %v6552_v34, 0.0  ;;  %v9421_v37 = vpop.f32.mrb[212].mxu0  ;;  %v4412_v58 = vsel %vm775_vm12, %v4411_v15, %v4407_v8 }
 0x320   :  { %v4416_v53 = vrot.slane %v4332_v9, %v11874_v42  ;;  %v9447_v44 = vpop.f32.mrb[212].mxu1  ;;  %6575 = vadd.xlane.f32.xlu0 %v6574_v41  ;;  %v6345_v14 = vpop.f32.mrb[213].mxu0  ;;  %v6571_v29 = vsel %vm645_vm3, %v6551_v54, 0.0 }
 0x321   :  { %v6554_v46 = vmul.f32 %v9447_v44, %v9421_v37  ;;  %v6490_v43 = vpop.f32.mrb[213].mxu1  ;;  %v4341_v13 = vpop.xlane.xlu0 %4340 }
 0x322   :  { %v4417_v56 = vsel %vm11885_vm13, %v4416_v53, %v4412_v58  ;;  %v6553_v57 = vmul.f32 %v6490_v43, %v6345_v14  ;;  %6572 = vadd.xlane.f32.xlu1 %v6571_v29  ;;  %v4431_v26 = vrot.slane %v4341_v13, %v10880_v55 }
 0x323   :  { %v4338_v33 = vpop.xlane.xlu1 %4337  ;;  %v6580_v20 = vsel %vm645_vm3, %v6554_v46, 0.0  ;;  %v9424_v17 = vpop.f32.mrb[214].mxu0  ;;  %v4422_v59 = vsel %vm789_vm14, %v4421_v18, %v4417_v56 }
 0x324   :  { %v4426_v40 = vrot.slane %v4338_v33, %v10859_v51  ;;  %v9450_v62 = vpop.f32.mrb[214].mxu1  ;;  %6581 = vadd.xlane.f32.xlu0 %v6580_v20  ;;  %v6355_v23 = vpop.f32.mrb[215].mxu0  ;;  %v6577_v22 = vsel %vm645_vm3, %v6553_v57, 0.0 }
 0x325   :  { %v6556_v30 = vmul.f32 %v9450_v62, %v9424_v17  ;;  %v6500_v45 = vpop.f32.mrb[215].mxu1  ;;  %v4347_v28 = vpop.xlane.xlu0 %4346 }
 0x326   :  { %v4427_v36 = vsel %vm11886_vm0, %v4426_v40, %v4422_v59  ;;  %v6555_v61 = vmul.f32 %v6500_v45, %v6355_v23  ;;  %6578 = vadd.xlane.f32.xlu1 %v6577_v22  ;;  %v4441_v21 = vrot.slane %v4347_v28, %v10893_v24 }
 0x327   :  { %v4344_v2 = vpop.xlane.xlu1 %4343  ;;  %v6586_v52 = vsel %vm645_vm3, %v6556_v30, 0.0  ;;  %v9427_v25 = vpop.f32.mrb[216].mxu0  ;;  %v4432_v6 = vsel %vm803_vm1, %v4431_v26, %v4427_v36 }
 0x328   :  { %v4436_v1 = vrot.slane %v4344_v2, %v10887_v3  ;;  %v9453_v50 = vpop.f32.mrb[216].mxu1  ;;  %6587 = vadd.xlane.f32.xlu0 %v6586_v52  ;;  %v6365_v38 = vpop.f32.mrb[217].mxu0  ;;  %v6583_v49 = vsel %vm645_vm3, %v6555_v61, 0.0 }
 0x329   :  { %v6558_v16 = vmul.f32 %v9453_v50, %v9427_v25  ;;  %v6510_v12 = vpop.f32.mrb[217].mxu1  ;;  %v4758_v60 = vpop.xlane.xlu0 %4757 }
 0x32a   :  { %v4437_v5 = vsel %vm810_vm2, %v4436_v1, %v4432_v6  ;;  %v6557_v4 = vmul.f32 %v6510_v12, %v6365_v38  ;;  %6584 = vadd.xlane.f32.xlu1 %v6583_v49  ;;  %v4824_v41 = vrot.slane %v4758_v60, %v10724_v63 }
 0x32b   :  { %v4442_v34 = vsel %vm817_vm15, %v4441_v21, %v4437_v5  ;;  %v4755_v27 = vpop.xlane.xlu1 %4754  ;;  %v6592_v10 = vsel %vm645_vm3, %v6558_v16, 0.0  ;;  %v9430_v8 = vpop.f32.mrb[218].mxu0 }
 0x32c   :  { %4444 = vst [vmem:[#allocation2 + $0x8] sm:$0x1] %v4442_v34  ;;  %v9456_v54 = vpop.f32.mrb[218].mxu1  ;;  %6593 = vadd.xlane.f32.xlu0 %v6592_v10  ;;  %v6375_v15 = vpop.f32.mrb[219].mxu0  ;;  %v6589_v9 = vsel %vm645_vm3, %v6557_v4, 0.0  ;;  %v4820_v37 = vrot.slane %v4755_v27, %v10728_v0 }
 0x32d   :  { %v6560_v53 = vmul.f32 %v9456_v54, %v9430_v8  ;;  %v6520_v44 = vpop.f32.mrb[219].mxu1  ;;  %v4764_v14 = vpop.xlane.xlu0 %4763 }
 0x32e   :  { %v6559_v29 = vmul.f32 %v6520_v44, %v6375_v15  ;;  %6590 = vadd.xlane.f32.xlu1 %v6589_v9  ;;  %v4825_v33 = vsel %vm719_vm4, %v4824_v41, %v4820_v37  ;;  %v4834_v22 = vrot.slane %v4764_v14, %v10760_v48 }
 0x32f   :  { %v4761_v58 = vpop.xlane.xlu1 %4760  ;;  %v6598_v46 = vsel %vm645_vm3, %v6560_v53, 0.0  ;;  %v9433_v43 = vpop.f32.mrb[220].mxu0 }
 0x330   :  { %v4829_v13 = vrot.slane %v4761_v58, %v10740_v19  ;;  %v9459_v56 = vpop.f32.mrb[220].mxu1  ;;  %6599 = vadd.xlane.f32.xlu0 %v6598_v46  ;;  %v6385_v57 = vpop.f32.mrb[221].mxu0  ;;  %v6595_v18 = vsel %vm645_vm3, %v6559_v29, 0.0 }
 0x331   :  { %v6562_v20 = vmul.f32 %v9459_v56, %v9433_v43  ;;  %v6530_v17 = vpop.f32.mrb[221].mxu1  ;;  %v4770_v40 = vpop.xlane.xlu0 %4769 }
 0x332   :  { %v4830_v62 = vsel %vm726_vm5, %v4829_v13, %v4825_v33  ;;  %v6561_v23 = vmul.f32 %v6530_v17, %v6385_v57  ;;  %6596 = vadd.xlane.f32.xlu1 %v6595_v18  ;;  %v4844_v49 = vrot.slane %v4770_v40, %v11870_v31 }
 0x333   :  { %v4767_v59 = vpop.xlane.xlu1 %4766  ;;  %v6604_v30 = vsel %vm645_vm3, %v6562_v20, 0.0  ;;  %v9436_v45 = vpop.f32.mrb[222].mxu0  ;;  %v4835_v2 = vsel %vm733_vm6, %v4834_v22, %v4830_v62 }
 0x334   :  { %v4839_v28 = vrot.slane %v4767_v59, %v10765_v35  ;;  %v9462_v36 = vpop.f32.mrb[222].mxu1  ;;  %6605 = vadd.xlane.f32.xlu0 %v6604_v30  ;;  %v6395_v61 = vpop.f32.mrb[223].mxu0  ;;  %v6601_v26 = vsel %vm645_vm3, %v6561_v23, 0.0 }
 0x335   :  { %v6564_v52 = vmul.f32 %v9462_v36, %v9436_v45  ;;  %v6540_v25 = vpop.f32.mrb[223].mxu1  ;;  %v4776_v1 = vpop.xlane.xlu0 %4775 }
 0x336   :  { %v4840_v50 = vsel %vm740_vm7, %v4839_v28, %v4835_v2  ;;  %v6563_v38 = vmul.f32 %v6540_v25, %v6395_v61  ;;  %6602 = vadd.xlane.f32.xlu1 %v6601_v26  ;;  %v4854_v9 = vrot.slane %v4776_v1, %v10803_v7 }
 0x337   :  { %v4773_v21 = vpop.xlane.xlu1 %4772  ;;  %v6610_v6 = vsel %vm645_vm3, %v6564_v52, 0.0  ;;  %v9467_v16 = vpop.f32.mrb[224].mxu0  ;;  %v4845_v34 = vsel %vm747_vm8, %v4844_v49, %v4840_v50 }
 0x338   :  { %v4849_v12 = vrot.slane %v4773_v21, %v11871_v47  ;;  %v9493_v60 = vpop.f32.mrb[224].mxu1  ;;  %6611 = vadd.xlane.f32.xlu0 %v6610_v6  ;;  %v6778_v5 = vpop.f32.mrb[225].mxu0  ;;  %v6607_v4 = vsel %vm645_vm3, %v6563_v38, 0.0 }
 0x339   :  { %v7003_v27 = vmul.f32 %v9493_v60, %v9467_v16  ;;  %v6923_v10 = vpop.f32.mrb[225].mxu1  ;;  %v4782_v8 = vpop.xlane.xlu0 %4781 }
 0x33a   :  { %v4850_v54 = vsel %vm754_vm9, %v4849_v12, %v4845_v34  ;;  %v7002_v15 = vmul.f32 %v6923_v10, %v6778_v5  ;;  %6608 = vadd.xlane.f32.xlu1 %v6607_v4  ;;  %v4864_v33 = vrot.slane %v4782_v8, %v11873_v32 }
 0x33b   :  { %v4779_v41 = vpop.xlane.xlu1 %4778  ;;  %v9470_v37 = vpop.f32.mrb[226].mxu0  ;;  %v7021_v53 = vsel %vm645_vm3, %v7003_v27, 0.0  ;;  %v4855_v46 = vsel %vm761_vm10, %v4854_v9, %v4850_v54 }
 0x33c   :  { %v4859_v44 = vrot.slane %v4779_v41, %v10811_v11  ;;  %v9496_v14 = vpop.f32.mrb[226].mxu1  ;;  %v7018_v29 = vsel %vm645_vm3, %v7002_v15, 0.0  ;;  %v6788_v58 = vpop.f32.mrb[227].mxu0 }
 0x33d   :  { %v7005_v43 = vmul.f32 %v9496_v14, %v9470_v37  ;;  %v6933_v13 = vpop.f32.mrb[227].mxu1  ;;  %v4788_v56 = vpop.xlane.xlu0 %4787  ;;  %7019 = vadd.xlane.f32.xlu0 %v7018_v29 }
 0x33e   :  { %v4860_v57 = vsel %vm768_vm11, %v4859_v44, %v4855_v46  ;;  %v7004_v18 = vmul.f32 %v6933_v13, %v6788_v58  ;;  %7022 = vadd.xlane.f32.xlu1 %v7021_v53  ;;  %v4874_v2 = vrot.slane %v4788_v56, %v10848_v39 }
 0x33f   :  { %v4785_v20 = vpop.xlane.xlu1 %4784  ;;  %v9473_v17 = vpop.f32.mrb[228].mxu0  ;;  %v7027_v40 = vsel %vm645_vm3, %v7005_v43, 0.0  ;;  %v4865_v30 = vsel %vm775_vm12, %v4864_v33, %v4860_v57 }
 0x340   :  { %v4869_v62 = vrot.slane %v4785_v20, %v11874_v42  ;;  %v9499_v23 = vpop.f32.mrb[228].mxu1  ;;  %v7024_v22 = vsel %vm645_vm3, %v7004_v18, 0.0  ;;  %v6798_v59 = vpop.f32.mrb[229].mxu0 }
 0x341   :  { %v7007_v45 = vmul.f32 %v9499_v23, %v9473_v17  ;;  %v6943_v28 = vpop.f32.mrb[229].mxu1  ;;  %v4794_v36 = vpop.xlane.xlu0 %4793  ;;  %7025 = vadd.xlane.f32.xlu0 %v7024_v22 }
 0x342   :  { %v4870_v61 = vsel %vm11885_vm13, %v4869_v62, %v4865_v30  ;;  %v7006_v26 = vmul.f32 %v6943_v28, %v6798_v59  ;;  %7028 = vadd.xlane.f32.xlu1 %v7027_v40  ;;  %v4884_v34 = vrot.slane %v4794_v36, %v10880_v55 }
 0x343   :  { %v4791_v52 = vpop.xlane.xlu1 %4790  ;;  %v9476_v25 = vpop.f32.mrb[230].mxu0  ;;  %v7033_v1 = vsel %vm645_vm3, %v7007_v45, 0.0  ;;  %v4875_v6 = vsel %vm789_vm14, %v4874_v2, %v4870_v61 }
 0x344   :  { %v4879_v50 = vrot.slane %v4791_v52, %v10859_v51  ;;  %v9502_v38 = vpop.f32.mrb[230].mxu1  ;;  %v7030_v49 = vsel %vm645_vm3, %v7006_v26, 0.0  ;;  %v6808_v21 = vpop.f32.mrb[231].mxu0 }
 0x345   :  { %v7009_v16 = vmul.f32 %v9502_v38, %v9476_v25  ;;  %v6953_v12 = vpop.f32.mrb[231].mxu1  ;;  %v4800_v60 = vpop.xlane.xlu0 %4799  ;;  %7031 = vadd.xlane.f32.xlu0 %v7030_v49 }
 0x346   :  { %v4880_v5 = vsel %vm11886_vm0, %v4879_v50, %v4875_v6  ;;  %v7008_v4 = vmul.f32 %v6953_v12, %v6808_v21  ;;  %7034 = vadd.xlane.f32.xlu1 %v7033_v1  ;;  %v4894_v37 = vrot.slane %v4800_v60, %v10893_v24 }
 0x347   :  { %v4797_v27 = vpop.xlane.xlu1 %4796  ;;  %v9479_v10 = vpop.f32.mrb[232].mxu0  ;;  %v7039_v8 = vsel %vm645_vm3, %v7009_v16, 0.0  ;;  %v4885_v53 = vsel %vm803_vm1, %v4884_v34, %v4880_v5 }
 0x348   :  { %v4889_v54 = vrot.slane %v4797_v27, %v10887_v3  ;;  %v9505_v15 = vpop.f32.mrb[232].mxu1  ;;  %v7036_v9 = vsel %vm645_vm3, %v7008_v4, 0.0  ;;  %v6818_v41 = vpop.f32.mrb[233].mxu0 }
 0x349   :  { %v7011_v44 = vmul.f32 %v9505_v15, %v9479_v10  ;;  %v6963_v14 = vpop.f32.mrb[233].mxu1  ;;  %v5211_v29 = vpop.xlane.xlu0 %5210  ;;  %7037 = vadd.xlane.f32.xlu0 %v7036_v9 }
 0x34a   :  { %v4890_v58 = vsel %vm810_vm2, %v4889_v54, %v4885_v53  ;;  %v7010_v46 = vmul.f32 %v6963_v14, %v6818_v41  ;;  %7040 = vadd.xlane.f32.xlu1 %v7039_v8  ;;  %v5277_v17 = vrot.slane %v5211_v29, %v10724_v63 }
 0x34b   :  { %v4895_v43 = vsel %vm817_vm15, %v4894_v37, %v4890_v58  ;;  %v5208_v13 = vpop.xlane.xlu1 %5207  ;;  %v9482_v56 = vpop.f32.mrb[234].mxu0  ;;  %v7045_v57 = vsel %vm645_vm3, %v7011_v44, 0.0 }
 0x34c   :  { %4897 = vst [vmem:[#allocation2 + $0x9] sm:$0x1] %v4895_v43  ;;  %v9508_v18 = vpop.f32.mrb[234].mxu1  ;;  %v7042_v33 = vsel %vm645_vm3, %v7010_v46, 0.0  ;;  %v6828_v20 = vpop.f32.mrb[235].mxu0  ;;  %v5273_v40 = vrot.slane %v5208_v13, %v10728_v0 }
 0x34d   :  { %v7013_v62 = vmul.f32 %v9508_v18, %v9482_v56  ;;  %v6973_v23 = vpop.f32.mrb[235].mxu1  ;;  %v5217_v22 = vpop.xlane.xlu0 %5216  ;;  %7043 = vadd.xlane.f32.xlu0 %v7042_v33 }
 0x34e   :  { %v7012_v59 = vmul.f32 %v6973_v23, %v6828_v20  ;;  %7046 = vadd.xlane.f32.xlu1 %v7045_v57  ;;  %v5278_v52 = vsel %vm719_vm4, %v5277_v17, %v5273_v40  ;;  %v5287_v21 = vrot.slane %v5217_v22, %v10760_v48 }
 0x34f   :  { %v5214_v30 = vpop.xlane.xlu1 %5213  ;;  %v9485_v45 = vpop.f32.mrb[236].mxu0  ;;  %v7051_v28 = vsel %vm645_vm3, %v7013_v62, 0.0 }
 0x350   :  { %v5282_v36 = vrot.slane %v5214_v30, %v10740_v19  ;;  %v9511_v61 = vpop.f32.mrb[236].mxu1  ;;  %v7048_v26 = vsel %vm645_vm3, %v7012_v59, 0.0  ;;  %v6838_v2 = vpop.f32.mrb[237].mxu0 }
 0x351   :  { %v7015_v25 = vmul.f32 %v9511_v61, %v9485_v45  ;;  %v6983_v1 = vpop.f32.mrb[237].mxu1  ;;  %v5223_v50 = vpop.xlane.xlu0 %5222  ;;  %7049 = vadd.xlane.f32.xlu0 %v7048_v26 }
 0x352   :  { %v5283_v38 = vsel %vm726_vm5, %v5282_v36, %v5278_v52  ;;  %v7014_v49 = vmul.f32 %v6983_v1, %v6838_v2  ;;  %7052 = vadd.xlane.f32.xlu1 %v7051_v28  ;;  %v5297_v41 = vrot.slane %v5223_v50, %v11870_v31 }
 0x353   :  { %v5220_v6 = vpop.xlane.xlu1 %5219  ;;  %v9488_v16 = vpop.f32.mrb[238].mxu0  ;;  %v7057_v12 = vsel %vm645_vm3, %v7015_v25, 0.0  ;;  %v5288_v27 = vsel %vm733_vm6, %v5287_v21, %v5283_v38 }
 0x354   :  { %v5292_v60 = vrot.slane %v5220_v6, %v10765_v35  ;;  %v9514_v5 = vpop.f32.mrb[238].mxu1  ;;  %v7054_v4 = vsel %vm645_vm3, %v7014_v49, 0.0  ;;  %v6848_v34 = vpop.f32.mrb[239].mxu0 }
 0x355   :  { %v11611_v10 = vmul.f32 %v9514_v5, %v9488_v16  ;;  %v6993_v8 = vpop.f32.mrb[239].mxu1  ;;  %v5229_v54 = vpop.xlane.xlu0 %5228  ;;  %7055 = vadd.xlane.f32.xlu0 %v7054_v4 }
 0x356   :  { %v5293_v15 = vsel %vm740_vm7, %v5292_v60, %v5288_v27  ;;  %v7016_v9 = vmul.f32 %v6993_v8, %v6848_v34  ;;  %7058 = vadd.xlane.f32.xlu1 %v7057_v12  ;;  %v5307_v33 = vrot.slane %v5229_v54, %v10803_v7 }
 0x357   :  { %v5226_v37 = vpop.xlane.xlu1 %5225  ;;  %v9519_v53 = vpop.f32.mrb[240].mxu0  ;;  %v5298_v46 = vsel %vm747_vm8, %v5297_v41, %v5293_v15 }
 0x358   :  { %v5302_v44 = vrot.slane %v5226_v37, %v11871_v47  ;;  %v9545_v14 = vpop.f32.mrb[240].mxu1  ;;  %v7231_v29 = vpop.f32.mrb[241].mxu0  ;;  %v7060_v58 = vsel %vm645_vm3, %v7016_v9, 0.0 }
 0x359   :  { %v7456_v43 = vmul.f32 %v9545_v14, %v9519_v53  ;;  %v7376_v13 = vpop.f32.mrb[241].mxu1  ;;  %v5235_v56 = vpop.xlane.xlu0 %5234  ;;  %7061 = vadd.xlane.f32.xlu0 %v7060_v58 }
 0x35a   :  { %v5303_v57 = vsel %vm754_vm9, %v5302_v44, %v5298_v46  ;;  %v7455_v18 = vmul.f32 %v7376_v13, %v7231_v29  ;;  %v5317_v2 = vrot.slane %v5235_v56, %v11873_v32 }
 0x35b   :  { %v5232_v20 = vpop.xlane.xlu1 %5231  ;;  %v9522_v17 = vpop.f32.mrb[242].mxu0  ;;  %v7474_v40 = vsel %vm645_vm3, %v7456_v43, 0.0  ;;  %v5308_v30 = vsel %vm761_vm10, %v5307_v33, %v5303_v57 }
 0x35c   :  { %v5312_v62 = vrot.slane %v5232_v20, %v10811_v11  ;;  %v9548_v23 = vpop.f32.mrb[242].mxu1  ;;  %7475 = vadd.xlane.f32.xlu1 %v7474_v40  ;;  %v7241_v22 = vpop.f32.mrb[243].mxu0  ;;  %v7471_v59 = vsel %vm645_vm3, %v7455_v18, 0.0 }
 0x35d   :  { %v7458_v45 = vmul.f32 %v9548_v23, %v9522_v17  ;;  %v7386_v28 = vpop.f32.mrb[243].mxu1  ;;  %v5241_v36 = vpop.xlane.xlu0 %5240  ;;  %7472 = vadd.xlane.f32.xlu0 %v7471_v59 }
 0x35e   :  { %v5313_v61 = vsel %vm768_vm11, %v5312_v62, %v5308_v30  ;;  %v7457_v26 = vmul.f32 %v7386_v28, %v7241_v22  ;;  %v5327_v34 = vrot.slane %v5241_v36, %v10848_v39 }
 0x35f   :  { %v5238_v52 = vpop.xlane.xlu1 %5237  ;;  %v9525_v25 = vpop.f32.mrb[244].mxu0  ;;  %v7480_v1 = vsel %vm645_vm3, %v7458_v45, 0.0  ;;  %v5318_v6 = vsel %vm775_vm12, %v5317_v2, %v5313_v61 }
 0x360   :  { %v5322_v50 = vrot.slane %v5238_v52, %v11874_v42  ;;  %v9551_v38 = vpop.f32.mrb[244].mxu1  ;;  %v7251_v49 = vpop.f32.mrb[245].mxu0  ;;  %v7477_v21 = vsel %vm645_vm3, %v7457_v26, 0.0 }
 0x361   :  { %v7460_v16 = vmul.f32 %v9551_v38, %v9525_v25  ;;  %v7396_v12 = vpop.f32.mrb[245].mxu1  ;;  %v5247_v60 = vpop.xlane.xlu0 %5246  ;;  %7481 = vadd.xlane.f32.xlu0 %v7480_v1  ;;  %7478 = vadd.xlane.f32.xlu1 %v7477_v21 }
 0x362   :  { %v5323_v5 = vsel %vm11885_vm13, %v5322_v50, %v5318_v6  ;;  %v7459_v4 = vmul.f32 %v7396_v12, %v7251_v49  ;;  %v5337_v43 = vrot.slane %v5247_v60, %v10880_v55 }
 0x363   :  { %v5244_v27 = vpop.xlane.xlu1 %5243  ;;  %v9528_v8 = vpop.f32.mrb[246].mxu0  ;;  %v7486_v54 = vsel %vm645_vm3, %v7460_v16, 0.0  ;;  %v5328_v53 = vsel %vm789_vm14, %v5327_v34, %v5323_v5 }
 0x364   :  { %v5332_v15 = vrot.slane %v5244_v27, %v10859_v51  ;;  %v9554_v9 = vpop.f32.mrb[246].mxu1  ;;  %v7261_v41 = vpop.f32.mrb[247].mxu0  ;;  %v7483_v37 = vsel %vm645_vm3, %v7459_v4, 0.0 }
 0x365   :  { %v7462_v44 = vmul.f32 %v9554_v9, %v9528_v8  ;;  %v7406_v14 = vpop.f32.mrb[247].mxu1  ;;  %v5253_v29 = vpop.xlane.xlu0 %5252  ;;  %7487 = vadd.xlane.f32.xlu0 %v7486_v54  ;;  %7484 = vadd.xlane.f32.xlu1 %v7483_v37 }
 0x366   :  { %v5333_v58 = vsel %vm11886_vm0, %v5332_v15, %v5328_v53  ;;  %v7461_v46 = vmul.f32 %v7406_v14, %v7261_v41  ;;  %v5347_v40 = vrot.slane %v5253_v29, %v10893_v24 }
 0x367   :  { %v5250_v13 = vpop.xlane.xlu1 %5249  ;;  %v9531_v56 = vpop.f32.mrb[248].mxu0  ;;  %v7492_v57 = vsel %vm645_vm3, %v7462_v44, 0.0  ;;  %v5338_v62 = vsel %vm803_vm1, %v5337_v43, %v5333_v58 }
 0x368   :  { %v5342_v18 = vrot.slane %v5250_v13, %v10887_v3  ;;  %v9557_v33 = vpop.f32.mrb[248].mxu1  ;;  %v7271_v20 = vpop.f32.mrb[249].mxu0  ;;  %v7489_v17 = vsel %vm645_vm3, %v7461_v46, 0.0 }
 0x369   :  { %v7464_v23 = vmul.f32 %v9557_v33, %v9531_v56  ;;  %v7416_v22 = vpop.f32.mrb[249].mxu1  ;;  %v5664_v59 = vpop.xlane.xlu0 %5663  ;;  %7493 = vadd.xlane.f32.xlu0 %v7492_v57  ;;  %7490 = vadd.xlane.f32.xlu1 %v7489_v17 }
 0x36a   :  { %v5343_v30 = vsel %vm810_vm2, %v5342_v18, %v5338_v62  ;;  %v7463_v45 = vmul.f32 %v7416_v22, %v7271_v20  ;;  %v5730_v1 = vrot.slane %v5664_v59, %v10724_v63 }
 0x36b   :  { %v5348_v28 = vsel %vm817_vm15, %v5347_v40, %v5343_v30  ;;  %v5661_v36 = vpop.xlane.xlu1 %5660  ;;  %v9534_v61 = vpop.f32.mrb[250].mxu0  ;;  %v7498_v26 = vsel %vm645_vm3, %v7464_v23, 0.0 }
 0x36c   :  { %5350 = vst [vmem:[#allocation2 + $0xa] sm:$0x1] %v5348_v28  ;;  %v9560_v2 = vpop.f32.mrb[250].mxu1  ;;  %v7281_v52 = vpop.f32.mrb[251].mxu0  ;;  %v7495_v25 = vsel %vm645_vm3, %v7463_v45, 0.0  ;;  %v5726_v50 = vrot.slane %v5661_v36, %v10728_v0 }
 0x36d   :  { %v7466_v38 = vmul.f32 %v9560_v2, %v9534_v61  ;;  %v7426_v49 = vpop.f32.mrb[251].mxu1  ;;  %v5670_v21 = vpop.xlane.xlu0 %5669  ;;  %7499 = vadd.xlane.f32.xlu0 %v7498_v26  ;;  %7496 = vadd.xlane.f32.xlu1 %v7495_v25  ;;  %v7063_v2 = vsel %vm645_vm3, %v11611_v10, 0.0 }
 0x36e   :  { %v7465_v6 = vmul.f32 %v7426_v49, %v7281_v52  ;;  %v5731_v8 = vsel %vm719_vm4, %v5730_v1, %v5726_v50  ;;  %v5740_v53 = vrot.slane %v5670_v21, %v10760_v48 }
 0x36f   :  { %v5667_v16 = vpop.xlane.xlu1 %5666  ;;  %v9537_v12 = vpop.f32.mrb[252].mxu0  ;;  %v7504_v60 = vsel %vm645_vm3, %v7466_v38, 0.0 }
 0x370   :  { %v5735_v5 = vrot.slane %v5667_v16, %v10740_v19  ;;  %v9563_v4 = vpop.f32.mrb[252].mxu1  ;;  %v7291_v34 = vpop.f32.mrb[253].mxu0  ;;  %v7501_v27 = vsel %vm645_vm3, %v7465_v6, 0.0 }
 0x371   :  { %v7468_v54 = vmul.f32 %v9563_v4, %v9537_v12  ;;  %v7436_v15 = vpop.f32.mrb[253].mxu1  ;;  %v5676_v9 = vpop.xlane.xlu0 %5675  ;;  %7505 = vadd.xlane.f32.xlu0 %v7504_v60  ;;  %7502 = vadd.xlane.f32.xlu1 %v7501_v27 }
 0x372   :  { %v5736_v41 = vsel %vm726_vm5, %v5735_v5, %v5731_v8  ;;  %v7467_v37 = vmul.f32 %v7436_v15, %v7291_v34  ;;  %v5750_v40 = vrot.slane %v5676_v9, %v11870_v31 }
 0x373   :  { %v5673_v44 = vpop.xlane.xlu1 %5672  ;;  %v9540_v14 = vpop.f32.mrb[254].mxu0  ;;  %v7510_v29 = vsel %vm645_vm3, %v7468_v54, 0.0  ;;  %v5741_v56 = vsel %vm733_vm6, %v5740_v53, %v5736_v41 }
 0x374   :  { %v5745_v58 = vrot.slane %v5673_v44, %v10765_v35  ;;  %v9566_v46 = vpop.f32.mrb[254].mxu1  ;;  %v7301_v43 = vpop.f32.mrb[255].mxu0  ;;  %v7507_v13 = vsel %vm645_vm3, %v7467_v37, 0.0 }
 0x375   :  { %v7470_v57 = vmul.f32 %v9566_v46, %v9540_v14  ;;  %v7446_v18 = vpop.f32.mrb[255].mxu1  ;;  %v5682_v33 = vpop.xlane.xlu0 %5681  ;;  %7511 = vadd.xlane.f32.xlu0 %v7510_v29  ;;  %7508 = vadd.xlane.f32.xlu1 %v7507_v13 }
 0x376   :  { %v5746_v20 = vsel %vm740_vm7, %v5745_v58, %v5741_v56  ;;  %v7469_v17 = vmul.f32 %v7446_v18, %v7301_v43  ;;  %v5760_v36 = vrot.slane %v5682_v33, %v10803_v7 }
 0x377   :  { %v5679_v62 = vpop.xlane.xlu1 %5678  ;;  %v7516_v23 = vsel %vm645_vm3, %v7470_v57, 0.0  ;;  %v5751_v30 = vsel %vm747_vm8, %v5750_v40, %v5746_v20 }
 0x378   :  { %v5755_v22 = vrot.slane %v5679_v62, %v11871_v47  ;;  %v7513_v59 = vsel %vm645_vm3, %v7469_v17, 0.0  ;;  %vm11887_vm3 = vmmov %vm11886_vm0 }
 0x379   :  { %v5688_v45 = vpop.xlane.xlu0 %5687  ;;  %7517 = vadd.xlane.f32.xlu0 %v7516_v23  ;;  %7514 = vadd.xlane.f32.xlu1 %v7513_v59  ;;  %vm11888_vm0 = vmmov %vm11885_vm13 }
 0x37a   :  { %v5756_v28 = vsel %vm754_vm9, %v5755_v22, %v5751_v30  ;;  %v5770_v50 = vrot.slane %v5688_v45, %v11873_v32 }
 0x37b   :  { %v5685_v61 = vpop.xlane.xlu1 %5684  ;;  %v5761_v52 = vsel %vm761_vm10, %v5760_v36, %v5756_v28 }
 0x37c   :  { %v5765_v26 = vrot.slane %v5685_v61, %v10811_v11 }
 0x37d   :  { %v5694_v25 = vpop.xlane.xlu0 %5693  ;;  %7064 = vadd.xlane.f32.xlu1 %v7063_v2 }
 0x37e   :  { %v5766_v1 = vsel %vm768_vm11, %v5765_v26, %v5761_v52  ;;  %v5780_v12 = vrot.slane %v5694_v25, %v10848_v39 }
 0x37f   :  { %v5691_v38 = vpop.xlane.xlu1 %5690  ;;  %v5771_v21 = vsel %vm775_vm12, %v5770_v50, %v5766_v1 }
 0x380   :  { %v5775_v49 = vrot.slane %v5691_v38, %v11874_v42 }
 0x381   :  { %v5700_v6 = vpop.xlane.xlu0 %5699 }
 0x382   :  { %v5776_v16 = vsel %vm11885_vm13, %v5775_v49, %v5771_v21  ;;  %v5790_v27 = vrot.slane %v5700_v6, %v10880_v55  ;;  %vm11889_vm13 = vmmov %vm11887_vm3 }
 0x383   :  { %v5697_v60 = vpop.xlane.xlu1 %5696  ;;  %v5781_v5 = vsel %vm789_vm14, %v5780_v12, %v5776_v16 }
 0x384   :  { %v5785_v10 = vrot.slane %v5697_v60, %v10859_v51 }
 0x385   :  { %v5706_v4 = vpop.xlane.xlu0 %5705 }
 0x386   :  { %v5786_v34 = vsel %vm11887_vm3, %v5785_v10, %v5781_v5  ;;  %v5800_v15 = vrot.slane %v5706_v4, %v10893_v24  ;;  %vm11890_vm3 = vmmov %vm11888_vm0 }
 0x387   :  { %v5703_v8 = vpop.xlane.xlu1 %5702  ;;  %v5791_v9 = vsel %vm803_vm1, %v5790_v27, %v5786_v34 }
 0x388   :  { %v5795_v54 = vrot.slane %v5703_v8, %v10887_v3 }
 0x389   :  { %v6117_v41 = vpop.xlane.xlu0 %6116 }
 0x38a   :  { %v5796_v37 = vsel %vm810_vm2, %v5795_v54, %v5791_v9  ;;  %v6183_v14 = vrot.slane %v6117_v41, %v10724_v63 }
 0x38b   :  { %v5801_v53 = vsel %vm817_vm15, %v5800_v15, %v5796_v37  ;;  %v6114_v44 = vpop.xlane.xlu1 %6113 }
 0x38c   :  { %5803 = vst [vmem:[#allocation2 + $0xb] sm:$0x1] %v5801_v53  ;;  %v6179_v29 = vrot.slane %v6114_v44, %v10728_v0 }
 0x38d   :  { %v6123_v58 = vpop.xlane.xlu0 %6122 }
 0x38e   :  { %v6184_v13 = vsel %vm719_vm4, %v6183_v14, %v6179_v29  ;;  %v6193_v18 = vrot.slane %v6123_v58, %v10760_v48 }
 0x38f   :  { %v6120_v46 = vpop.xlane.xlu1 %6119 }
 0x390   :  { %v6188_v43 = vrot.slane %v6120_v46, %v10740_v19 }
 0x391   :  { %v6129_v56 = vpop.xlane.xlu0 %6128 }
 0x392   :  { %v6189_v57 = vsel %vm726_vm5, %v6188_v43, %v6184_v13  ;;  %v6203_v23 = vrot.slane %v6129_v56, %v11870_v31 }
 0x393   :  { %v6126_v33 = vpop.xlane.xlu1 %6125  ;;  %v6194_v17 = vsel %vm733_vm6, %v6193_v18, %v6189_v57 }
 0x394   :  { %v6198_v20 = vrot.slane %v6126_v33, %v10765_v35 }
 0x395   :  { %v6135_v40 = vpop.xlane.xlu0 %6134 }
 0x396   :  { %v6199_v62 = vsel %vm740_vm7, %v6198_v20, %v6194_v17  ;;  %v6213_v36 = vrot.slane %v6135_v40, %v10803_v7 }
 0x397   :  { %v6132_v22 = vpop.xlane.xlu1 %6131  ;;  %v6204_v30 = vsel %vm747_vm8, %v6203_v23, %v6199_v62 }
 0x398   :  { %v6208_v59 = vrot.slane %v6132_v22, %v11871_v47 }
 0x399   :  { %v6141_v45 = vpop.xlane.xlu0 %6140 }
 0x39a   :  { %v6209_v28 = vsel %vm754_vm9, %v6208_v59, %v6204_v30  ;;  %v6223_v1 = vrot.slane %v6141_v45, %v11873_v32 }
 0x39b   :  { %v6138_v61 = vpop.xlane.xlu1 %6137  ;;  %v6214_v2 = vsel %vm761_vm10, %v6213_v36, %v6209_v28 }
 0x39c   :  { %v6218_v26 = vrot.slane %v6138_v61, %v10811_v11 }
 0x39d   :  { %v6147_v52 = vpop.xlane.xlu0 %6146 }
 0x39e   :  { %v6219_v25 = vsel %vm768_vm11, %v6218_v26, %v6214_v2  ;;  %v6233_v16 = vrot.slane %v6147_v52, %v10848_v39 }
 0x39f   :  { %v6144_v50 = vpop.xlane.xlu1 %6143  ;;  %v6224_v49 = vsel %vm775_vm12, %v6223_v1, %v6219_v25 }
 0x3a0   :  { %v6228_v38 = vrot.slane %v6144_v50, %v11874_v42 }
 0x3a1   :  { %v6153_v21 = vpop.xlane.xlu0 %6152 }
 0x3a2   :  { %v6229_v6 = vsel %vm11888_vm0, %v6228_v38, %v6224_v49  ;;  %v6243_v34 = vrot.slane %v6153_v21, %v10880_v55  ;;  %vm11891_vm0 = vmmov %vm11889_vm13 }
 0x3a3   :  { %v6150_v12 = vpop.xlane.xlu1 %6149  ;;  %v6234_v10 = vsel %vm789_vm14, %v6233_v16, %v6229_v6 }
 0x3a4   :  { %v6238_v60 = vrot.slane %v6150_v12, %v10859_v51 }
 0x3a5   :  { %v6159_v5 = vpop.xlane.xlu0 %6158 }
 0x3a6   :  { %v6239_v4 = vsel %vm11889_vm13, %v6238_v60, %v6234_v10  ;;  %v6253_v54 = vrot.slane %v6159_v5, %v10893_v24 }
 0x3a7   :  { %v6156_v27 = vpop.xlane.xlu1 %6155  ;;  %v6244_v15 = vsel %vm803_vm1, %v6243_v34, %v6239_v4 }
 0x3a8   :  { %v6248_v8 = vrot.slane %v6156_v27, %v10887_v3 }
 0x3a9   :  { %v6570_v9 = vpop.xlane.xlu0 %6569 }
 0x3aa   :  { %v6249_v41 = vsel %vm810_vm2, %v6248_v8, %v6244_v15  ;;  %v6636_v44 = vrot.slane %v6570_v9, %v10724_v63 }
 0x3ab   :  { %v6254_v37 = vsel %vm817_vm15, %v6253_v54, %v6249_v41  ;;  %v6567_v53 = vpop.xlane.xlu1 %6566 }
 0x3ac   :  { %6256 = vst [vmem:[#allocation2 + $0xc] sm:$0x1] %v6254_v37  ;;  %v6632_v14 = vrot.slane %v6567_v53, %v10728_v0 }
 0x3ad   :  { %v6576_v29 = vpop.xlane.xlu0 %6575 }
 0x3ae   :  { %v6637_v43 = vsel %vm719_vm4, %v6636_v44, %v6632_v14  ;;  %v6646_v57 = vrot.slane %v6576_v29, %v10760_v48 }
 0x3af   :  { %v6573_v58 = vpop.xlane.xlu1 %6572 }
 0x3b0   :  { %v6641_v46 = vrot.slane %v6573_v58, %v10740_v19 }
 0x3b1   :  { %v6582_v13 = vpop.xlane.xlu0 %6581 }
 0x3b2   :  { %v6642_v56 = vsel %vm726_vm5, %v6641_v46, %v6637_v43  ;;  %v6656_v62 = vrot.slane %v6582_v13, %v11870_v31 }
 0x3b3   :  { %v6579_v18 = vpop.xlane.xlu1 %6578  ;;  %v6647_v20 = vsel %vm733_vm6, %v6646_v57, %v6642_v56 }
 0x3b4   :  { %v6651_v33 = vrot.slane %v6579_v18, %v10765_v35 }
 0x3b5   :  { %v6588_v17 = vpop.xlane.xlu0 %6587 }
 0x3b6   :  { %v6652_v40 = vsel %vm740_vm7, %v6651_v33, %v6647_v20  ;;  %v6666_v28 = vrot.slane %v6588_v17, %v10803_v7 }
 0x3b7   :  { %v6585_v23 = vpop.xlane.xlu1 %6584  ;;  %v6657_v59 = vsel %vm747_vm8, %v6656_v62, %v6652_v40 }
 0x3b8   :  { %v6661_v22 = vrot.slane %v6585_v23, %v11871_v47 }
 0x3b9   :  { %v6594_v30 = vpop.xlane.xlu0 %6593 }
 0x3ba   :  { %v6662_v45 = vsel %vm754_vm9, %v6661_v22, %v6657_v59  ;;  %v6676_v25 = vrot.slane %v6594_v30, %v11873_v32 }
 0x3bb   :  { %v6591_v36 = vpop.xlane.xlu1 %6590  ;;  %v6667_v26 = vsel %vm761_vm10, %v6666_v28, %v6662_v45 }
 0x3bc   :  { %v6671_v61 = vrot.slane %v6591_v36, %v10811_v11 }
 0x3bd   :  { %v6600_v2 = vpop.xlane.xlu0 %6599 }
 0x3be   :  { %v6672_v52 = vsel %vm768_vm11, %v6671_v61, %v6667_v26  ;;  %v6686_v6 = vrot.slane %v6600_v2, %v10848_v39 }
 0x3bf   :  { %v6597_v1 = vpop.xlane.xlu1 %6596  ;;  %v6677_v38 = vsel %vm775_vm12, %v6676_v25, %v6672_v52 }
 0x3c0   :  { %v6681_v50 = vrot.slane %v6597_v1, %v11874_v42 }
 0x3c1   :  { %v6606_v49 = vpop.xlane.xlu0 %6605 }
 0x3c2   :  { %v6682_v21 = vsel %vm11890_vm3, %v6681_v50, %v6677_v38  ;;  %v6696_v4 = vrot.slane %v6606_v49, %v10880_v55 }
 0x3c3   :  { %v6603_v16 = vpop.xlane.xlu1 %6602  ;;  %v6687_v60 = vsel %vm789_vm14, %v6686_v6, %v6682_v21 }
 0x3c4   :  { %v6691_v12 = vrot.slane %v6603_v16, %v10859_v51 }
 0x3c5   :  { %v6612_v10 = vpop.xlane.xlu0 %6611 }
 0x3c6   :  { %v6692_v5 = vsel %vm11891_vm0, %v6691_v12, %v6687_v60  ;;  %v6706_v8 = vrot.slane %v6612_v10, %v10893_v24 }
 0x3c7   :  { %v6609_v34 = vpop.xlane.xlu1 %6608  ;;  %v6697_v54 = vsel %vm803_vm1, %v6696_v4, %v6692_v5 }
 0x3c8   :  { %v6701_v27 = vrot.slane %v6609_v34, %v10887_v3 }
 0x3ca   :  { %v6702_v15 = vsel %vm810_vm2, %v6701_v27, %v6697_v54  ;;  %v7020_v9 = vpop.xlane.xlu0 %7019 }
 0x3cb   :  { %v6707_v41 = vsel %vm817_vm15, %v6706_v8, %v6702_v15  ;;  %v7023_v37 = vpop.xlane.xlu1 %7022  ;;  %v7085_v30 = vrot.slane %v7020_v9, %v10728_v0 }
 0x3cc   :  { %6709 = vst [vmem:[#allocation2 + $0xd] sm:$0x1] %v6707_v41  ;;  %v7089_v45 = vrot.slane %v7023_v37, %v10724_v63 }
 0x3ce   :  { %v7026_v53 = vpop.xlane.xlu0 %7025  ;;  %v7090_v1 = vsel %vm719_vm4, %v7089_v45, %v7085_v30 }
 0x3cf   :  { %v7029_v44 = vpop.xlane.xlu1 %7028  ;;  %v7094_v36 = vrot.slane %v7026_v53, %v10740_v19 }
 0x3d0   :  { %v7099_v50 = vrot.slane %v7029_v44, %v10760_v48 }
 0x3d2   :  { %v7032_v14 = vpop.xlane.xlu0 %7031 }
 0x3d3   :  { %v7035_v29 = vpop.xlane.xlu1 %7034  ;;  %v7104_v38 = vrot.slane %v7032_v14, %v10765_v35 }
 0x3d4   :  { %v7109_v60 = vrot.slane %v7035_v29, %v11870_v31 }
 0x3d6   :  { %v7038_v58 = vpop.xlane.xlu0 %7037 }
 0x3d7   :  { %v7041_v46 = vpop.xlane.xlu1 %7040  ;;  %v7114_v5 = vrot.slane %v7038_v58, %v11871_v47 }
 0x3d8   :  { %v7119_v15 = vrot.slane %v7041_v46, %v10803_v7 }
 0x3da   :  { %v7044_v43 = vpop.xlane.xlu0 %7043 }
 0x3db   :  { %v11748_v13 = vpop.xlane.xlu1 %7046  ;;  %v7124_v41 = vrot.slane %v7044_v43, %v10811_v11 }
 0x3dc   :  { %v7129_v58 = vrot.slane %v11748_v13, %v11873_v32 }
 0x3de   :  { %v11750_v56 = vpop.xlane.xlu0 %7049 }
 0x3df   :  { %v11752_v57 = vpop.xlane.xlu1 %7052 }
 0x3e2   :  { %v11754_v18 = vpop.xlane.xlu0 %7055 }
 0x3e3   :  { %v11756_v33 = vpop.xlane.xlu1 %7058 }
 0x3e6   :  { %v11758_v20 = vpop.xlane.xlu0 %7061 }
 0x3e9   :  { %v7476_v17 = vpop.xlane.xlu1 %7475 }
 0x3ea   :  { %v7473_v40 = vpop.xlane.xlu0 %7472  ;;  %v7542_v62 = vrot.slane %v7476_v17, %v10724_v63  ;;  %v7095_v63 = vsel %vm726_vm5, %v7094_v36, %v7090_v1 }
 0x3eb   :  { %v7538_v23 = vrot.slane %v7473_v40, %v10728_v0  ;;  %v7100_v12 = vsel %vm733_vm6, %v7099_v50, %v7095_v63 }
 0x3ec   :  { %v7105_v10 = vsel %vm740_vm7, %v7104_v38, %v7100_v12 }
 0x3ed   :  { %v7543_v61 = vsel %vm719_vm4, %v7542_v62, %v7538_v23  ;;  %v7110_v54 = vsel %vm747_vm8, %v7109_v60, %v7105_v10  ;;  %vm11892_vm4 = vmmov %vm11890_vm3 }
 0x3ee   :  { %v7482_v22 = vpop.xlane.xlu0 %7481  ;;  %v7479_v59 = vpop.xlane.xlu1 %7478  ;;  %v7115_v9 = vsel %vm754_vm9, %v7114_v5, %v7110_v54 }
 0x3ef   :  { %v7547_v28 = vrot.slane %v7479_v59, %v10740_v19  ;;  %v7552_v26 = vrot.slane %v7482_v22, %v10760_v48  ;;  %v7120_v29 = vsel %vm761_vm10, %v7119_v15, %v7115_v9 }
 0x3f0   :  { %v7125_v46 = vsel %vm768_vm11, %v7124_v41, %v7120_v29 }
 0x3f1   :  { %v7548_v2 = vsel %vm726_vm5, %v7547_v28, %v7543_v61  ;;  %v7130_v22 = vsel %vm775_vm12, %v7129_v58, %v7125_v46  ;;  %vm11893_vm5 = vmmov %vm11890_vm3 }
 0x3f2   :  { %v7488_v52 = vpop.xlane.xlu0 %7487  ;;  %v7485_v25 = vpop.xlane.xlu1 %7484  ;;  %v7553_v49 = vsel %vm733_vm6, %v7552_v26, %v7548_v2  ;;  %vm11894_vm6 = vmmov %vm11891_vm0 }
 0x3f3   :  { %v7557_v0 = vrot.slane %v7485_v25, %v10765_v35  ;;  %v7562_v19 = vrot.slane %v7488_v52, %v11870_v31 }
 0x3f5   :  { %v7558_v21 = vsel %vm740_vm7, %v7557_v0, %v7553_v49  ;;  %vm11895_vm7 = vmmov %vm11891_vm0 }
 0x3f6   :  { %v7494_v6 = vpop.xlane.xlu0 %7493  ;;  %v7491_v16 = vpop.xlane.xlu1 %7490  ;;  %v7563_v4 = vsel %vm747_vm8, %v7562_v19, %v7558_v21 }
 0x3f7   :  { %v7567_v48 = vrot.slane %v7491_v16, %v11871_v47  ;;  %v7572_v35 = vrot.slane %v7494_v6, %v10803_v7 }
 0x3f9   :  { %v7568_v34 = vsel %vm754_vm9, %v7567_v48, %v7563_v4 }
 0x3fa   :  { %v7500_v27 = vpop.xlane.xlu0 %7499  ;;  %v7497_v8 = vpop.xlane.xlu1 %7496  ;;  %v7573_v37 = vsel %vm761_vm10, %v7572_v35, %v7568_v34 }
 0x3fb   :  { %v7577_v31 = vrot.slane %v7497_v8, %v10811_v11  ;;  %v7582_v47 = vrot.slane %v7500_v27, %v11873_v32  ;;  %v7134_v11 = vrot.slane %v11750_v56, %v11874_v42  ;;  %v7139_v32 = vrot.slane %v11752_v57, %v10848_v39 }
 0x3fd   :  { %v7578_v53 = vsel %vm768_vm11, %v7577_v31, %v7573_v37  ;;  %v7135_v59 = vsel %vm11893_vm5, %v7134_v11, %v7130_v22 }
 0x3fe   :  { %v7506_v44 = vpop.xlane.xlu0 %7505  ;;  %v7503_v14 = vpop.xlane.xlu1 %7502  ;;  %v7583_v17 = vsel %vm775_vm12, %v7582_v47, %v7578_v53  ;;  %v7140_v61 = vsel %vm789_vm14, %v7139_v32, %v7135_v59 }
 0x3ff   :  { %v7587_v7 = vrot.slane %v7503_v14, %v11874_v42  ;;  %v7592_v43 = vrot.slane %v7506_v44, %v10848_v39  ;;  %v7144_v42 = vrot.slane %v11754_v18, %v10859_v51  ;;  %v7149_v39 = vrot.slane %v11756_v33, %v10880_v55 }
 0x401   :  { %v7588_v40 = vsel %vm11892_vm4, %v7587_v7, %v7583_v17  ;;  %v7145_v2 = vsel %vm11895_vm7, %v7144_v42, %v7140_v61 }
 0x402   :  { %v7512_v62 = vpop.xlane.xlu0 %7511  ;;  %v7509_v23 = vpop.xlane.xlu1 %7508  ;;  %v7593_v30 = vsel %vm789_vm14, %v7592_v43, %v7588_v40 }
 0x403   :  { %v7597_v13 = vrot.slane %v7509_v23, %v10859_v51  ;;  %v7602_v56 = vrot.slane %v7512_v62, %v10880_v55  ;;  %v7154_v51 = vrot.slane %v11758_v20, %v10887_v3  ;;  %v7150_v55 = vsel %vm803_vm1, %v7149_v39, %v7145_v2 }
 0x405   :  { %v7598_v45 = vsel %vm11894_vm6, %v7597_v13, %v7593_v30  ;;  %v7155_v50 = vsel %vm810_vm2, %v7154_v51, %v7150_v55 }
 0x406   :  { %v7518_v28 = vpop.xlane.xlu0 %7517  ;;  %v7515_v36 = vpop.xlane.xlu1 %7514  ;;  %v7603_v18 = vsel %vm803_vm1, %v7602_v56, %v7598_v45 }
 0x407   :  { %v7612_v57 = vrot.slane %v7518_v28, %v10893_v24  ;;  %v7607_v26 = vrot.slane %v7515_v36, %v10887_v3 }
 0x409   :  { %v7608_v52 = vsel %vm810_vm2, %v7607_v26, %v7603_v18 }
 0x40a   :  { %v7613_v25 = vsel %vm817_vm15, %v7612_v57, %v7608_v52  ;;  %v7065_v1 = vpop.xlane.xlu1 %7064 }
 0x40b   :  { %7615 = vst [vmem:[#allocation2 + $0xf] sm:$0x1] %v7613_v25  ;;  %v7159_v33 = vrot.slane %v7065_v1, %v10893_v24 }
 0x40d   :  { %v7160_v0 = vsel %vm817_vm15, %v7159_v33, %v7155_v50 }
 0x40e   :  { %7162 = vst [vmem:[#allocation2 + $0xe] sm:$0x1] %v7160_v0 }
 0x40f   :  { %9585 = shalt.err (!%p9582_p4)
}
 0x410   :  { %s9586_s27 = scalar_lea.hbm %s11843_s3, 256 }
 0x411   :  { %p9587_p5 = scmp.ne.s32.totalorder %s11843_s3, %s9586_s27  ;;  %p9590_p6 = scmp.lt.u32.totalorder %s9586_s27, %s11843_s3 }
 0x413   :  { %p9592_p7 = pnand %p9590_p6, %p9587_p5 }
 0x415   :  { %9595 = shalt.err (!%p9592_p7)
}
 0x416   :  { %s9601_s5 = smov 128   ;;  %s9602_s6 = smov 8  }
 0x417   :  { %7627 = dma.vmem_to_hbm [thread:$0]  %s7622_s25, 256, %s11843_s3, [#allocation3], %s9601_s5, %s9601_s5, %s9602_s6  }
 0x418   :  { %9596 = dma.done.wait [#allocation3], 256  }
 0x419   :  { %9597 = vsyncadd [#allocation3], 4294967040 }
 0x41a   :  { %7631 = vsyncpa [#allocation3], 1 }

</bundles_post_ra>
